<compile_context>
chip_gen: v5e
topology: v5e:2x2
jax: 0.10.0
libtpu: 0.0.40
codegen_flags: <defaults>
</compile_context>

<pallas_src>
import functools

import jax
import jax.numpy as jnp
from jax import lax
from jax.experimental import pallas as pl
from jax.experimental.pallas import tpu as pltpu


# ----------------------------------------------------------------------------
# MobileNetV3-Large config: (in_c, kernel, expanded_c, out_c, use_se, activation, stride)
# ----------------------------------------------------------------------------
BNECK = [
    (16, 3, 16, 16, False, "relu", 1),
    (16, 3, 64, 24, False, "relu", 2),
    (24, 3, 72, 24, False, "relu", 1),
    (24, 5, 72, 40, True, "relu", 2),
    (40, 5, 120, 40, True, "relu", 1),
    (40, 5, 120, 40, True, "relu", 1),
    (40, 3, 240, 80, False, "hardswish", 2),
    (80, 3, 200, 80, False, "hardswish", 1),
    (80, 3, 184, 80, False, "hardswish", 1),
    (80, 3, 184, 80, False, "hardswish", 1),
    (80, 3, 480, 112, True, "hardswish", 1),
    (112, 3, 672, 112, True, "hardswish", 1),
    (112, 5, 672, 160, True, "hardswish", 2),
    (160, 5, 960, 160, True, "hardswish", 1),
    (160, 5, 960, 160, True, "hardswish", 1),
]


def make_divisible(v, divisor=8):
    new_v = max(divisor, int(v + divisor / 2) // divisor * divisor)
    if new_v < 0.9 * v:
        new_v += divisor
    return new_v


def _act_fn(x, act):
    if act == "relu":
        return jnp.maximum(x, 0.0)
    if act == "hardswish":
        return x * (jnp.clip(x + 3.0, 0.0, 6.0) * (1.0 / 6.0))
    if act == "hardsigmoid":
        return jnp.clip(x + 3.0, 0.0, 6.0) * (1.0 / 6.0)
    return x  # identity


_CPARAMS = pltpu.CompilerParams(
    dimension_semantics=("parallel",),
    vmem_limit_bytes=32 * 1024 * 1024,
)


# ----------------------------------------------------------------------------
# Kernel 1: tiled matmul + bias + activation (stem conv via im2col)
# ----------------------------------------------------------------------------
def _mm_kernel(act, x_ref, w_ref, b_ref, o_ref):
    y = jnp.dot(x_ref[...], w_ref[...], preferred_element_type=jnp.float32)
    o_ref[...] = _act_fn(y + b_ref[...], act).astype(o_ref.dtype)


def pallas_matmul(x, w, b, act="identity", out_dtype=jnp.bfloat16):
    M, K = x.shape
    N = w.shape[1]
    TM = M
    for cand in (1024, 512, 256, 128):          # >=2 grid steps for v7x megacore at these sizes
        if M % cand == 0:
            TM = cand
            break
    return pl.pallas_call(
        functools.partial(_mm_kernel, act),
        out_shape=jax.ShapeDtypeStruct((M, N), out_dtype),
        grid=(M // TM,),
        in_specs=[
            pl.BlockSpec((TM, K), lambda i: (i, 0)),
            pl.BlockSpec((K, N), lambda i: (0, 0)),    # weight resident across M tiles
            pl.BlockSpec((1, N), lambda i: (0, 0)),
        ],
        out_specs=pl.BlockSpec((TM, N), lambda i: (i, 0)),
        compiler_params=_CPARAMS,
    )(x, w, b)


# ----------------------------------------------------------------------------
# Kernel 2: fully fused InvertedResidual block, one grid step per batch element.
#   expand 1x1 -> polyphase padded scratch (bf16) -> depthwise kxk -> SE -> project 1x1
#   (+ residual from the block-input ref).  Optionally fuses the 160->960 head conv +
#   hardswish + global average pool (last block).
# ----------------------------------------------------------------------------
def _block_kernel(k, s, act, Hh, Wh, Ho, Wo,
                  has_expand, has_se, has_res, has_head,
                  x_ref, *refs):
    refs = list(refs)
    ex_ref = refs.pop()          # VMEM scratch (last)
    o_ref = refs.pop()           # output ref
    pos = 0
    we_ref = be_ref = None
    if has_expand:
        we_ref, be_ref = refs[pos], refs[pos + 1]
        pos += 2
    wd_ref, bd_ref = refs[pos], refs[pos + 1]
    pos += 2
    w1_ref = b1_ref = w2_ref = b2_ref = None
    if has_se:
        w1_ref, b1_ref, w2_ref, b2_ref = refs[pos:pos + 4]
        pos += 4
    wp_ref, bp_ref = refs[pos], refs[pos + 1]
    pos += 2
    wh_ref = bh_ref = None
    if has_head:
        wh_ref, bh_ref = refs[pos], refs[pos + 1]
        pos += 2

    p = (k - 1) // 2
    Hph = Ho + (k - 1) // s
    Wph = Wo + (k - 1) // s
    C = ex_ref.shape[-1]

    # ---- expand 1x1 per phase + scatter rows into the zero-padded polyphase scratch ----------
    for a in range(s):
        ra = (a - p) % s
        sa = (ra + p - a) // s
        for b in range(s):
            rb = (b - p) % s
            sb = (rb + p - b) // s

            # zero only the halo border (interior rows are fully overwritten below)
            if sa > 0:
                ex_ref[a, b, 0:sa, :, :] = jnp.zeros((sa, Wph, C), ex_ref.dtype)
            if sa + Hh < Hph:
                ex_ref[a, b, sa + Hh:Hph, :, :] = jnp.zeros((Hph - sa - Hh, Wph, C), ex_ref.dtype)
            if sb > 0:
                ex_ref[a, b, :, 0:sb, :] = jnp.zeros((Hph, sb, C), ex_ref.dtype)
            if sb + Wh < Wph:
                ex_ref[a, b, :, sb + Wh:Wph, :] = jnp.zeros((Hph, Wph - sb - Wh, C), ex_ref.dtype)

            xp = x_ref[0, ra * s + rb]                                  # (Hh*Wh, cin) bf16
            if has_expand:
                e_ph = jnp.dot(xp, we_ref[...], preferred_element_type=jnp.float32)
                e_ph = _act_fn(e_ph + be_ref[...], act).astype(ex_ref.dtype)
            else:
                e_ph = xp.astype(ex_ref.dtype)
            for h in range(Hh):
                ex_ref[a, b, sa + h, sb:sb + Wh, :] = e_ph[h * Wh:(h + 1) * Wh, :]

    # ---- depthwise conv (+BN+act): W-axis (sublane) realignment hoisted out of the dy loop ---
    accs = [None, None]
    t = 0
    for dx in range(k):
        pb = dx % s
        woff = dx // s
        slabs = [ex_ref[a, pb, :, woff:woff + Wo, :].astype(jnp.float32)  # (Hph, Wo, C) f32
                 for a in range(s)]
        for dy in range(k):
            win = slabs[dy % s][dy // s:dy // s + Ho]                    # (Ho, Wo, C), free slice
            term = win * wd_ref[dy * k + dx]                             # per-channel f32 weight
            i = t % 2
            accs[i] = term if accs[i] is None else accs[i] + term
            t += 1
    acc = accs[0] + accs[1]
    y = _act_fn(acc + bd_ref[...], act)                                  # (Ho, Wo, C) f32

    # ---- fused Squeeze-Excitation ------------------------------------------------------------
    if has_se:
        sq = jnp.mean(jnp.mean(y, axis=0), axis=0, keepdims=True)        # (1, C) f32
        h1 = jnp.dot(sq.astype(jnp.bfloat16), w1_ref[...],
                     preferred_element_type=jnp.float32) + b1_ref[...]
        h1 = jnp.maximum(h1, 0.0)
        sc = jnp.dot(h1.astype(jnp.bfloat16), w2_ref[...],
                     preferred_element_type=jnp.float32) + b2_ref[...]
        y = y * _act_fn(sc, "hardsigmoid")

    # ---- project 1x1 (+residual) per output row; optional fused head conv + avg pool ---------
    y_bf = y.astype(jnp.bfloat16)
    pooled = None
    for h in range(Ho):
        row = jnp.dot(y_bf[h], wp_ref[...], preferred_element_type=jnp.float32) + bp_ref[...]
        if has_res:
            row = row + x_ref[0, 0, h * Wo:(h + 1) * Wo, :].astype(jnp.float32)
        if has_head:
            hr = jnp.dot(row.astype(jnp.bfloat16), wh_ref[...],
                         preferred_element_type=jnp.float32) + bh_ref[...]
            hr = _act_fn(hr, "hardswish")
            srow = jnp.sum(hr, axis=0, keepdims=True)                    # (1, Chead)
            pooled = srow if pooled is None else pooled + srow
        else:
            o_ref[0, h] = row.astype(o_ref.dtype)
    if has_head:
        o_ref[0] = (pooled * (1.0 / (Ho * Wo))).astype(o_ref.dtype)


def pallas_block(x_ph, blk, cfg, H, W, head=None):
    cin, k, exp, cout, use_se, act, stride = cfg
    N, ss, HhWh, _ = x_ph.shape
    Hh, Wh = H // stride, W // stride
    Ho, Wo = H // stride, W // stride
    Hph = Ho + (k - 1) // stride
    Wph = Wo + (k - 1) // stride
    has_res = (stride == 1 and cin == cout)

    in_specs = [pl.BlockSpec((1, ss, HhWh, cin), lambda n: (n, 0, 0, 0))]
    args = [x_ph]
    if "expand" in blk:
        in_specs += [pl.BlockSpec((cin, exp), lambda n: (0, 0)),
                     pl.BlockSpec((1, exp), lambda n: (0, 0))]
        args += [blk["expand"]["w"], blk["expand"]["b"]]
    in_specs += [pl.BlockSpec((k * k, 1, exp), lambda n: (0, 0, 0)),
                 pl.BlockSpec((1, exp), lambda n: (0, 0))]
    args += [blk["dw"]["w"], blk["dw"]["b"]]
    if use_se:
        se = blk["se"]
        sq_ch = se["w1"].shape[1]
        in_specs += [pl.BlockSpec((exp, sq_ch), lambda n: (0, 0)),
                     pl.BlockSpec((1, sq_ch), lambda n: (0, 0)),
                     pl.BlockSpec((sq_ch, exp), lambda n: (0, 0)),
                     pl.BlockSpec((1, exp), lambda n: (0, 0))]
        args += [se["w1"], se["b1"], se["w2"], se["b2"]]
    in_specs += [pl.BlockSpec((exp, cout), lambda n: (0, 0)),
                 pl.BlockSpec((1, cout), lambda n: (0, 0))]
    args += [blk["project"]["w"], blk["project"]["b"]]
    if head is not None:
        c_head = head["w"].shape[1]
        in_specs += [pl.BlockSpec((cout, c_head), lambda n: (0, 0)),
                     pl.BlockSpec((1, c_head), lambda n: (0, 0))]
        args += [head["w"], head["b"]]
        out_shape = jax.ShapeDtypeStruct((N, 1, c_head), jnp.float32)
        out_spec = pl.BlockSpec((1, 1, c_head), lambda n: (n, 0, 0))
    else:
        out_shape = jax.ShapeDtypeStruct((N, Ho, Wo, cout), jnp.bfloat16)
        out_spec = pl.BlockSpec((1, Ho, Wo, cout), lambda n: (n, 0, 0, 0))

    kern = functools.partial(_block_kernel, k, stride, act, Hh, Wh, Ho, Wo,
                             "expand" in blk, use_se, has_res, head is not None)
    return pl.pallas_call(
        kern,
        out_shape=out_shape,
        grid=(N,),
        in_specs=in_specs,
        out_specs=out_spec,
        scratch_shapes=[pltpu.VMEM((stride, stride, Hph, Wph, exp), jnp.bfloat16)],
        compiler_params=_CPARAMS,
    )(*args)


def run_block(blk, cfg, x_nhwc, head=None):
    """Prepare the (cheap, small) polyphase input layout and run the fused block kernel."""
    cin, k, exp, cout, use_se, act, stride = cfg
    N, H, W, _ = x_nhwc.shape
    if stride == 2:
        assert H % 2 == 0 and W % 2 == 0, "stride-2 blocks require even spatial dims"
        Hh, Wh = H // 2, W // 2
        x_ph = (x_nhwc.reshape(N, Hh, 2, Wh, 2, cin)
                .transpose(0, 2, 4, 1, 3, 5)
                .reshape(N, 4, Hh * Wh, cin))
    else:
        x_ph = x_nhwc.reshape(N, 1, H * W, cin)
    return pallas_block(x_ph, blk, cfg, H, W, head=head)


# ----------------------------------------------------------------------------
# JAX glue: im2col for the 3-channel stem conv
# ----------------------------------------------------------------------------
def stem_im2col(x, k=3, stride=2):
    N, H, W, C = x.shape
    p = (k - 1) // 2
    xp = jnp.pad(x, ((0, 0), (p, p), (p, p), (0, 0)))
    Ho = (H + 2 * p - k) // stride + 1
    Wo = (W + 2 * p - k) // stride + 1
    cols = []
    for dy in range(k):
        for dx in range(k):
            cols.append(xp[:, dy:dy + stride * Ho:stride, dx:dx + stride * Wo:stride, :])
    patches = jnp.concatenate(cols, axis=-1)                 # (N, Ho, Wo, k*k*C)
    return patches.reshape(N * Ho * Wo, k * k * C), Ho, Wo


# ----------------------------------------------------------------------------
# Deterministic synthetic parameters (BN folded; scale pre-folded into weights)
# ----------------------------------------------------------------------------
class KeyGen:
    def __init__(self, seed):
        self.key = jax.random.PRNGKey(seed)
        self.i = 0

    def __call__(self):
        self.i += 1
        return jax.random.fold_in(self.key, self.i)


def bn_fold(kg, c, eps=1e-3):
    gamma = 1.0 + 0.1 * jax.random.normal(kg(), (c,), jnp.float32)
    beta = 0.1 * jax.random.normal(kg(), (c,), jnp.float32)
    mean = 0.1 * jax.random.normal(kg(), (c,), jnp.float32)
    var = 1.0 + 0.1 * jax.random.uniform(kg(), (c,), jnp.float32)
    scale = gamma / jnp.sqrt(var + eps)
    bias = beta - mean * scale
    return scale.reshape(1, c), bias.reshape(1, c)


def conv_params(kg, cin, cout, k):
    fan_in = cin * k * k
    w = jax.random.normal(kg(), (k * k * cin, cout), jnp.float32) * (2.0 / fan_in) ** 0.5
    scale, bias = bn_fold(kg, cout)
    return {"w": (w * scale).astype(jnp.bfloat16), "b": bias}


def dw_params(kg, c, k):
    w = jax.random.normal(kg(), (k * k, 1, c), jnp.float32) * (2.0 / (k * k)) ** 0.5
    scale, bias = bn_fold(kg, c)
    return {"w": w * scale.reshape(1, 1, c), "b": bias}


def se_params(kg, c, sq):
    w1 = jax.random.normal(kg(), (c, sq), jnp.float32) * (2.0 / c) ** 0.5
    b1 = 0.01 * jax.random.normal(kg(), (1, sq), jnp.float32)
    w2 = jax.random.normal(kg(), (sq, c), jnp.float32) * (2.0 / sq) ** 0.5
    b2 = 0.01 * jax.random.normal(kg(), (1, c), jnp.float32)
    return {"w1": w1.astype(jnp.bfloat16), "b1": b1,
            "w2": w2.astype(jnp.bfloat16), "b2": b2}


def build_params(seed=42):
    kg = KeyGen(seed)
    params = {"stem": conv_params(kg, 3, 16, 3), "blocks": []}
    for (cin, k, exp, cout, use_se, act, stride) in BNECK:
        b = {}
        if exp != cin:
            b["expand"] = conv_params(kg, cin, exp, 1)
        b["dw"] = dw_params(kg, exp, k)
        if use_se:
            b["se"] = se_params(kg, exp, make_divisible(exp // 4, 8))
        b["project"] = conv_params(kg, exp, cout, 1)
        params["blocks"].append(b)
    params["last"] = conv_params(kg, 160, 960, 1)
    return params


# ----------------------------------------------------------------------------
# Pure-JAX reference of one InvertedResidual block (same bf16 quantization points)
# ----------------------------------------------------------------------------
def ref_block(blk, cfg, x_nhwc_bf16):
    cin, k, exp, cout, use_se, act, stride = cfg
    x = x_nhwc_bf16.astype(jnp.float32)
    if "expand" in blk:
        e = _act_fn(jnp.einsum("nhwc,ce->nhwe", x, blk["expand"]["w"].astype(jnp.float32))
                    + blk["expand"]["b"], act)
    else:
        e = x
    e = e.astype(jnp.bfloat16).astype(jnp.float32)            # kernel's bf16 scratch
    p = (k - 1) // 2
    wd = blk["dw"]["w"].reshape(k, k, 1, exp)
    d = lax.conv_general_dilated(
        e, wd, window_strides=(stride, stride), padding=[(p, p), (p, p)],
        dimension_numbers=("NHWC", "HWIO", "NHWC"), feature_group_count=exp)
    d = _act_fn(d + blk["dw"]["b"].reshape(1, 1, 1, exp), act)
    if use_se:
        se = blk["se"]
        pool = jnp.mean(d, axis=(1, 2))                        # (N, exp)
        h1 = jnp.maximum(pool.astype(jnp.bfloat16).astype(jnp.float32)
                         @ se["w1"].astype(jnp.float32) + se["b1"], 0.0)
        sc = _act_fn(h1.astype(jnp.bfloat16).astype(jnp.float32)
                     @ se["w2"].astype(jnp.float32) + se["b2"], "hardsigmoid")
        d = d * sc[:, None, None, :]
    pj_in = d.astype(jnp.bfloat16).astype(jnp.float32)
    out = (jnp.einsum("nhwc,co->nhwo", pj_in, blk["project"]["w"].astype(jnp.float32))
           + blk["project"]["b"].reshape(1, 1, 1, cout))
    if stride == 1 and cin == cout:
        out = out + x
    return out.astype(jnp.bfloat16)


def ref_head(block_out_bf16, head):
    y = block_out_bf16.astype(jnp.float32)
    h = _act_fn(jnp.einsum("nhwc,co->nhwo", y, head["w"].astype(jnp.float32))
                + head["b"].reshape(1, 1, 1, -1), "hardswish")
    return jnp.mean(h, axis=(1, 2))                            # (N, 960)


# ----------------------------------------------------------------------------
# Full forward: MobileNetV3-Large features -> AdaptiveAvgPool2d(1)
# ----------------------------------------------------------------------------
def mobilenet_extractor_forward(params, x_nchw):
    x = jnp.transpose(x_nchw.astype(jnp.float32), (0, 2, 3, 1))      # NCHW -> NHWC
    N = x.shape[0]

    # stem: Conv3x3 s2 + BN + Hardswish (im2col + weight-resident tiled matmul)
    pm, H, W = stem_im2col(x, k=3, stride=2)
    y = pallas_matmul(pm.astype(jnp.bfloat16), params["stem"]["w"], params["stem"]["b"],
                      act="hardswish")
    x = y.reshape(N, H, W, 16)

    n_blocks = len(BNECK)
    pooled = None
    for bi, (blk, cfg) in enumerate(zip(params["blocks"], BNECK)):
        stride = cfg[6]
        head = params["last"] if bi == n_blocks - 1 else None        # fuse head into last block
        out = run_block(blk, cfg, x, head=head)
        H, W = H // stride, W // stride
        if head is None:
            x = out                                                   # (N, H, W, cout) bf16
        else:
            pooled = out                                              # (N, 1, 960) f32

    return pooled.reshape(N, 960, 1, 1)                               # PyTorch-shaped output


if __name__ == "__main__":
    params = build_params(seed=42)
    key = jax.random.PRNGKey(0)

    # --- numerical parity checks of the fused block kernel vs a pure-JAX reference -----------
    def _check(got, want, tag):
        g = got.astype(jnp.float32)
        w = want.astype(jnp.float32)
        err = float(jnp.max(jnp.abs(g - w)))
        scale = float(jnp.max(jnp.abs(w))) + 1e-6
        assert err <= 0.05 * scale + 0.05, (tag, err, scale)

    # block 3: stride-2 polyphase, k=5 depthwise, SE, no residual   (16x16 input at this depth)
    # block 11: stride-1, k=3, SE, residual                          (4x4 input at this depth)
    for bi, Hb in ((3, 16), (11, 4)):
        cfg = BNECK[bi]
        xb = (0.5 * jax.random.normal(jax.random.fold_in(key, 100 + bi),
                                      (2, Hb, Hb, cfg[0]), jnp.float32)).astype(jnp.bfloat16)
        got = jax.block_until_ready(run_block(params["blocks"][bi], cfg, xb))
        want = jax.block_until_ready(ref_block(params["blocks"][bi], cfg, xb))
        _check(got, want, f"block{bi}")

    # last block with the fused 160->960 head conv + hardswish + global average pool
    cfg = BNECK[14]
    xb = (0.5 * jax.random.normal(jax.random.fold_in(key, 200),
                                  (2, 2, 2, cfg[0]), jnp.float32)).astype(jnp.bfloat16)
    got = jax.block_until_ready(
        run_block(params["blocks"][14], cfg, xb, head=params["last"])).reshape(2, 960)
    want = jax.block_until_ready(
        ref_head(ref_block(params["blocks"][14], cfg, xb), params["last"]))
    _check(got, want, "head")

    # --- full forward: batch=2, RGB, 64x64 spatial (stride-32 backbone -> 2x2 final map) -----
    x = jax.random.normal(key, (2, 3, 64, 64), dtype=jnp.float32)
    fwd = jax.jit(mobilenet_extractor_forward)
    out = jax.block_until_ready(fwd(params, x))

    assert out.shape == (2, 960, 1, 1), out.shape
    assert out.dtype == jnp.float32
    assert bool(jnp.all(jnp.isfinite(out)))
    print("KERNEL_OK")
</pallas_src>

<mosaic_0001>
module attributes {stable_mosaic.version = 11 : i64} {
  func.func @_block_kernel(%arg0: i32, %arg1: memref<1x4x64x24xbf16, #tpu.memory_space<vmem>>, %arg2: memref<24x72xbf16, #tpu.memory_space<vmem>>, %arg3: memref<1x72xf32, #tpu.memory_space<vmem>>, %arg4: memref<25x1x72xf32, #tpu.memory_space<vmem>>, %arg5: memref<1x72xf32, #tpu.memory_space<vmem>>, %arg6: memref<72x24xbf16, #tpu.memory_space<vmem>>, %arg7: memref<1x24xf32, #tpu.memory_space<vmem>>, %arg8: memref<24x72xbf16, #tpu.memory_space<vmem>>, %arg9: memref<1x72xf32, #tpu.memory_space<vmem>>, %arg10: memref<72x40xbf16, #tpu.memory_space<vmem>>, %arg11: memref<1x40xf32, #tpu.memory_space<vmem>>, %arg12: memref<1x8x8x40xbf16, #tpu.memory_space<vmem>>, %arg13: memref<2x2x10x10x72xbf16, #tpu.memory_space<vmem>>) attributes {dimension_semantics = [#tpu.dimension_semantics<parallel>], iteration_bounds = array<i64: 2>, scalar_prefetch = 0 : i64, scratch_operands = 1 : i64, tpu.core_type = #tpu.core_type<tc>, window_params = [{transform_indices = @transform_0, window_bounds = array<i64: 1, 4, 64, 24>}, {pipeline_mode = #tpu.pipeline_mode<synchronous>, transform_indices = @transform_1, window_bounds = array<i64: 24, 72>}, {pipeline_mode = #tpu.pipeline_mode<synchronous>, transform_indices = @transform_2, window_bounds = array<i64: 1, 72>}, {pipeline_mode = #tpu.pipeline_mode<synchronous>, transform_indices = @transform_3, window_bounds = array<i64: 25, 1, 72>}, {pipeline_mode = #tpu.pipeline_mode<synchronous>, transform_indices = @transform_4, window_bounds = array<i64: 1, 72>}, {pipeline_mode = #tpu.pipeline_mode<synchronous>, transform_indices = @transform_5, window_bounds = array<i64: 72, 24>}, {pipeline_mode = #tpu.pipeline_mode<synchronous>, transform_indices = @transform_6, window_bounds = array<i64: 1, 24>}, {pipeline_mode = #tpu.pipeline_mode<synchronous>, transform_indices = @transform_7, window_bounds = array<i64: 24, 72>}, {pipeline_mode = #tpu.pipeline_mode<synchronous>, transform_indices = @transform_8, window_bounds = array<i64: 1, 72>}, {pipeline_mode = #tpu.pipeline_mode<synchronous>, transform_indices = @transform_9, window_bounds = array<i64: 72, 40>}, {pipeline_mode = #tpu.pipeline_mode<synchronous>, transform_indices = @transform_10, window_bounds = array<i64: 1, 40>}, {transform_indices = @transform_11, window_bounds = array<i64: 1, 8, 8, 40>}]} {
    %cst = arith.constant 0.000000e+00 : bf16
    %0 = vector.broadcast %cst : bf16 to vector<1x10x72xbf16>
    %c0 = arith.constant 0 : index
    %c0_0 = arith.constant 0 : index
    %c0_1 = arith.constant 0 : index
    %c0_2 = arith.constant 0 : index
    %c0_3 = arith.constant 0 : index
    %1 = vector.load %arg13[%c0, %c0_0, %c0_1, %c0_2, %c0_3] : memref<2x2x10x10x72xbf16, #tpu.memory_space<vmem>>, vector<1x1x1x10x72xbf16>
    %2 = vector.shape_cast %1 : vector<1x1x1x10x72xbf16> to vector<1x10x72xbf16>
    %3 = vector.shape_cast %0 : vector<1x10x72xbf16> to vector<1x1x1x10x72xbf16>
    tpu.vector_store %arg13[%c0, %c0_0, %c0_1, %c0_2, %c0_3], %3 {strides = array<i32>} : memref<2x2x10x10x72xbf16, #tpu.memory_space<vmem>>, vector<1x1x1x10x72xbf16>,
    %cst_4 = arith.constant 0.000000e+00 : bf16
    %4 = vector.broadcast %cst_4 : bf16 to vector<1x10x72xbf16>
    %c0_5 = arith.constant 0 : index
    %c0_6 = arith.constant 0 : index
    %c9 = arith.constant 9 : index
    %c0_7 = arith.constant 0 : index
    %c0_8 = arith.constant 0 : index
    %5 = vector.load %arg13[%c0_5, %c0_6, %c9, %c0_7, %c0_8] : memref<2x2x10x10x72xbf16, #tpu.memory_space<vmem>>, vector<1x1x1x10x72xbf16>
    %6 = vector.shape_cast %5 : vector<1x1x1x10x72xbf16> to vector<1x10x72xbf16>
    %7 = vector.shape_cast %4 : vector<1x10x72xbf16> to vector<1x1x1x10x72xbf16>
    tpu.vector_store %arg13[%c0_5, %c0_6, %c9, %c0_7, %c0_8], %7 {strides = array<i32>} : memref<2x2x10x10x72xbf16, #tpu.memory_space<vmem>>, vector<1x1x1x10x72xbf16>,
    %cst_9 = arith.constant 0.000000e+00 : bf16
    %8 = vector.broadcast %cst_9 : bf16 to vector<10x1x72xbf16>
    %c0_10 = arith.constant 0 : index
    %c0_11 = arith.constant 0 : index
    %c0_12 = arith.constant 0 : index
    %c0_13 = arith.constant 0 : index
    %c0_14 = arith.constant 0 : index
    %9 = vector.load %arg13[%c0_10, %c0_11, %c0_12, %c0_13, %c0_14] : memref<2x2x10x10x72xbf16, #tpu.memory_space<vmem>>, vector<1x1x10x1x72xbf16>
    %10 = vector.shape_cast %9 : vector<1x1x10x1x72xbf16> to vector<10x1x72xbf16>
    %11 = vector.shape_cast %8 : vector<10x1x72xbf16> to vector<1x1x10x1x72xbf16>
    tpu.vector_store %arg13[%c0_10, %c0_11, %c0_12, %c0_13, %c0_14], %11 {strides = array<i32>} : memref<2x2x10x10x72xbf16, #tpu.memory_space<vmem>>, vector<1x1x10x1x72xbf16>,
    %cst_15 = arith.constant 0.000000e+00 : bf16
    %12 = vector.broadcast %cst_15 : bf16 to vector<10x1x72xbf16>
    %c0_16 = arith.constant 0 : index
    %c0_17 = arith.constant 0 : index
    %c0_18 = arith.constant 0 : index
    %c9_19 = arith.constant 9 : index
    %c0_20 = arith.constant 0 : index
    %13 = vector.load %arg13[%c0_16, %c0_17, %c0_18, %c9_19, %c0_20] : memref<2x2x10x10x72xbf16, #tpu.memory_space<vmem>>, vector<1x1x10x1x72xbf16>
    %14 = vector.shape_cast %13 : vector<1x1x10x1x72xbf16> to vector<10x1x72xbf16>
    %15 = vector.shape_cast %12 : vector<10x1x72xbf16> to vector<1x1x10x1x72xbf16>
    tpu.vector_store %arg13[%c0_16, %c0_17, %c0_18, %c9_19, %c0_20], %15 {strides = array<i32>} : memref<2x2x10x10x72xbf16, #tpu.memory_space<vmem>>, vector<1x1x10x1x72xbf16>,
    %c0_21 = arith.constant 0 : index
    %c0_22 = arith.constant 0 : index
    %c0_23 = arith.constant 0 : index
    %c0_24 = arith.constant 0 : index
    %16 = vector.load %arg1[%c0_21, %c0_22, %c0_23, %c0_24] : memref<1x4x64x24xbf16, #tpu.memory_space<vmem>>, vector<1x1x64x24xbf16>
    %17 = vector.shape_cast %16 : vector<1x1x64x24xbf16> to vector<64x24xbf16>
    %c0_25 = arith.constant 0 : index
    %c0_26 = arith.constant 0 : index
    %18 = vector.load %arg2[%c0_25, %c0_26] : memref<24x72xbf16, #tpu.memory_space<vmem>>, vector<24x72xbf16>
    %cst_27 = arith.constant dense<0.000000e+00> : vector<64x72xf32>
    %19 = tpu.matmul %17, %18, %cst_27 {dimension_numbers = #tpu.dot_dimension_numbers<[1], [0], [0], [1], [0, 0, 1, 1], [], []>} : vector<64x24xbf16>, vector<24x72xbf16>, vector<64x72xf32> -> vector<64x72xf32>
    %c0_28 = arith.constant 0 : index
    %c0_29 = arith.constant 0 : index
    %20 = vector.load %arg3[%c0_28, %c0_29] : memref<1x72xf32, #tpu.memory_space<vmem>>, vector<1x72xf32>
    %21 = vector.broadcast %20 : vector<1x72xf32> to vector<64x72xf32>
    %22 = arith.addf %19, %21 : vector<64x72xf32>
    %cst_30 = arith.constant 0.000000e+00 : f32
    %23 = vector.broadcast %cst_30 : f32 to vector<64x72xf32>
    %24 = arith.maximumf %22, %23 : vector<64x72xf32>
    %25 = arith.truncf %24 : vector<64x72xf32> to vector<64x72xbf16>
    %26 = vector.extract_strided_slice %25 {offsets = [0, 0], sizes = [8, 72], strides = [1, 1]} : vector<64x72xbf16> to vector<8x72xbf16>
    %c0_31 = arith.constant 0 : index
    %c0_32 = arith.constant 0 : index
    %c1 = arith.constant 1 : index
    %c1_33 = arith.constant 1 : index
    %c0_34 = arith.constant 0 : index
    %27 = vector.load %arg13[%c0_31, %c0_32, %c1, %c1_33, %c0_34] : memref<2x2x10x10x72xbf16, #tpu.memory_space<vmem>>, vector<1x1x1x8x72xbf16>
    %28 = vector.shape_cast %27 : vector<1x1x1x8x72xbf16> to vector<8x72xbf16>
    %29 = vector.shape_cast %26 : vector<8x72xbf16> to vector<1x1x1x8x72xbf16>
    tpu.vector_store %arg13[%c0_31, %c0_32, %c1, %c1_33, %c0_34], %29 {strides = array<i32>} : memref<2x2x10x10x72xbf16, #tpu.memory_space<vmem>>, vector<1x1x1x8x72xbf16>,
    %30 = vector.extract_strided_slice %25 {offsets = [8, 0], sizes = [8, 72], strides = [1, 1]} : vector<64x72xbf16> to vector<8x72xbf16>
    %c0_35 = arith.constant 0 : index
    %c0_36 = arith.constant 0 : index
    %c2 = arith.constant 2 : index
    %c1_37 = arith.constant 1 : index
    %c0_38 = arith.constant 0 : index
    %31 = vector.load %arg13[%c0_35, %c0_36, %c2, %c1_37, %c0_38] : memref<2x2x10x10x72xbf16, #tpu.memory_space<vmem>>, vector<1x1x1x8x72xbf16>
    %32 = vector.shape_cast %31 : vector<1x1x1x8x72xbf16> to vector<8x72xbf16>
    %33 = vector.shape_cast %30 : vector<8x72xbf16> to vector<1x1x1x8x72xbf16>
    tpu.vector_store %arg13[%c0_35, %c0_36, %c2, %c1_37, %c0_38], %33 {strides = array<i32>} : memref<2x2x10x10x72xbf16, #tpu.memory_space<vmem>>, vector<1x1x1x8x72xbf16>,
    %34 = vector.extract_strided_slice %25 {offsets = [16, 0], sizes = [8, 72], strides = [1, 1]} : vector<64x72xbf16> to vector<8x72xbf16>
    %c0_39 = arith.constant 0 : index
    %c0_40 = arith.constant 0 : index
    %c3 = arith.constant 3 : index
    %c1_41 = arith.constant 1 : index
    %c0_42 = arith.constant 0 : index
    %35 = vector.load %arg13[%c0_39, %c0_40, %c3, %c1_41, %c0_42] : memref<2x2x10x10x72xbf16, #tpu.memory_space<vmem>>, vector<1x1x1x8x72xbf16>
    %36 = vector.shape_cast %35 : vector<1x1x1x8x72xbf16> to vector<8x72xbf16>
    %37 = vector.shape_cast %34 : vector<8x72xbf16> to vector<1x1x1x8x72xbf16>
    tpu.vector_store %arg13[%c0_39, %c0_40, %c3, %c1_41, %c0_42], %37 {strides = array<i32>} : memref<2x2x10x10x72xbf16, #tpu.memory_space<vmem>>, vector<1x1x1x8x72xbf16>,
    %38 = vector.extract_strided_slice %25 {offsets = [24, 0], sizes = [8, 72], strides = [1, 1]} : vector<64x72xbf16> to vector<8x72xbf16>
    %c0_43 = arith.constant 0 : index
    %c0_44 = arith.constant 0 : index
    %c4 = arith.constant 4 : index
    %c1_45 = arith.constant 1 : index
    %c0_46 = arith.constant 0 : index
    %39 = vector.load %arg13[%c0_43, %c0_44, %c4, %c1_45, %c0_46] : memref<2x2x10x10x72xbf16, #tpu.memory_space<vmem>>, vector<1x1x1x8x72xbf16>
    %40 = vector.shape_cast %39 : vector<1x1x1x8x72xbf16> to vector<8x72xbf16>
    %41 = vector.shape_cast %38 : vector<8x72xbf16> to vector<1x1x1x8x72xbf16>
    tpu.vector_store %arg13[%c0_43, %c0_44, %c4, %c1_45, %c0_46], %41 {strides = array<i32>} : memref<2x2x10x10x72xbf16, #tpu.memory_space<vmem>>, vector<1x1x1x8x72xbf16>,
    %42 = vector.extract_strided_slice %25 {offsets = [32, 0], sizes = [8, 72], strides = [1, 1]} : vector<64x72xbf16> to vector<8x72xbf16>
    %c0_47 = arith.constant 0 : index
    %c0_48 = arith.constant 0 : index
    %c5 = arith.constant 5 : index
    %c1_49 = arith.constant 1 : index
    %c0_50 = arith.constant 0 : index
    %43 = vector.load %arg13[%c0_47, %c0_48, %c5, %c1_49, %c0_50] : memref<2x2x10x10x72xbf16, #tpu.memory_space<vmem>>, vector<1x1x1x8x72xbf16>
    %44 = vector.shape_cast %43 : vector<1x1x1x8x72xbf16> to vector<8x72xbf16>
    %45 = vector.shape_cast %42 : vector<8x72xbf16> to vector<1x1x1x8x72xbf16>
    tpu.vector_store %arg13[%c0_47, %c0_48, %c5, %c1_49, %c0_50], %45 {strides = array<i32>} : memref<2x2x10x10x72xbf16, #tpu.memory_space<vmem>>, vector<1x1x1x8x72xbf16>,
    %46 = vector.extract_strided_slice %25 {offsets = [40, 0], sizes = [8, 72], strides = [1, 1]} : vector<64x72xbf16> to vector<8x72xbf16>
    %c0_51 = arith.constant 0 : index
    %c0_52 = arith.constant 0 : index
    %c6 = arith.constant 6 : index
    %c1_53 = arith.constant 1 : index
    %c0_54 = arith.constant 0 : index
    %47 = vector.load %arg13[%c0_51, %c0_52, %c6, %c1_53, %c0_54] : memref<2x2x10x10x72xbf16, #tpu.memory_space<vmem>>, vector<1x1x1x8x72xbf16>
    %48 = vector.shape_cast %47 : vector<1x1x1x8x72xbf16> to vector<8x72xbf16>
    %49 = vector.shape_cast %46 : vector<8x72xbf16> to vector<1x1x1x8x72xbf16>
    tpu.vector_store %arg13[%c0_51, %c0_52, %c6, %c1_53, %c0_54], %49 {strides = array<i32>} : memref<2x2x10x10x72xbf16, #tpu.memory_space<vmem>>, vector<1x1x1x8x72xbf16>,
    %50 = vector.extract_strided_slice %25 {offsets = [48, 0], sizes = [8, 72], strides = [1, 1]} : vector<64x72xbf16> to vector<8x72xbf16>
    %c0_55 = arith.constant 0 : index
    %c0_56 = arith.constant 0 : index
    %c7 = arith.constant 7 : index
    %c1_57 = arith.constant 1 : index
    %c0_58 = arith.constant 0 : index
    %51 = vector.load %arg13[%c0_55, %c0_56, %c7, %c1_57, %c0_58] : memref<2x2x10x10x72xbf16, #tpu.memory_space<vmem>>, vector<1x1x1x8x72xbf16>
    %52 = vector.shape_cast %51 : vector<1x1x1x8x72xbf16> to vector<8x72xbf16>
    %53 = vector.shape_cast %50 : vector<8x72xbf16> to vector<1x1x1x8x72xbf16>
    tpu.vector_store %arg13[%c0_55, %c0_56, %c7, %c1_57, %c0_58], %53 {strides = array<i32>} : memref<2x2x10x10x72xbf16, #tpu.memory_space<vmem>>, vector<1x1x1x8x72xbf16>,
    %54 = vector.extract_strided_slice %25 {offsets = [56, 0], sizes = [8, 72], strides = [1, 1]} : vector<64x72xbf16> to vector<8x72xbf16>
    %c0_59 = arith.constant 0 : index
    %c0_60 = arith.constant 0 : index
    %c8 = arith.constant 8 : index
    %c1_61 = arith.constant 1 : index
    %c0_62 = arith.constant 0 : index
    %55 = vector.load %arg13[%c0_59, %c0_60, %c8, %c1_61, %c0_62] : memref<2x2x10x10x72xbf16, #tpu.memory_space<vmem>>, vector<1x1x1x8x72xbf16>
    %56 = vector.shape_cast %55 : vector<1x1x1x8x72xbf16> to vector<8x72xbf16>
    %57 = vector.shape_cast %54 : vector<8x72xbf16> to vector<1x1x1x8x72xbf16>
    tpu.vector_store %arg13[%c0_59, %c0_60, %c8, %c1_61, %c0_62], %57 {strides = array<i32>} : memref<2x2x10x10x72xbf16, #tpu.memory_space<vmem>>, vector<1x1x1x8x72xbf16>,
    %cst_63 = arith.constant 0.000000e+00 : bf16
    %58 = vector.broadcast %cst_63 : bf16 to vector<1x10x72xbf16>
    %c0_64 = arith.constant 0 : index
    %c1_65 = arith.constant 1 : index
    %c0_66 = arith.constant 0 : index
    %c0_67 = arith.constant 0 : index
    %c0_68 = arith.constant 0 : index
    %59 = vector.load %arg13[%c0_64, %c1_65, %c0_66, %c0_67, %c0_68] : memref<2x2x10x10x72xbf16, #tpu.memory_space<vmem>>, vector<1x1x1x10x72xbf16>
    %60 = vector.shape_cast %59 : vector<1x1x1x10x72xbf16> to vector<1x10x72xbf16>
    %61 = vector.shape_cast %58 : vector<1x10x72xbf16> to vector<1x1x1x10x72xbf16>
    tpu.vector_store %arg13[%c0_64, %c1_65, %c0_66, %c0_67, %c0_68], %61 {strides = array<i32>} : memref<2x2x10x10x72xbf16, #tpu.memory_space<vmem>>, vector<1x1x1x10x72xbf16>,
    %cst_69 = arith.constant 0.000000e+00 : bf16
    %62 = vector.broadcast %cst_69 : bf16 to vector<1x10x72xbf16>
    %c0_70 = arith.constant 0 : index
    %c1_71 = arith.constant 1 : index
    %c9_72 = arith.constant 9 : index
    %c0_73 = arith.constant 0 : index
    %c0_74 = arith.constant 0 : index
    %63 = vector.load %arg13[%c0_70, %c1_71, %c9_72, %c0_73, %c0_74] : memref<2x2x10x10x72xbf16, #tpu.memory_space<vmem>>, vector<1x1x1x10x72xbf16>
    %64 = vector.shape_cast %63 : vector<1x1x1x10x72xbf16> to vector<1x10x72xbf16>
    %65 = vector.shape_cast %62 : vector<1x10x72xbf16> to vector<1x1x1x10x72xbf16>
    tpu.vector_store %arg13[%c0_70, %c1_71, %c9_72, %c0_73, %c0_74], %65 {strides = array<i32>} : memref<2x2x10x10x72xbf16, #tpu.memory_space<vmem>>, vector<1x1x1x10x72xbf16>,
    %cst_75 = arith.constant 0.000000e+00 : bf16
    %66 = vector.broadcast %cst_75 : bf16 to vector<10x1x72xbf16>
    %c0_76 = arith.constant 0 : index
    %c1_77 = arith.constant 1 : index
    %c0_78 = arith.constant 0 : index
    %c0_79 = arith.constant 0 : index
    %c0_80 = arith.constant 0 : index
    %67 = vector.load %arg13[%c0_76, %c1_77, %c0_78, %c0_79, %c0_80] : memref<2x2x10x10x72xbf16, #tpu.memory_space<vmem>>, vector<1x1x10x1x72xbf16>
    %68 = vector.shape_cast %67 : vector<1x1x10x1x72xbf16> to vector<10x1x72xbf16>
    %69 = vector.shape_cast %66 : vector<10x1x72xbf16> to vector<1x1x10x1x72xbf16>
    tpu.vector_store %arg13[%c0_76, %c1_77, %c0_78, %c0_79, %c0_80], %69 {strides = array<i32>} : memref<2x2x10x10x72xbf16, #tpu.memory_space<vmem>>, vector<1x1x10x1x72xbf16>,
    %cst_81 = arith.constant 0.000000e+00 : bf16
    %70 = vector.broadcast %cst_81 : bf16 to vector<10x1x72xbf16>
    %c0_82 = arith.constant 0 : index
    %c1_83 = arith.constant 1 : index
    %c0_84 = arith.constant 0 : index
    %c9_85 = arith.constant 9 : index
    %c0_86 = arith.constant 0 : index
    %71 = vector.load %arg13[%c0_82, %c1_83, %c0_84, %c9_85, %c0_86] : memref<2x2x10x10x72xbf16, #tpu.memory_space<vmem>>, vector<1x1x10x1x72xbf16>
    %72 = vector.shape_cast %71 : vector<1x1x10x1x72xbf16> to vector<10x1x72xbf16>
    %73 = vector.shape_cast %70 : vector<10x1x72xbf16> to vector<1x1x10x1x72xbf16>
    tpu.vector_store %arg13[%c0_82, %c1_83, %c0_84, %c9_85, %c0_86], %73 {strides = array<i32>} : memref<2x2x10x10x72xbf16, #tpu.memory_space<vmem>>, vector<1x1x10x1x72xbf16>,
    %c0_87 = arith.constant 0 : index
    %c1_88 = arith.constant 1 : index
    %c0_89 = arith.constant 0 : index
    %c0_90 = arith.constant 0 : index
    %74 = vector.load %arg1[%c0_87, %c1_88, %c0_89, %c0_90] : memref<1x4x64x24xbf16, #tpu.memory_space<vmem>>, vector<1x1x64x24xbf16>
    %75 = vector.shape_cast %74 : vector<1x1x64x24xbf16> to vector<64x24xbf16>
    %c0_91 = arith.constant 0 : index
    %c0_92 = arith.constant 0 : index
    %76 = vector.load %arg2[%c0_91, %c0_92] : memref<24x72xbf16, #tpu.memory_space<vmem>>, vector<24x72xbf16>
    %cst_93 = arith.constant dense<0.000000e+00> : vector<64x72xf32>
    %77 = tpu.matmul %75, %76, %cst_93 {dimension_numbers = #tpu.dot_dimension_numbers<[1], [0], [0], [1], [0, 0, 1, 1], [], []>} : vector<64x24xbf16>, vector<24x72xbf16>, vector<64x72xf32> -> vector<64x72xf32>
    %c0_94 = arith.constant 0 : index
    %c0_95 = arith.constant 0 : index
    %78 = vector.load %arg3[%c0_94, %c0_95] : memref<1x72xf32, #tpu.memory_space<vmem>>, vector<1x72xf32>
    %79 = vector.broadcast %78 : vector<1x72xf32> to vector<64x72xf32>
    %80 = arith.addf %77, %79 : vector<64x72xf32>
    %cst_96 = arith.constant 0.000000e+00 : f32
    %81 = vector.broadcast %cst_96 : f32 to vector<64x72xf32>
    %82 = arith.maximumf %80, %81 : vector<64x72xf32>
    %83 = arith.truncf %82 : vector<64x72xf32> to vector<64x72xbf16>
    %84 = vector.extract_strided_slice %83 {offsets = [0, 0], sizes = [8, 72], strides = [1, 1]} : vector<64x72xbf16> to vector<8x72xbf16>
    %c0_97 = arith.constant 0 : index
    %c1_98 = arith.constant 1 : index
    %c1_99 = arith.constant 1 : index
    %c1_100 = arith.constant 1 : index
    %c0_101 = arith.constant 0 : index
    %85 = vector.load %arg13[%c0_97, %c1_98, %c1_99, %c1_100, %c0_101] : memref<2x2x10x10x72xbf16, #tpu.memory_space<vmem>>, vector<1x1x1x8x72xbf16>
    %86 = vector.shape_cast %85 : vector<1x1x1x8x72xbf16> to vector<8x72xbf16>
    %87 = vector.shape_cast %84 : vector<8x72xbf16> to vector<1x1x1x8x72xbf16>
    tpu.vector_store %arg13[%c0_97, %c1_98, %c1_99, %c1_100, %c0_101], %87 {strides = array<i32>} : memref<2x2x10x10x72xbf16, #tpu.memory_space<vmem>>, vector<1x1x1x8x72xbf16>,
    %88 = vector.extract_strided_slice %83 {offsets = [8, 0], sizes = [8, 72], strides = [1, 1]} : vector<64x72xbf16> to vector<8x72xbf16>
    %c0_102 = arith.constant 0 : index
    %c1_103 = arith.constant 1 : index
    %c2_104 = arith.constant 2 : index
    %c1_105 = arith.constant 1 : index
    %c0_106 = arith.constant 0 : index
    %89 = vector.load %arg13[%c0_102, %c1_103, %c2_104, %c1_105, %c0_106] : memref<2x2x10x10x72xbf16, #tpu.memory_space<vmem>>, vector<1x1x1x8x72xbf16>
    %90 = vector.shape_cast %89 : vector<1x1x1x8x72xbf16> to vector<8x72xbf16>
    %91 = vector.shape_cast %88 : vector<8x72xbf16> to vector<1x1x1x8x72xbf16>
    tpu.vector_store %arg13[%c0_102, %c1_103, %c2_104, %c1_105, %c0_106], %91 {strides = array<i32>} : memref<2x2x10x10x72xbf16, #tpu.memory_space<vmem>>, vector<1x1x1x8x72xbf16>,
    %92 = vector.extract_strided_slice %83 {offsets = [16, 0], sizes = [8, 72], strides = [1, 1]} : vector<64x72xbf16> to vector<8x72xbf16>
    %c0_107 = arith.constant 0 : index
    %c1_108 = arith.constant 1 : index
    %c3_109 = arith.constant 3 : index
    %c1_110 = arith.constant 1 : index
    %c0_111 = arith.constant 0 : index
    %93 = vector.load %arg13[%c0_107, %c1_108, %c3_109, %c1_110, %c0_111] : memref<2x2x10x10x72xbf16, #tpu.memory_space<vmem>>, vector<1x1x1x8x72xbf16>
    %94 = vector.shape_cast %93 : vector<1x1x1x8x72xbf16> to vector<8x72xbf16>
    %95 = vector.shape_cast %92 : vector<8x72xbf16> to vector<1x1x1x8x72xbf16>
    tpu.vector_store %arg13[%c0_107, %c1_108, %c3_109, %c1_110, %c0_111], %95 {strides = array<i32>} : memref<2x2x10x10x72xbf16, #tpu.memory_space<vmem>>, vector<1x1x1x8x72xbf16>,
    %96 = vector.extract_strided_slice %83 {offsets = [24, 0], sizes = [8, 72], strides = [1, 1]} : vector<64x72xbf16> to vector<8x72xbf16>
    %c0_112 = arith.constant 0 : index
    %c1_113 = arith.constant 1 : index
    %c4_114 = arith.constant 4 : index
    %c1_115 = arith.constant 1 : index
    %c0_116 = arith.constant 0 : index
    %97 = vector.load %arg13[%c0_112, %c1_113, %c4_114, %c1_115, %c0_116] : memref<2x2x10x10x72xbf16, #tpu.memory_space<vmem>>, vector<1x1x1x8x72xbf16>
    %98 = vector.shape_cast %97 : vector<1x1x1x8x72xbf16> to vector<8x72xbf16>
    %99 = vector.shape_cast %96 : vector<8x72xbf16> to vector<1x1x1x8x72xbf16>
    tpu.vector_store %arg13[%c0_112, %c1_113, %c4_114, %c1_115, %c0_116], %99 {strides = array<i32>} : memref<2x2x10x10x72xbf16, #tpu.memory_space<vmem>>, vector<1x1x1x8x72xbf16>,
    %100 = vector.extract_strided_slice %83 {offsets = [32, 0], sizes = [8, 72], strides = [1, 1]} : vector<64x72xbf16> to vector<8x72xbf16>
    %c0_117 = arith.constant 0 : index
    %c1_118 = arith.constant 1 : index
    %c5_119 = arith.constant 5 : index
    %c1_120 = arith.constant 1 : index
    %c0_121 = arith.constant 0 : index
    %101 = vector.load %arg13[%c0_117, %c1_118, %c5_119, %c1_120, %c0_121] : memref<2x2x10x10x72xbf16, #tpu.memory_space<vmem>>, vector<1x1x1x8x72xbf16>
    %102 = vector.shape_cast %101 : vector<1x1x1x8x72xbf16> to vector<8x72xbf16>
    %103 = vector.shape_cast %100 : vector<8x72xbf16> to vector<1x1x1x8x72xbf16>
    tpu.vector_store %arg13[%c0_117, %c1_118, %c5_119, %c1_120, %c0_121], %103 {strides = array<i32>} : memref<2x2x10x10x72xbf16, #tpu.memory_space<vmem>>, vector<1x1x1x8x72xbf16>,
    %104 = vector.extract_strided_slice %83 {offsets = [40, 0], sizes = [8, 72], strides = [1, 1]} : vector<64x72xbf16> to vector<8x72xbf16>
    %c0_122 = arith.constant 0 : index
    %c1_123 = arith.constant 1 : index
    %c6_124 = arith.constant 6 : index
    %c1_125 = arith.constant 1 : index
    %c0_126 = arith.constant 0 : index
    %105 = vector.load %arg13[%c0_122, %c1_123, %c6_124, %c1_125, %c0_126] : memref<2x2x10x10x72xbf16, #tpu.memory_space<vmem>>, vector<1x1x1x8x72xbf16>
    %106 = vector.shape_cast %105 : vector<1x1x1x8x72xbf16> to vector<8x72xbf16>
    %107 = vector.shape_cast %104 : vector<8x72xbf16> to vector<1x1x1x8x72xbf16>
    tpu.vector_store %arg13[%c0_122, %c1_123, %c6_124, %c1_125, %c0_126], %107 {strides = array<i32>} : memref<2x2x10x10x72xbf16, #tpu.memory_space<vmem>>, vector<1x1x1x8x72xbf16>,
    %108 = vector.extract_strided_slice %83 {offsets = [48, 0], sizes = [8, 72], strides = [1, 1]} : vector<64x72xbf16> to vector<8x72xbf16>
    %c0_127 = arith.constant 0 : index
    %c1_128 = arith.constant 1 : index
    %c7_129 = arith.constant 7 : index
    %c1_130 = arith.constant 1 : index
    %c0_131 = arith.constant 0 : index
    %109 = vector.load %arg13[%c0_127, %c1_128, %c7_129, %c1_130, %c0_131] : memref<2x2x10x10x72xbf16, #tpu.memory_space<vmem>>, vector<1x1x1x8x72xbf16>
    %110 = vector.shape_cast %109 : vector<1x1x1x8x72xbf16> to vector<8x72xbf16>
    %111 = vector.shape_cast %108 : vector<8x72xbf16> to vector<1x1x1x8x72xbf16>
    tpu.vector_store %arg13[%c0_127, %c1_128, %c7_129, %c1_130, %c0_131], %111 {strides = array<i32>} : memref<2x2x10x10x72xbf16, #tpu.memory_space<vmem>>, vector<1x1x1x8x72xbf16>,
    %112 = vector.extract_strided_slice %83 {offsets = [56, 0], sizes = [8, 72], strides = [1, 1]} : vector<64x72xbf16> to vector<8x72xbf16>
    %c0_132 = arith.constant 0 : index
    %c1_133 = arith.constant 1 : index
    %c8_134 = arith.constant 8 : index
    %c1_135 = arith.constant 1 : index
    %c0_136 = arith.constant 0 : index
    %113 = vector.load %arg13[%c0_132, %c1_133, %c8_134, %c1_135, %c0_136] : memref<2x2x10x10x72xbf16, #tpu.memory_space<vmem>>, vector<1x1x1x8x72xbf16>
    %114 = vector.shape_cast %113 : vector<1x1x1x8x72xbf16> to vector<8x72xbf16>
    %115 = vector.shape_cast %112 : vector<8x72xbf16> to vector<1x1x1x8x72xbf16>
    tpu.vector_store %arg13[%c0_132, %c1_133, %c8_134, %c1_135, %c0_136], %115 {strides = array<i32>} : memref<2x2x10x10x72xbf16, #tpu.memory_space<vmem>>, vector<1x1x1x8x72xbf16>,
    %cst_137 = arith.constant 0.000000e+00 : bf16
    %116 = vector.broadcast %cst_137 : bf16 to vector<1x10x72xbf16>
    %c1_138 = arith.constant 1 : index
    %c0_139 = arith.constant 0 : index
    %c0_140 = arith.constant 0 : index
    %c0_141 = arith.constant 0 : index
    %c0_142 = arith.constant 0 : index
    %117 = vector.load %arg13[%c1_138, %c0_139, %c0_140, %c0_141, %c0_142] : memref<2x2x10x10x72xbf16, #tpu.memory_space<vmem>>, vector<1x1x1x10x72xbf16>
    %118 = vector.shape_cast %117 : vector<1x1x1x10x72xbf16> to vector<1x10x72xbf16>
    %119 = vector.shape_cast %116 : vector<1x10x72xbf16> to vector<1x1x1x10x72xbf16>
    tpu.vector_store %arg13[%c1_138, %c0_139, %c0_140, %c0_141, %c0_142], %119 {strides = array<i32>} : memref<2x2x10x10x72xbf16, #tpu.memory_space<vmem>>, vector<1x1x1x10x72xbf16>,
    %cst_143 = arith.constant 0.000000e+00 : bf16
    %120 = vector.broadcast %cst_143 : bf16 to vector<1x10x72xbf16>
    %c1_144 = arith.constant 1 : index
    %c0_145 = arith.constant 0 : index
    %c9_146 = arith.constant 9 : index
    %c0_147 = arith.constant 0 : index
    %c0_148 = arith.constant 0 : index
    %121 = vector.load %arg13[%c1_144, %c0_145, %c9_146, %c0_147, %c0_148] : memref<2x2x10x10x72xbf16, #tpu.memory_space<vmem>>, vector<1x1x1x10x72xbf16>
    %122 = vector.shape_cast %121 : vector<1x1x1x10x72xbf16> to vector<1x10x72xbf16>
    %123 = vector.shape_cast %120 : vector<1x10x72xbf16> to vector<1x1x1x10x72xbf16>
    tpu.vector_store %arg13[%c1_144, %c0_145, %c9_146, %c0_147, %c0_148], %123 {strides = array<i32>} : memref<2x2x10x10x72xbf16, #tpu.memory_space<vmem>>, vector<1x1x1x10x72xbf16>,
    %cst_149 = arith.constant 0.000000e+00 : bf16
    %124 = vector.broadcast %cst_149 : bf16 to vector<10x1x72xbf16>
    %c1_150 = arith.constant 1 : index
    %c0_151 = arith.constant 0 : index
    %c0_152 = arith.constant 0 : index
    %c0_153 = arith.constant 0 : index
    %c0_154 = arith.constant 0 : index
    %125 = vector.load %arg13[%c1_150, %c0_151, %c0_152, %c0_153, %c0_154] : memref<2x2x10x10x72xbf16, #tpu.memory_space<vmem>>, vector<1x1x10x1x72xbf16>
    %126 = vector.shape_cast %125 : vector<1x1x10x1x72xbf16> to vector<10x1x72xbf16>
    %127 = vector.shape_cast %124 : vector<10x1x72xbf16> to vector<1x1x10x1x72xbf16>
    tpu.vector_store %arg13[%c1_150, %c0_151, %c0_152, %c0_153, %c0_154], %127 {strides = array<i32>} : memref<2x2x10x10x72xbf16, #tpu.memory_space<vmem>>, vector<1x1x10x1x72xbf16>,
    %cst_155 = arith.constant 0.000000e+00 : bf16
    %128 = vector.broadcast %cst_155 : bf16 to vector<10x1x72xbf16>
    %c1_156 = arith.constant 1 : index
    %c0_157 = arith.constant 0 : index
    %c0_158 = arith.constant 0 : index
    %c9_159 = arith.constant 9 : index
    %c0_160 = arith.constant 0 : index
    %129 = vector.load %arg13[%c1_156, %c0_157, %c0_158, %c9_159, %c0_160] : memref<2x2x10x10x72xbf16, #tpu.memory_space<vmem>>, vector<1x1x10x1x72xbf16>
    %130 = vector.shape_cast %129 : vector<1x1x10x1x72xbf16> to vector<10x1x72xbf16>
    %131 = vector.shape_cast %128 : vector<10x1x72xbf16> to vector<1x1x10x1x72xbf16>
    tpu.vector_store %arg13[%c1_156, %c0_157, %c0_158, %c9_159, %c0_160], %131 {strides = array<i32>} : memref<2x2x10x10x72xbf16, #tpu.memory_space<vmem>>, vector<1x1x10x1x72xbf16>,
    %c0_161 = arith.constant 0 : index
    %c2_162 = arith.constant 2 : index
    %c0_163 = arith.constant 0 : index
    %c0_164 = arith.constant 0 : index
    %132 = vector.load %arg1[%c0_161, %c2_162, %c0_163, %c0_164] : memref<1x4x64x24xbf16, #tpu.memory_space<vmem>>, vector<1x1x64x24xbf16>
    %133 = vector.shape_cast %132 : vector<1x1x64x24xbf16> to vector<64x24xbf16>
    %c0_165 = arith.constant 0 : index
    %c0_166 = arith.constant 0 : index
    %134 = vector.load %arg2[%c0_165, %c0_166] : memref<24x72xbf16, #tpu.memory_space<vmem>>, vector<24x72xbf16>
    %cst_167 = arith.constant dense<0.000000e+00> : vector<64x72xf32>
    %135 = tpu.matmul %133, %134, %cst_167 {dimension_numbers = #tpu.dot_dimension_numbers<[1], [0], [0], [1], [0, 0, 1, 1], [], []>} : vector<64x24xbf16>, vector<24x72xbf16>, vector<64x72xf32> -> vector<64x72xf32>
    %c0_168 = arith.constant 0 : index
    %c0_169 = arith.constant 0 : index
    %136 = vector.load %arg3[%c0_168, %c0_169] : memref<1x72xf32, #tpu.memory_space<vmem>>, vector<1x72xf32>
    %137 = vector.broadcast %136 : vector<1x72xf32> to vector<64x72xf32>
    %138 = arith.addf %135, %137 : vector<64x72xf32>
    %cst_170 = arith.constant 0.000000e+00 : f32
    %139 = vector.broadcast %cst_170 : f32 to vector<64x72xf32>
    %140 = arith.maximumf %138, %139 : vector<64x72xf32>
    %141 = arith.truncf %140 : vector<64x72xf32> to vector<64x72xbf16>
    %142 = vector.extract_strided_slice %141 {offsets = [0, 0], sizes = [8, 72], strides = [1, 1]} : vector<64x72xbf16> to vector<8x72xbf16>
    %c1_171 = arith.constant 1 : index
    %c0_172 = arith.constant 0 : index
    %c1_173 = arith.constant 1 : index
    %c1_174 = arith.constant 1 : index
    %c0_175 = arith.constant 0 : index
    %143 = vector.load %arg13[%c1_171, %c0_172, %c1_173, %c1_174, %c0_175] : memref<2x2x10x10x72xbf16, #tpu.memory_space<vmem>>, vector<1x1x1x8x72xbf16>
    %144 = vector.shape_cast %143 : vector<1x1x1x8x72xbf16> to vector<8x72xbf16>
    %145 = vector.shape_cast %142 : vector<8x72xbf16> to vector<1x1x1x8x72xbf16>
    tpu.vector_store %arg13[%c1_171, %c0_172, %c1_173, %c1_174, %c0_175], %145 {strides = array<i32>} : memref<2x2x10x10x72xbf16, #tpu.memory_space<vmem>>, vector<1x1x1x8x72xbf16>,
    %146 = vector.extract_strided_slice %141 {offsets = [8, 0], sizes = [8, 72], strides = [1, 1]} : vector<64x72xbf16> to vector<8x72xbf16>
    %c1_176 = arith.constant 1 : index
    %c0_177 = arith.constant 0 : index
    %c2_178 = arith.constant 2 : index
    %c1_179 = arith.constant 1 : index
    %c0_180 = arith.constant 0 : index
    %147 = vector.load %arg13[%c1_176, %c0_177, %c2_178, %c1_179, %c0_180] : memref<2x2x10x10x72xbf16, #tpu.memory_space<vmem>>, vector<1x1x1x8x72xbf16>
    %148 = vector.shape_cast %147 : vector<1x1x1x8x72xbf16> to vector<8x72xbf16>
    %149 = vector.shape_cast %146 : vector<8x72xbf16> to vector<1x1x1x8x72xbf16>
    tpu.vector_store %arg13[%c1_176, %c0_177, %c2_178, %c1_179, %c0_180], %149 {strides = array<i32>} : memref<2x2x10x10x72xbf16, #tpu.memory_space<vmem>>, vector<1x1x1x8x72xbf16>,
    %150 = vector.extract_strided_slice %141 {offsets = [16, 0], sizes = [8, 72], strides = [1, 1]} : vector<64x72xbf16> to vector<8x72xbf16>
    %c1_181 = arith.constant 1 : index
    %c0_182 = arith.constant 0 : index
    %c3_183 = arith.constant 3 : index
    %c1_184 = arith.constant 1 : index
    %c0_185 = arith.constant 0 : index
    %151 = vector.load %arg13[%c1_181, %c0_182, %c3_183, %c1_184, %c0_185] : memref<2x2x10x10x72xbf16, #tpu.memory_space<vmem>>, vector<1x1x1x8x72xbf16>
    %152 = vector.shape_cast %151 : vector<1x1x1x8x72xbf16> to vector<8x72xbf16>
    %153 = vector.shape_cast %150 : vector<8x72xbf16> to vector<1x1x1x8x72xbf16>
    tpu.vector_store %arg13[%c1_181, %c0_182, %c3_183, %c1_184, %c0_185], %153 {strides = array<i32>} : memref<2x2x10x10x72xbf16, #tpu.memory_space<vmem>>, vector<1x1x1x8x72xbf16>,
    %154 = vector.extract_strided_slice %141 {offsets = [24, 0], sizes = [8, 72], strides = [1, 1]} : vector<64x72xbf16> to vector<8x72xbf16>
    %c1_186 = arith.constant 1 : index
    %c0_187 = arith.constant 0 : index
    %c4_188 = arith.constant 4 : index
    %c1_189 = arith.constant 1 : index
    %c0_190 = arith.constant 0 : index
    %155 = vector.load %arg13[%c1_186, %c0_187, %c4_188, %c1_189, %c0_190] : memref<2x2x10x10x72xbf16, #tpu.memory_space<vmem>>, vector<1x1x1x8x72xbf16>
    %156 = vector.shape_cast %155 : vector<1x1x1x8x72xbf16> to vector<8x72xbf16>
    %157 = vector.shape_cast %154 : vector<8x72xbf16> to vector<1x1x1x8x72xbf16>
    tpu.vector_store %arg13[%c1_186, %c0_187, %c4_188, %c1_189, %c0_190], %157 {strides = array<i32>} : memref<2x2x10x10x72xbf16, #tpu.memory_space<vmem>>, vector<1x1x1x8x72xbf16>,
    %158 = vector.extract_strided_slice %141 {offsets = [32, 0], sizes = [8, 72], strides = [1, 1]} : vector<64x72xbf16> to vector<8x72xbf16>
    %c1_191 = arith.constant 1 : index
    %c0_192 = arith.constant 0 : index
    %c5_193 = arith.constant 5 : index
    %c1_194 = arith.constant 1 : index
    %c0_195 = arith.constant 0 : index
    %159 = vector.load %arg13[%c1_191, %c0_192, %c5_193, %c1_194, %c0_195] : memref<2x2x10x10x72xbf16, #tpu.memory_space<vmem>>, vector<1x1x1x8x72xbf16>
    %160 = vector.shape_cast %159 : vector<1x1x1x8x72xbf16> to vector<8x72xbf16>
    %161 = vector.shape_cast %158 : vector<8x72xbf16> to vector<1x1x1x8x72xbf16>
    tpu.vector_store %arg13[%c1_191, %c0_192, %c5_193, %c1_194, %c0_195], %161 {strides = array<i32>} : memref<2x2x10x10x72xbf16, #tpu.memory_space<vmem>>, vector<1x1x1x8x72xbf16>,
    %162 = vector.extract_strided_slice %141 {offsets = [40, 0], sizes = [8, 72], strides = [1, 1]} : vector<64x72xbf16> to vector<8x72xbf16>
    %c1_196 = arith.constant 1 : index
    %c0_197 = arith.constant 0 : index
    %c6_198 = arith.constant 6 : index
    %c1_199 = arith.constant 1 : index
    %c0_200 = arith.constant 0 : index
    %163 = vector.load %arg13[%c1_196, %c0_197, %c6_198, %c1_199, %c0_200] : memref<2x2x10x10x72xbf16, #tpu.memory_space<vmem>>, vector<1x1x1x8x72xbf16>
    %164 = vector.shape_cast %163 : vector<1x1x1x8x72xbf16> to vector<8x72xbf16>
    %165 = vector.shape_cast %162 : vector<8x72xbf16> to vector<1x1x1x8x72xbf16>
    tpu.vector_store %arg13[%c1_196, %c0_197, %c6_198, %c1_199, %c0_200], %165 {strides = array<i32>} : memref<2x2x10x10x72xbf16, #tpu.memory_space<vmem>>, vector<1x1x1x8x72xbf16>,
    %166 = vector.extract_strided_slice %141 {offsets = [48, 0], sizes = [8, 72], strides = [1, 1]} : vector<64x72xbf16> to vector<8x72xbf16>
    %c1_201 = arith.constant 1 : index
    %c0_202 = arith.constant 0 : index
    %c7_203 = arith.constant 7 : index
    %c1_204 = arith.constant 1 : index
    %c0_205 = arith.constant 0 : index
    %167 = vector.load %arg13[%c1_201, %c0_202, %c7_203, %c1_204, %c0_205] : memref<2x2x10x10x72xbf16, #tpu.memory_space<vmem>>, vector<1x1x1x8x72xbf16>
    %168 = vector.shape_cast %167 : vector<1x1x1x8x72xbf16> to vector<8x72xbf16>
    %169 = vector.shape_cast %166 : vector<8x72xbf16> to vector<1x1x1x8x72xbf16>
    tpu.vector_store %arg13[%c1_201, %c0_202, %c7_203, %c1_204, %c0_205], %169 {strides = array<i32>} : memref<2x2x10x10x72xbf16, #tpu.memory_space<vmem>>, vector<1x1x1x8x72xbf16>,
    %170 = vector.extract_strided_slice %141 {offsets = [56, 0], sizes = [8, 72], strides = [1, 1]} : vector<64x72xbf16> to vector<8x72xbf16>
    %c1_206 = arith.constant 1 : index
    %c0_207 = arith.constant 0 : index
    %c8_208 = arith.constant 8 : index
    %c1_209 = arith.constant 1 : index
    %c0_210 = arith.constant 0 : index
    %171 = vector.load %arg13[%c1_206, %c0_207, %c8_208, %c1_209, %c0_210] : memref<2x2x10x10x72xbf16, #tpu.memory_space<vmem>>, vector<1x1x1x8x72xbf16>
    %172 = vector.shape_cast %171 : vector<1x1x1x8x72xbf16> to vector<8x72xbf16>
    %173 = vector.shape_cast %170 : vector<8x72xbf16> to vector<1x1x1x8x72xbf16>
    tpu.vector_store %arg13[%c1_206, %c0_207, %c8_208, %c1_209, %c0_210], %173 {strides = array<i32>} : memref<2x2x10x10x72xbf16, #tpu.memory_space<vmem>>, vector<1x1x1x8x72xbf16>,
    %cst_211 = arith.constant 0.000000e+00 : bf16
    %174 = vector.broadcast %cst_211 : bf16 to vector<1x10x72xbf16>
    %c1_212 = arith.constant 1 : index
    %c1_213 = arith.constant 1 : index
    %c0_214 = arith.constant 0 : index
    %c0_215 = arith.constant 0 : index
    %c0_216 = arith.constant 0 : index
    %175 = vector.load %arg13[%c1_212, %c1_213, %c0_214, %c0_215, %c0_216] : memref<2x2x10x10x72xbf16, #tpu.memory_space<vmem>>, vector<1x1x1x10x72xbf16>
    %176 = vector.shape_cast %175 : vector<1x1x1x10x72xbf16> to vector<1x10x72xbf16>
    %177 = vector.shape_cast %174 : vector<1x10x72xbf16> to vector<1x1x1x10x72xbf16>
    tpu.vector_store %arg13[%c1_212, %c1_213, %c0_214, %c0_215, %c0_216], %177 {strides = array<i32>} : memref<2x2x10x10x72xbf16, #tpu.memory_space<vmem>>, vector<1x1x1x10x72xbf16>,
    %cst_217 = arith.constant 0.000000e+00 : bf16
    %178 = vector.broadcast %cst_217 : bf16 to vector<1x10x72xbf16>
    %c1_218 = arith.constant 1 : index
    %c1_219 = arith.constant 1 : index
    %c9_220 = arith.constant 9 : index
    %c0_221 = arith.constant 0 : index
    %c0_222 = arith.constant 0 : index
    %179 = vector.load %arg13[%c1_218, %c1_219, %c9_220, %c0_221, %c0_222] : memref<2x2x10x10x72xbf16, #tpu.memory_space<vmem>>, vector<1x1x1x10x72xbf16>
    %180 = vector.shape_cast %179 : vector<1x1x1x10x72xbf16> to vector<1x10x72xbf16>
    %181 = vector.shape_cast %178 : vector<1x10x72xbf16> to vector<1x1x1x10x72xbf16>
    tpu.vector_store %arg13[%c1_218, %c1_219, %c9_220, %c0_221, %c0_222], %181 {strides = array<i32>} : memref<2x2x10x10x72xbf16, #tpu.memory_space<vmem>>, vector<1x1x1x10x72xbf16>,
    %cst_223 = arith.constant 0.000000e+00 : bf16
    %182 = vector.broadcast %cst_223 : bf16 to vector<10x1x72xbf16>
    %c1_224 = arith.constant 1 : index
    %c1_225 = arith.constant 1 : index
    %c0_226 = arith.constant 0 : index
    %c0_227 = arith.constant 0 : index
    %c0_228 = arith.constant 0 : index
    %183 = vector.load %arg13[%c1_224, %c1_225, %c0_226, %c0_227, %c0_228] : memref<2x2x10x10x72xbf16, #tpu.memory_space<vmem>>, vector<1x1x10x1x72xbf16>
    %184 = vector.shape_cast %183 : vector<1x1x10x1x72xbf16> to vector<10x1x72xbf16>
    %185 = vector.shape_cast %182 : vector<10x1x72xbf16> to vector<1x1x10x1x72xbf16>
    tpu.vector_store %arg13[%c1_224, %c1_225, %c0_226, %c0_227, %c0_228], %185 {strides = array<i32>} : memref<2x2x10x10x72xbf16, #tpu.memory_space<vmem>>, vector<1x1x10x1x72xbf16>,
    %cst_229 = arith.constant 0.000000e+00 : bf16
    %186 = vector.broadcast %cst_229 : bf16 to vector<10x1x72xbf16>
    %c1_230 = arith.constant 1 : index
    %c1_231 = arith.constant 1 : index
    %c0_232 = arith.constant 0 : index
    %c9_233 = arith.constant 9 : index
    %c0_234 = arith.constant 0 : index
    %187 = vector.load %arg13[%c1_230, %c1_231, %c0_232, %c9_233, %c0_234] : memref<2x2x10x10x72xbf16, #tpu.memory_space<vmem>>, vector<1x1x10x1x72xbf16>
    %188 = vector.shape_cast %187 : vector<1x1x10x1x72xbf16> to vector<10x1x72xbf16>
    %189 = vector.shape_cast %186 : vector<10x1x72xbf16> to vector<1x1x10x1x72xbf16>
    tpu.vector_store %arg13[%c1_230, %c1_231, %c0_232, %c9_233, %c0_234], %189 {strides = array<i32>} : memref<2x2x10x10x72xbf16, #tpu.memory_space<vmem>>, vector<1x1x10x1x72xbf16>,
    %c0_235 = arith.constant 0 : index
    %c3_236 = arith.constant 3 : index
    %c0_237 = arith.constant 0 : index
    %c0_238 = arith.constant 0 : index
    %190 = vector.load %arg1[%c0_235, %c3_236, %c0_237, %c0_238] : memref<1x4x64x24xbf16, #tpu.memory_space<vmem>>, vector<1x1x64x24xbf16>
    %191 = vector.shape_cast %190 : vector<1x1x64x24xbf16> to vector<64x24xbf16>
    %c0_239 = arith.constant 0 : index
    %c0_240 = arith.constant 0 : index
    %192 = vector.load %arg2[%c0_239, %c0_240] : memref<24x72xbf16, #tpu.memory_space<vmem>>, vector<24x72xbf16>
    %cst_241 = arith.constant dense<0.000000e+00> : vector<64x72xf32>
    %193 = tpu.matmul %191, %192, %cst_241 {dimension_numbers = #tpu.dot_dimension_numbers<[1], [0], [0], [1], [0, 0, 1, 1], [], []>} : vector<64x24xbf16>, vector<24x72xbf16>, vector<64x72xf32> -> vector<64x72xf32>
    %c0_242 = arith.constant 0 : index
    %c0_243 = arith.constant 0 : index
    %194 = vector.load %arg3[%c0_242, %c0_243] : memref<1x72xf32, #tpu.memory_space<vmem>>, vector<1x72xf32>
    %195 = vector.broadcast %194 : vector<1x72xf32> to vector<64x72xf32>
    %196 = arith.addf %193, %195 : vector<64x72xf32>
    %cst_244 = arith.constant 0.000000e+00 : f32
    %197 = vector.broadcast %cst_244 : f32 to vector<64x72xf32>
    %198 = arith.maximumf %196, %197 : vector<64x72xf32>
    %199 = arith.truncf %198 : vector<64x72xf32> to vector<64x72xbf16>
    %200 = vector.extract_strided_slice %199 {offsets = [0, 0], sizes = [8, 72], strides = [1, 1]} : vector<64x72xbf16> to vector<8x72xbf16>
    %c1_245 = arith.constant 1 : index
    %c1_246 = arith.constant 1 : index
    %c1_247 = arith.constant 1 : index
    %c1_248 = arith.constant 1 : index
    %c0_249 = arith.constant 0 : index
    %201 = vector.load %arg13[%c1_245, %c1_246, %c1_247, %c1_248, %c0_249] : memref<2x2x10x10x72xbf16, #tpu.memory_space<vmem>>, vector<1x1x1x8x72xbf16>
    %202 = vector.shape_cast %201 : vector<1x1x1x8x72xbf16> to vector<8x72xbf16>
    %203 = vector.shape_cast %200 : vector<8x72xbf16> to vector<1x1x1x8x72xbf16>
    tpu.vector_store %arg13[%c1_245, %c1_246, %c1_247, %c1_248, %c0_249], %203 {strides = array<i32>} : memref<2x2x10x10x72xbf16, #tpu.memory_space<vmem>>, vector<1x1x1x8x72xbf16>,
    %204 = vector.extract_strided_slice %199 {offsets = [8, 0], sizes = [8, 72], strides = [1, 1]} : vector<64x72xbf16> to vector<8x72xbf16>
    %c1_250 = arith.constant 1 : index
    %c1_251 = arith.constant 1 : index
    %c2_252 = arith.constant 2 : index
    %c1_253 = arith.constant 1 : index
    %c0_254 = arith.constant 0 : index
    %205 = vector.load %arg13[%c1_250, %c1_251, %c2_252, %c1_253, %c0_254] : memref<2x2x10x10x72xbf16, #tpu.memory_space<vmem>>, vector<1x1x1x8x72xbf16>
    %206 = vector.shape_cast %205 : vector<1x1x1x8x72xbf16> to vector<8x72xbf16>
    %207 = vector.shape_cast %204 : vector<8x72xbf16> to vector<1x1x1x8x72xbf16>
    tpu.vector_store %arg13[%c1_250, %c1_251, %c2_252, %c1_253, %c0_254], %207 {strides = array<i32>} : memref<2x2x10x10x72xbf16, #tpu.memory_space<vmem>>, vector<1x1x1x8x72xbf16>,
    %208 = vector.extract_strided_slice %199 {offsets = [16, 0], sizes = [8, 72], strides = [1, 1]} : vector<64x72xbf16> to vector<8x72xbf16>
    %c1_255 = arith.constant 1 : index
    %c1_256 = arith.constant 1 : index
    %c3_257 = arith.constant 3 : index
    %c1_258 = arith.constant 1 : index
    %c0_259 = arith.constant 0 : index
    %209 = vector.load %arg13[%c1_255, %c1_256, %c3_257, %c1_258, %c0_259] : memref<2x2x10x10x72xbf16, #tpu.memory_space<vmem>>, vector<1x1x1x8x72xbf16>
    %210 = vector.shape_cast %209 : vector<1x1x1x8x72xbf16> to vector<8x72xbf16>
    %211 = vector.shape_cast %208 : vector<8x72xbf16> to vector<1x1x1x8x72xbf16>
    tpu.vector_store %arg13[%c1_255, %c1_256, %c3_257, %c1_258, %c0_259], %211 {strides = array<i32>} : memref<2x2x10x10x72xbf16, #tpu.memory_space<vmem>>, vector<1x1x1x8x72xbf16>,
    %212 = vector.extract_strided_slice %199 {offsets = [24, 0], sizes = [8, 72], strides = [1, 1]} : vector<64x72xbf16> to vector<8x72xbf16>
    %c1_260 = arith.constant 1 : index
    %c1_261 = arith.constant 1 : index
    %c4_262 = arith.constant 4 : index
    %c1_263 = arith.constant 1 : index
    %c0_264 = arith.constant 0 : index
    %213 = vector.load %arg13[%c1_260, %c1_261, %c4_262, %c1_263, %c0_264] : memref<2x2x10x10x72xbf16, #tpu.memory_space<vmem>>, vector<1x1x1x8x72xbf16>
    %214 = vector.shape_cast %213 : vector<1x1x1x8x72xbf16> to vector<8x72xbf16>
    %215 = vector.shape_cast %212 : vector<8x72xbf16> to vector<1x1x1x8x72xbf16>
    tpu.vector_store %arg13[%c1_260, %c1_261, %c4_262, %c1_263, %c0_264], %215 {strides = array<i32>} : memref<2x2x10x10x72xbf16, #tpu.memory_space<vmem>>, vector<1x1x1x8x72xbf16>,
    %216 = vector.extract_strided_slice %199 {offsets = [32, 0], sizes = [8, 72], strides = [1, 1]} : vector<64x72xbf16> to vector<8x72xbf16>
    %c1_265 = arith.constant 1 : index
    %c1_266 = arith.constant 1 : index
    %c5_267 = arith.constant 5 : index
    %c1_268 = arith.constant 1 : index
    %c0_269 = arith.constant 0 : index
    %217 = vector.load %arg13[%c1_265, %c1_266, %c5_267, %c1_268, %c0_269] : memref<2x2x10x10x72xbf16, #tpu.memory_space<vmem>>, vector<1x1x1x8x72xbf16>
    %218 = vector.shape_cast %217 : vector<1x1x1x8x72xbf16> to vector<8x72xbf16>
    %219 = vector.shape_cast %216 : vector<8x72xbf16> to vector<1x1x1x8x72xbf16>
    tpu.vector_store %arg13[%c1_265, %c1_266, %c5_267, %c1_268, %c0_269], %219 {strides = array<i32>} : memref<2x2x10x10x72xbf16, #tpu.memory_space<vmem>>, vector<1x1x1x8x72xbf16>,
    %220 = vector.extract_strided_slice %199 {offsets = [40, 0], sizes = [8, 72], strides = [1, 1]} : vector<64x72xbf16> to vector<8x72xbf16>
    %c1_270 = arith.constant 1 : index
    %c1_271 = arith.constant 1 : index
    %c6_272 = arith.constant 6 : index
    %c1_273 = arith.constant 1 : index
    %c0_274 = arith.constant 0 : index
    %221 = vector.load %arg13[%c1_270, %c1_271, %c6_272, %c1_273, %c0_274] : memref<2x2x10x10x72xbf16, #tpu.memory_space<vmem>>, vector<1x1x1x8x72xbf16>
    %222 = vector.shape_cast %221 : vector<1x1x1x8x72xbf16> to vector<8x72xbf16>
    %223 = vector.shape_cast %220 : vector<8x72xbf16> to vector<1x1x1x8x72xbf16>
    tpu.vector_store %arg13[%c1_270, %c1_271, %c6_272, %c1_273, %c0_274], %223 {strides = array<i32>} : memref<2x2x10x10x72xbf16, #tpu.memory_space<vmem>>, vector<1x1x1x8x72xbf16>,
    %224 = vector.extract_strided_slice %199 {offsets = [48, 0], sizes = [8, 72], strides = [1, 1]} : vector<64x72xbf16> to vector<8x72xbf16>
    %c1_275 = arith.constant 1 : index
    %c1_276 = arith.constant 1 : index
    %c7_277 = arith.constant 7 : index
    %c1_278 = arith.constant 1 : index
    %c0_279 = arith.constant 0 : index
    %225 = vector.load %arg13[%c1_275, %c1_276, %c7_277, %c1_278, %c0_279] : memref<2x2x10x10x72xbf16, #tpu.memory_space<vmem>>, vector<1x1x1x8x72xbf16>
    %226 = vector.shape_cast %225 : vector<1x1x1x8x72xbf16> to vector<8x72xbf16>
    %227 = vector.shape_cast %224 : vector<8x72xbf16> to vector<1x1x1x8x72xbf16>
    tpu.vector_store %arg13[%c1_275, %c1_276, %c7_277, %c1_278, %c0_279], %227 {strides = array<i32>} : memref<2x2x10x10x72xbf16, #tpu.memory_space<vmem>>, vector<1x1x1x8x72xbf16>,
    %228 = vector.extract_strided_slice %199 {offsets = [56, 0], sizes = [8, 72], strides = [1, 1]} : vector<64x72xbf16> to vector<8x72xbf16>
    %c1_280 = arith.constant 1 : index
    %c1_281 = arith.constant 1 : index
    %c8_282 = arith.constant 8 : index
    %c1_283 = arith.constant 1 : index
    %c0_284 = arith.constant 0 : index
    %229 = vector.load %arg13[%c1_280, %c1_281, %c8_282, %c1_283, %c0_284] : memref<2x2x10x10x72xbf16, #tpu.memory_space<vmem>>, vector<1x1x1x8x72xbf16>
    %230 = vector.shape_cast %229 : vector<1x1x1x8x72xbf16> to vector<8x72xbf16>
    %231 = vector.shape_cast %228 : vector<8x72xbf16> to vector<1x1x1x8x72xbf16>
    tpu.vector_store %arg13[%c1_280, %c1_281, %c8_282, %c1_283, %c0_284], %231 {strides = array<i32>} : memref<2x2x10x10x72xbf16, #tpu.memory_space<vmem>>, vector<1x1x1x8x72xbf16>,
    %c0_285 = arith.constant 0 : index
    %c0_286 = arith.constant 0 : index
    %c0_287 = arith.constant 0 : index
    %c0_288 = arith.constant 0 : index
    %c0_289 = arith.constant 0 : index
    %232 = vector.load %arg13[%c0_285, %c0_286, %c0_287, %c0_288, %c0_289] : memref<2x2x10x10x72xbf16, #tpu.memory_space<vmem>>, vector<1x1x10x8x72xbf16>
    %233 = vector.shape_cast %232 : vector<1x1x10x8x72xbf16> to vector<10x8x72xbf16>
    %234 = arith.extf %233 : vector<10x8x72xbf16> to vector<10x8x72xf32>
    %c1_290 = arith.constant 1 : index
    %c0_291 = arith.constant 0 : index
    %c0_292 = arith.constant 0 : index
    %c0_293 = arith.constant 0 : index
    %c0_294 = arith.constant 0 : index
    %235 = vector.load %arg13[%c1_290, %c0_291, %c0_292, %c0_293, %c0_294] : memref<2x2x10x10x72xbf16, #tpu.memory_space<vmem>>, vector<1x1x10x8x72xbf16>
    %236 = vector.shape_cast %235 : vector<1x1x10x8x72xbf16> to vector<10x8x72xbf16>
    %237 = arith.extf %236 : vector<10x8x72xbf16> to vector<10x8x72xf32>
    %238 = vector.extract_strided_slice %234 {offsets = [0, 0, 0], sizes = [8, 8, 72], strides = [1, 1, 1]} : vector<10x8x72xf32> to vector<8x8x72xf32>
    %c0_295 = arith.constant 0 : index
    %c0_296 = arith.constant 0 : index
    %c0_297 = arith.constant 0 : index
    %239 = vector.load %arg4[%c0_295, %c0_296, %c0_297] : memref<25x1x72xf32, #tpu.memory_space<vmem>>, vector<1x1x72xf32>
    %240 = vector.shape_cast %239 : vector<1x1x72xf32> to vector<1x72xf32>
    %241 = vector.shape_cast %240 : vector<1x72xf32> to vector<1x1x72xf32>
    %242 = vector.broadcast %241 : vector<1x1x72xf32> to vector<8x8x72xf32>
    %243 = arith.mulf %238, %242 : vector<8x8x72xf32>
    %244 = vector.extract_strided_slice %237 {offsets = [0, 0, 0], sizes = [8, 8, 72], strides = [1, 1, 1]} : vector<10x8x72xf32> to vector<8x8x72xf32>
    %c5_298 = arith.constant 5 : index
    %c0_299 = arith.constant 0 : index
    %c0_300 = arith.constant 0 : index
    %245 = vector.load %arg4[%c5_298, %c0_299, %c0_300] : memref<25x1x72xf32, #tpu.memory_space<vmem>>, vector<1x1x72xf32>
    %246 = vector.shape_cast %245 : vector<1x1x72xf32> to vector<1x72xf32>
    %247 = vector.shape_cast %246 : vector<1x72xf32> to vector<1x1x72xf32>
    %248 = vector.broadcast %247 : vector<1x1x72xf32> to vector<8x8x72xf32>
    %249 = arith.mulf %244, %248 : vector<8x8x72xf32>
    %250 = vector.extract_strided_slice %234 {offsets = [1, 0, 0], sizes = [8, 8, 72], strides = [1, 1, 1]} : vector<10x8x72xf32> to vector<8x8x72xf32>
    %c10 = arith.constant 10 : index
    %c0_301 = arith.constant 0 : index
    %c0_302 = arith.constant 0 : index
    %251 = vector.load %arg4[%c10, %c0_301, %c0_302] : memref<25x1x72xf32, #tpu.memory_space<vmem>>, vector<1x1x72xf32>
    %252 = vector.shape_cast %251 : vector<1x1x72xf32> to vector<1x72xf32>
    %253 = vector.shape_cast %252 : vector<1x72xf32> to vector<1x1x72xf32>
    %254 = vector.broadcast %253 : vector<1x1x72xf32> to vector<8x8x72xf32>
    %255 = arith.mulf %250, %254 : vector<8x8x72xf32>
    %256 = arith.addf %243, %255 : vector<8x8x72xf32>
    %257 = vector.extract_strided_slice %237 {offsets = [1, 0, 0], sizes = [8, 8, 72], strides = [1, 1, 1]} : vector<10x8x72xf32> to vector<8x8x72xf32>
    %c15 = arith.constant 15 : index
    %c0_303 = arith.constant 0 : index
    %c0_304 = arith.constant 0 : index
    %258 = vector.load %arg4[%c15, %c0_303, %c0_304] : memref<25x1x72xf32, #tpu.memory_space<vmem>>, vector<1x1x72xf32>
    %259 = vector.shape_cast %258 : vector<1x1x72xf32> to vector<1x72xf32>
    %260 = vector.shape_cast %259 : vector<1x72xf32> to vector<1x1x72xf32>
    %261 = vector.broadcast %260 : vector<1x1x72xf32> to vector<8x8x72xf32>
    %262 = arith.mulf %257, %261 : vector<8x8x72xf32>
    %263 = arith.addf %249, %262 : vector<8x8x72xf32>
    %264 = vector.extract_strided_slice %234 {offsets = [2, 0, 0], sizes = [8, 8, 72], strides = [1, 1, 1]} : vector<10x8x72xf32> to vector<8x8x72xf32>
    %c20 = arith.constant 20 : index
    %c0_305 = arith.constant 0 : index
    %c0_306 = arith.constant 0 : index
    %265 = vector.load %arg4[%c20, %c0_305, %c0_306] : memref<25x1x72xf32, #tpu.memory_space<vmem>>, vector<1x1x72xf32>
    %266 = vector.shape_cast %265 : vector<1x1x72xf32> to vector<1x72xf32>
    %267 = vector.shape_cast %266 : vector<1x72xf32> to vector<1x1x72xf32>
    %268 = vector.broadcast %267 : vector<1x1x72xf32> to vector<8x8x72xf32>
    %269 = arith.mulf %264, %268 : vector<8x8x72xf32>
    %270 = arith.addf %256, %269 : vector<8x8x72xf32>
    %c0_307 = arith.constant 0 : index
    %c1_308 = arith.constant 1 : index
    %c0_309 = arith.constant 0 : index
    %c0_310 = arith.constant 0 : index
    %c0_311 = arith.constant 0 : index
    %271 = vector.load %arg13[%c0_307, %c1_308, %c0_309, %c0_310, %c0_311] : memref<2x2x10x10x72xbf16, #tpu.memory_space<vmem>>, vector<1x1x10x8x72xbf16>
    %272 = vector.shape_cast %271 : vector<1x1x10x8x72xbf16> to vector<10x8x72xbf16>
    %273 = arith.extf %272 : vector<10x8x72xbf16> to vector<10x8x72xf32>
    %c1_312 = arith.constant 1 : index
    %c1_313 = arith.constant 1 : index
    %c0_314 = arith.constant 0 : index
    %c0_315 = arith.constant 0 : index
    %c0_316 = arith.constant 0 : index
    %274 = vector.load %arg13[%c1_312, %c1_313, %c0_314, %c0_315, %c0_316] : memref<2x2x10x10x72xbf16, #tpu.memory_space<vmem>>, vector<1x1x10x8x72xbf16>
    %275 = vector.shape_cast %274 : vector<1x1x10x8x72xbf16> to vector<10x8x72xbf16>
    %276 = arith.extf %275 : vector<10x8x72xbf16> to vector<10x8x72xf32>
    %277 = vector.extract_strided_slice %273 {offsets = [0, 0, 0], sizes = [8, 8, 72], strides = [1, 1, 1]} : vector<10x8x72xf32> to vector<8x8x72xf32>
    %c1_317 = arith.constant 1 : index
    %c0_318 = arith.constant 0 : index
    %c0_319 = arith.constant 0 : index
    %278 = vector.load %arg4[%c1_317, %c0_318, %c0_319] : memref<25x1x72xf32, #tpu.memory_space<vmem>>, vector<1x1x72xf32>
    %279 = vector.shape_cast %278 : vector<1x1x72xf32> to vector<1x72xf32>
    %280 = vector.shape_cast %279 : vector<1x72xf32> to vector<1x1x72xf32>
    %281 = vector.broadcast %280 : vector<1x1x72xf32> to vector<8x8x72xf32>
    %282 = arith.mulf %277, %281 : vector<8x8x72xf32>
    %283 = arith.addf %263, %282 : vector<8x8x72xf32>
    %284 = vector.extract_strided_slice %276 {offsets = [0, 0, 0], sizes = [8, 8, 72], strides = [1, 1, 1]} : vector<10x8x72xf32> to vector<8x8x72xf32>
    %c6_320 = arith.constant 6 : index
    %c0_321 = arith.constant 0 : index
    %c0_322 = arith.constant 0 : index
    %285 = vector.load %arg4[%c6_320, %c0_321, %c0_322] : memref<25x1x72xf32, #tpu.memory_space<vmem>>, vector<1x1x72xf32>
    %286 = vector.shape_cast %285 : vector<1x1x72xf32> to vector<1x72xf32>
    %287 = vector.shape_cast %286 : vector<1x72xf32> to vector<1x1x72xf32>
    %288 = vector.broadcast %287 : vector<1x1x72xf32> to vector<8x8x72xf32>
    %289 = arith.mulf %284, %288 : vector<8x8x72xf32>
    %290 = arith.addf %270, %289 : vector<8x8x72xf32>
    %291 = vector.extract_strided_slice %273 {offsets = [1, 0, 0], sizes = [8, 8, 72], strides = [1, 1, 1]} : vector<10x8x72xf32> to vector<8x8x72xf32>
    %c11 = arith.constant 11 : index
    %c0_323 = arith.constant 0 : index
    %c0_324 = arith.constant 0 : index
    %292 = vector.load %arg4[%c11, %c0_323, %c0_324] : memref<25x1x72xf32, #tpu.memory_space<vmem>>, vector<1x1x72xf32>
    %293 = vector.shape_cast %292 : vector<1x1x72xf32> to vector<1x72xf32>
    %294 = vector.shape_cast %293 : vector<1x72xf32> to vector<1x1x72xf32>
    %295 = vector.broadcast %294 : vector<1x1x72xf32> to vector<8x8x72xf32>
    %296 = arith.mulf %291, %295 : vector<8x8x72xf32>
    %297 = arith.addf %283, %296 : vector<8x8x72xf32>
    %298 = vector.extract_strided_slice %276 {offsets = [1, 0, 0], sizes = [8, 8, 72], strides = [1, 1, 1]} : vector<10x8x72xf32> to vector<8x8x72xf32>
    %c16 = arith.constant 16 : index
    %c0_325 = arith.constant 0 : index
    %c0_326 = arith.constant 0 : index
    %299 = vector.load %arg4[%c16, %c0_325, %c0_326] : memref<25x1x72xf32, #tpu.memory_space<vmem>>, vector<1x1x72xf32>
    %300 = vector.shape_cast %299 : vector<1x1x72xf32> to vector<1x72xf32>
    %301 = vector.shape_cast %300 : vector<1x72xf32> to vector<1x1x72xf32>
    %302 = vector.broadcast %301 : vector<1x1x72xf32> to vector<8x8x72xf32>
    %303 = arith.mulf %298, %302 : vector<8x8x72xf32>
    %304 = arith.addf %290, %303 : vector<8x8x72xf32>
    %305 = vector.extract_strided_slice %273 {offsets = [2, 0, 0], sizes = [8, 8, 72], strides = [1, 1, 1]} : vector<10x8x72xf32> to vector<8x8x72xf32>
    %c21 = arith.constant 21 : index
    %c0_327 = arith.constant 0 : index
    %c0_328 = arith.constant 0 : index
    %306 = vector.load %arg4[%c21, %c0_327, %c0_328] : memref<25x1x72xf32, #tpu.memory_space<vmem>>, vector<1x1x72xf32>
    %307 = vector.shape_cast %306 : vector<1x1x72xf32> to vector<1x72xf32>
    %308 = vector.shape_cast %307 : vector<1x72xf32> to vector<1x1x72xf32>
    %309 = vector.broadcast %308 : vector<1x1x72xf32> to vector<8x8x72xf32>
    %310 = arith.mulf %305, %309 : vector<8x8x72xf32>
    %311 = arith.addf %297, %310 : vector<8x8x72xf32>
    %c0_329 = arith.constant 0 : index
    %c0_330 = arith.constant 0 : index
    %c0_331 = arith.constant 0 : index
    %c1_332 = arith.constant 1 : index
    %c0_333 = arith.constant 0 : index
    %312 = vector.load %arg13[%c0_329, %c0_330, %c0_331, %c1_332, %c0_333] : memref<2x2x10x10x72xbf16, #tpu.memory_space<vmem>>, vector<1x1x10x8x72xbf16>
    %313 = vector.shape_cast %312 : vector<1x1x10x8x72xbf16> to vector<10x8x72xbf16>
    %314 = arith.extf %313 : vector<10x8x72xbf16> to vector<10x8x72xf32>
    %c1_334 = arith.constant 1 : index
    %c0_335 = arith.constant 0 : index
    %c0_336 = arith.constant 0 : index
    %c1_337 = arith.constant 1 : index
    %c0_338 = arith.constant 0 : index
    %315 = vector.load %arg13[%c1_334, %c0_335, %c0_336, %c1_337, %c0_338] : memref<2x2x10x10x72xbf16, #tpu.memory_space<vmem>>, vector<1x1x10x8x72xbf16>
    %316 = vector.shape_cast %315 : vector<1x1x10x8x72xbf16> to vector<10x8x72xbf16>
    %317 = arith.extf %316 : vector<10x8x72xbf16> to vector<10x8x72xf32>
    %318 = vector.extract_strided_slice %314 {offsets = [0, 0, 0], sizes = [8, 8, 72], strides = [1, 1, 1]} : vector<10x8x72xf32> to vector<8x8x72xf32>
    %c2_339 = arith.constant 2 : index
    %c0_340 = arith.constant 0 : index
    %c0_341 = arith.constant 0 : index
    %319 = vector.load %arg4[%c2_339, %c0_340, %c0_341] : memref<25x1x72xf32, #tpu.memory_space<vmem>>, vector<1x1x72xf32>
    %320 = vector.shape_cast %319 : vector<1x1x72xf32> to vector<1x72xf32>
    %321 = vector.shape_cast %320 : vector<1x72xf32> to vector<1x1x72xf32>
    %322 = vector.broadcast %321 : vector<1x1x72xf32> to vector<8x8x72xf32>
    %323 = arith.mulf %318, %322 : vector<8x8x72xf32>
    %324 = arith.addf %304, %323 : vector<8x8x72xf32>
    %325 = vector.extract_strided_slice %317 {offsets = [0, 0, 0], sizes = [8, 8, 72], strides = [1, 1, 1]} : vector<10x8x72xf32> to vector<8x8x72xf32>
    %c7_342 = arith.constant 7 : index
    %c0_343 = arith.constant 0 : index
    %c0_344 = arith.constant 0 : index
    %326 = vector.load %arg4[%c7_342, %c0_343, %c0_344] : memref<25x1x72xf32, #tpu.memory_space<vmem>>, vector<1x1x72xf32>
    %327 = vector.shape_cast %326 : vector<1x1x72xf32> to vector<1x72xf32>
    %328 = vector.shape_cast %327 : vector<1x72xf32> to vector<1x1x72xf32>
    %329 = vector.broadcast %328 : vector<1x1x72xf32> to vector<8x8x72xf32>
    %330 = arith.mulf %325, %329 : vector<8x8x72xf32>
    %331 = arith.addf %311, %330 : vector<8x8x72xf32>
    %332 = vector.extract_strided_slice %314 {offsets = [1, 0, 0], sizes = [8, 8, 72], strides = [1, 1, 1]} : vector<10x8x72xf32> to vector<8x8x72xf32>
    %c12 = arith.constant 12 : index
    %c0_345 = arith.constant 0 : index
    %c0_346 = arith.constant 0 : index
    %333 = vector.load %arg4[%c12, %c0_345, %c0_346] : memref<25x1x72xf32, #tpu.memory_space<vmem>>, vector<1x1x72xf32>
    %334 = vector.shape_cast %333 : vector<1x1x72xf32> to vector<1x72xf32>
    %335 = vector.shape_cast %334 : vector<1x72xf32> to vector<1x1x72xf32>
    %336 = vector.broadcast %335 : vector<1x1x72xf32> to vector<8x8x72xf32>
    %337 = arith.mulf %332, %336 : vector<8x8x72xf32>
    %338 = arith.addf %324, %337 : vector<8x8x72xf32>
    %339 = vector.extract_strided_slice %317 {offsets = [1, 0, 0], sizes = [8, 8, 72], strides = [1, 1, 1]} : vector<10x8x72xf32> to vector<8x8x72xf32>
    %c17 = arith.constant 17 : index
    %c0_347 = arith.constant 0 : index
    %c0_348 = arith.constant 0 : index
    %340 = vector.load %arg4[%c17, %c0_347, %c0_348] : memref<25x1x72xf32, #tpu.memory_space<vmem>>, vector<1x1x72xf32>
    %341 = vector.shape_cast %340 : vector<1x1x72xf32> to vector<1x72xf32>
    %342 = vector.shape_cast %341 : vector<1x72xf32> to vector<1x1x72xf32>
    %343 = vector.broadcast %342 : vector<1x1x72xf32> to vector<8x8x72xf32>
    %344 = arith.mulf %339, %343 : vector<8x8x72xf32>
    %345 = arith.addf %331, %344 : vector<8x8x72xf32>
    %346 = vector.extract_strided_slice %314 {offsets = [2, 0, 0], sizes = [8, 8, 72], strides = [1, 1, 1]} : vector<10x8x72xf32> to vector<8x8x72xf32>
    %c22 = arith.constant 22 : index
    %c0_349 = arith.constant 0 : index
    %c0_350 = arith.constant 0 : index
    %347 = vector.load %arg4[%c22, %c0_349, %c0_350] : memref<25x1x72xf32, #tpu.memory_space<vmem>>, vector<1x1x72xf32>
    %348 = vector.shape_cast %347 : vector<1x1x72xf32> to vector<1x72xf32>
    %349 = vector.shape_cast %348 : vector<1x72xf32> to vector<1x1x72xf32>
    %350 = vector.broadcast %349 : vector<1x1x72xf32> to vector<8x8x72xf32>
    %351 = arith.mulf %346, %350 : vector<8x8x72xf32>
    %352 = arith.addf %338, %351 : vector<8x8x72xf32>
    %c0_351 = arith.constant 0 : index
    %c1_352 = arith.constant 1 : index
    %c0_353 = arith.constant 0 : index
    %c1_354 = arith.constant 1 : index
    %c0_355 = arith.constant 0 : index
    %353 = vector.load %arg13[%c0_351, %c1_352, %c0_353, %c1_354, %c0_355] : memref<2x2x10x10x72xbf16, #tpu.memory_space<vmem>>, vector<1x1x10x8x72xbf16>
    %354 = vector.shape_cast %353 : vector<1x1x10x8x72xbf16> to vector<10x8x72xbf16>
    %355 = arith.extf %354 : vector<10x8x72xbf16> to vector<10x8x72xf32>
    %c1_356 = arith.constant 1 : index
    %c1_357 = arith.constant 1 : index
    %c0_358 = arith.constant 0 : index
    %c1_359 = arith.constant 1 : index
    %c0_360 = arith.constant 0 : index
    %356 = vector.load %arg13[%c1_356, %c1_357, %c0_358, %c1_359, %c0_360] : memref<2x2x10x10x72xbf16, #tpu.memory_space<vmem>>, vector<1x1x10x8x72xbf16>
    %357 = vector.shape_cast %356 : vector<1x1x10x8x72xbf16> to vector<10x8x72xbf16>
    %358 = arith.extf %357 : vector<10x8x72xbf16> to vector<10x8x72xf32>
    %359 = vector.extract_strided_slice %355 {offsets = [0, 0, 0], sizes = [8, 8, 72], strides = [1, 1, 1]} : vector<10x8x72xf32> to vector<8x8x72xf32>
    %c3_361 = arith.constant 3 : index
    %c0_362 = arith.constant 0 : index
    %c0_363 = arith.constant 0 : index
    %360 = vector.load %arg4[%c3_361, %c0_362, %c0_363] : memref<25x1x72xf32, #tpu.memory_space<vmem>>, vector<1x1x72xf32>
    %361 = vector.shape_cast %360 : vector<1x1x72xf32> to vector<1x72xf32>
    %362 = vector.shape_cast %361 : vector<1x72xf32> to vector<1x1x72xf32>
    %363 = vector.broadcast %362 : vector<1x1x72xf32> to vector<8x8x72xf32>
    %364 = arith.mulf %359, %363 : vector<8x8x72xf32>
    %365 = arith.addf %345, %364 : vector<8x8x72xf32>
    %366 = vector.extract_strided_slice %358 {offsets = [0, 0, 0], sizes = [8, 8, 72], strides = [1, 1, 1]} : vector<10x8x72xf32> to vector<8x8x72xf32>
    %c8_364 = arith.constant 8 : index
    %c0_365 = arith.constant 0 : index
    %c0_366 = arith.constant 0 : index
    %367 = vector.load %arg4[%c8_364, %c0_365, %c0_366] : memref<25x1x72xf32, #tpu.memory_space<vmem>>, vector<1x1x72xf32>
    %368 = vector.shape_cast %367 : vector<1x1x72xf32> to vector<1x72xf32>
    %369 = vector.shape_cast %368 : vector<1x72xf32> to vector<1x1x72xf32>
    %370 = vector.broadcast %369 : vector<1x1x72xf32> to vector<8x8x72xf32>
    %371 = arith.mulf %366, %370 : vector<8x8x72xf32>
    %372 = arith.addf %352, %371 : vector<8x8x72xf32>
    %373 = vector.extract_strided_slice %355 {offsets = [1, 0, 0], sizes = [8, 8, 72], strides = [1, 1, 1]} : vector<10x8x72xf32> to vector<8x8x72xf32>
    %c13 = arith.constant 13 : index
    %c0_367 = arith.constant 0 : index
    %c0_368 = arith.constant 0 : index
    %374 = vector.load %arg4[%c13, %c0_367, %c0_368] : memref<25x1x72xf32, #tpu.memory_space<vmem>>, vector<1x1x72xf32>
    %375 = vector.shape_cast %374 : vector<1x1x72xf32> to vector<1x72xf32>
    %376 = vector.shape_cast %375 : vector<1x72xf32> to vector<1x1x72xf32>
    %377 = vector.broadcast %376 : vector<1x1x72xf32> to vector<8x8x72xf32>
    %378 = arith.mulf %373, %377 : vector<8x8x72xf32>
    %379 = arith.addf %365, %378 : vector<8x8x72xf32>
    %380 = vector.extract_strided_slice %358 {offsets = [1, 0, 0], sizes = [8, 8, 72], strides = [1, 1, 1]} : vector<10x8x72xf32> to vector<8x8x72xf32>
    %c18 = arith.constant 18 : index
    %c0_369 = arith.constant 0 : index
    %c0_370 = arith.constant 0 : index
    %381 = vector.load %arg4[%c18, %c0_369, %c0_370] : memref<25x1x72xf32, #tpu.memory_space<vmem>>, vector<1x1x72xf32>
    %382 = vector.shape_cast %381 : vector<1x1x72xf32> to vector<1x72xf32>
    %383 = vector.shape_cast %382 : vector<1x72xf32> to vector<1x1x72xf32>
    %384 = vector.broadcast %383 : vector<1x1x72xf32> to vector<8x8x72xf32>
    %385 = arith.mulf %380, %384 : vector<8x8x72xf32>
    %386 = arith.addf %372, %385 : vector<8x8x72xf32>
    %387 = vector.extract_strided_slice %355 {offsets = [2, 0, 0], sizes = [8, 8, 72], strides = [1, 1, 1]} : vector<10x8x72xf32> to vector<8x8x72xf32>
    %c23 = arith.constant 23 : index
    %c0_371 = arith.constant 0 : index
    %c0_372 = arith.constant 0 : index
    %388 = vector.load %arg4[%c23, %c0_371, %c0_372] : memref<25x1x72xf32, #tpu.memory_space<vmem>>, vector<1x1x72xf32>
    %389 = vector.shape_cast %388 : vector<1x1x72xf32> to vector<1x72xf32>
    %390 = vector.shape_cast %389 : vector<1x72xf32> to vector<1x1x72xf32>
    %391 = vector.broadcast %390 : vector<1x1x72xf32> to vector<8x8x72xf32>
    %392 = arith.mulf %387, %391 : vector<8x8x72xf32>
    %393 = arith.addf %379, %392 : vector<8x8x72xf32>
    %c0_373 = arith.constant 0 : index
    %c0_374 = arith.constant 0 : index
    %c0_375 = arith.constant 0 : index
    %c2_376 = arith.constant 2 : index
    %c0_377 = arith.constant 0 : index
    %394 = vector.load %arg13[%c0_373, %c0_374, %c0_375, %c2_376, %c0_377] : memref<2x2x10x10x72xbf16, #tpu.memory_space<vmem>>, vector<1x1x10x8x72xbf16>
    %395 = vector.shape_cast %394 : vector<1x1x10x8x72xbf16> to vector<10x8x72xbf16>
    %396 = arith.extf %395 : vector<10x8x72xbf16> to vector<10x8x72xf32>
    %c1_378 = arith.constant 1 : index
    %c0_379 = arith.constant 0 : index
    %c0_380 = arith.constant 0 : index
    %c2_381 = arith.constant 2 : index
    %c0_382 = arith.constant 0 : index
    %397 = vector.load %arg13[%c1_378, %c0_379, %c0_380, %c2_381, %c0_382] : memref<2x2x10x10x72xbf16, #tpu.memory_space<vmem>>, vector<1x1x10x8x72xbf16>
    %398 = vector.shape_cast %397 : vector<1x1x10x8x72xbf16> to vector<10x8x72xbf16>
    %399 = arith.extf %398 : vector<10x8x72xbf16> to vector<10x8x72xf32>
    %400 = vector.extract_strided_slice %396 {offsets = [0, 0, 0], sizes = [8, 8, 72], strides = [1, 1, 1]} : vector<10x8x72xf32> to vector<8x8x72xf32>
    %c4_383 = arith.constant 4 : index
    %c0_384 = arith.constant 0 : index
    %c0_385 = arith.constant 0 : index
    %401 = vector.load %arg4[%c4_383, %c0_384, %c0_385] : memref<25x1x72xf32, #tpu.memory_space<vmem>>, vector<1x1x72xf32>
    %402 = vector.shape_cast %401 : vector<1x1x72xf32> to vector<1x72xf32>
    %403 = vector.shape_cast %402 : vector<1x72xf32> to vector<1x1x72xf32>
    %404 = vector.broadcast %403 : vector<1x1x72xf32> to vector<8x8x72xf32>
    %405 = arith.mulf %400, %404 : vector<8x8x72xf32>
    %406 = arith.addf %386, %405 : vector<8x8x72xf32>
    %407 = vector.extract_strided_slice %399 {offsets = [0, 0, 0], sizes = [8, 8, 72], strides = [1, 1, 1]} : vector<10x8x72xf32> to vector<8x8x72xf32>
    %c9_386 = arith.constant 9 : index
    %c0_387 = arith.constant 0 : index
    %c0_388 = arith.constant 0 : index
    %408 = vector.load %arg4[%c9_386, %c0_387, %c0_388] : memref<25x1x72xf32, #tpu.memory_space<vmem>>, vector<1x1x72xf32>
    %409 = vector.shape_cast %408 : vector<1x1x72xf32> to vector<1x72xf32>
    %410 = vector.shape_cast %409 : vector<1x72xf32> to vector<1x1x72xf32>
    %411 = vector.broadcast %410 : vector<1x1x72xf32> to vector<8x8x72xf32>
    %412 = arith.mulf %407, %411 : vector<8x8x72xf32>
    %413 = arith.addf %393, %412 : vector<8x8x72xf32>
    %414 = vector.extract_strided_slice %396 {offsets = [1, 0, 0], sizes = [8, 8, 72], strides = [1, 1, 1]} : vector<10x8x72xf32> to vector<8x8x72xf32>
    %c14 = arith.constant 14 : index
    %c0_389 = arith.constant 0 : index
    %c0_390 = arith.constant 0 : index
    %415 = vector.load %arg4[%c14, %c0_389, %c0_390] : memref<25x1x72xf32, #tpu.memory_space<vmem>>, vector<1x1x72xf32>
    %416 = vector.shape_cast %415 : vector<1x1x72xf32> to vector<1x72xf32>
    %417 = vector.shape_cast %416 : vector<1x72xf32> to vector<1x1x72xf32>
    %418 = vector.broadcast %417 : vector<1x1x72xf32> to vector<8x8x72xf32>
    %419 = arith.mulf %414, %418 : vector<8x8x72xf32>
    %420 = arith.addf %406, %419 : vector<8x8x72xf32>
    %421 = vector.extract_strided_slice %399 {offsets = [1, 0, 0], sizes = [8, 8, 72], strides = [1, 1, 1]} : vector<10x8x72xf32> to vector<8x8x72xf32>
    %c19 = arith.constant 19 : index
    %c0_391 = arith.constant 0 : index
    %c0_392 = arith.constant 0 : index
    %422 = vector.load %arg4[%c19, %c0_391, %c0_392] : memref<25x1x72xf32, #tpu.memory_space<vmem>>, vector<1x1x72xf32>
    %423 = vector.shape_cast %422 : vector<1x1x72xf32> to vector<1x72xf32>
    %424 = vector.shape_cast %423 : vector<1x72xf32> to vector<1x1x72xf32>
    %425 = vector.broadcast %424 : vector<1x1x72xf32> to vector<8x8x72xf32>
    %426 = arith.mulf %421, %425 : vector<8x8x72xf32>
    %427 = arith.addf %413, %426 : vector<8x8x72xf32>
    %428 = vector.extract_strided_slice %396 {offsets = [2, 0, 0], sizes = [8, 8, 72], strides = [1, 1, 1]} : vector<10x8x72xf32> to vector<8x8x72xf32>
    %c24 = arith.constant 24 : index
    %c0_393 = arith.constant 0 : index
    %c0_394 = arith.constant 0 : index
    %429 = vector.load %arg4[%c24, %c0_393, %c0_394] : memref<25x1x72xf32, #tpu.memory_space<vmem>>, vector<1x1x72xf32>
    %430 = vector.shape_cast %429 : vector<1x1x72xf32> to vector<1x72xf32>
    %431 = vector.shape_cast %430 : vector<1x72xf32> to vector<1x1x72xf32>
    %432 = vector.broadcast %431 : vector<1x1x72xf32> to vector<8x8x72xf32>
    %433 = arith.mulf %428, %432 : vector<8x8x72xf32>
    %434 = arith.addf %420, %433 : vector<8x8x72xf32>
    %435 = arith.addf %434, %427 : vector<8x8x72xf32>
    %c0_395 = arith.constant 0 : index
    %c0_396 = arith.constant 0 : index
    %436 = vector.load %arg5[%c0_395, %c0_396] : memref<1x72xf32, #tpu.memory_space<vmem>>, vector<1x72xf32>
    %437 = vector.shape_cast %436 : vector<1x72xf32> to vector<1x1x72xf32>
    %438 = vector.broadcast %437 : vector<1x1x72xf32> to vector<8x8x72xf32>
    %439 = arith.addf %435, %438 : vector<8x8x72xf32>
    %cst_397 = arith.constant 0.000000e+00 : f32
    %440 = vector.broadcast %cst_397 : f32 to vector<8x8x72xf32>
    %441 = arith.maximumf %439, %440 : vector<8x8x72xf32>
    %cst_398 = arith.constant dense<0.000000e+00> : vector<8x72xf32>
    %442 = vector.multi_reduction <add>, %441, %cst_398 [0] : vector<8x8x72xf32> to vector<8x72xf32>
    %cst_399 = arith.constant 8.000000e+00 : f32
    %443 = vector.broadcast %cst_399 : f32 to vector<8x72xf32>
    %444 = arith.divf %442, %443 : vector<8x72xf32>
    %cst_400 = arith.constant dense<0.000000e+00> : vector<72xf32>
    %445 = vector.multi_reduction <add>, %444, %cst_400 [0] : vector<8x72xf32> to vector<72xf32>
    %446 = vector.shape_cast %445 : vector<72xf32> to vector<1x72xf32>
    %cst_401 = arith.constant 8.000000e+00 : f32
    %447 = vector.broadcast %cst_401 : f32 to vector<1x72xf32>
    %448 = arith.divf %446, %447 : vector<1x72xf32>
    %449 = arith.truncf %448 : vector<1x72xf32> to vector<1x72xbf16>
    %c0_402 = arith.constant 0 : index
    %c0_403 = arith.constant 0 : index
    %450 = vector.load %arg6[%c0_402, %c0_403] : memref<72x24xbf16, #tpu.memory_space<vmem>>, vector<72x24xbf16>
    %cst_404 = arith.constant dense<0.000000e+00> : vector<1x24xf32>
    %451 = tpu.matmul %449, %450, %cst_404 {dimension_numbers = #tpu.dot_dimension_numbers<[1], [0], [0], [1], [0, 0, 1, 1], [], []>} : vector<1x72xbf16>, vector<72x24xbf16>, vector<1x24xf32> -> vector<1x24xf32>
    %c0_405 = arith.constant 0 : index
    %c0_406 = arith.constant 0 : index
    %452 = vector.load %arg7[%c0_405, %c0_406] : memref<1x24xf32, #tpu.memory_space<vmem>>, vector<1x24xf32>
    %453 = arith.addf %451, %452 : vector<1x24xf32>
    %cst_407 = arith.constant 0.000000e+00 : f32
    %454 = vector.broadcast %cst_407 : f32 to vector<1x24xf32>
    %455 = arith.maximumf %453, %454 : vector<1x24xf32>
    %456 = arith.truncf %455 : vector<1x24xf32> to vector<1x24xbf16>
    %c0_408 = arith.constant 0 : index
    %c0_409 = arith.constant 0 : index
    %457 = vector.load %arg8[%c0_408, %c0_409] : memref<24x72xbf16, #tpu.memory_space<vmem>>, vector<24x72xbf16>
    %cst_410 = arith.constant dense<0.000000e+00> : vector<1x72xf32>
    %458 = tpu.matmul %456, %457, %cst_410 {dimension_numbers = #tpu.dot_dimension_numbers<[1], [0], [0], [1], [0, 0, 1, 1], [], []>} : vector<1x24xbf16>, vector<24x72xbf16>, vector<1x72xf32> -> vector<1x72xf32>
    %c0_411 = arith.constant 0 : index
    %c0_412 = arith.constant 0 : index
    %459 = vector.load %arg9[%c0_411, %c0_412] : memref<1x72xf32, #tpu.memory_space<vmem>>, vector<1x72xf32>
    %460 = arith.addf %458, %459 : vector<1x72xf32>
    %cst_413 = arith.constant 3.000000e+00 : f32
    %461 = vector.broadcast %cst_413 : f32 to vector<1x72xf32>
    %462 = arith.addf %460, %461 : vector<1x72xf32>
    %cst_414 = arith.constant 0.000000e+00 : f32
    %cst_415 = arith.constant 6.000000e+00 : f32
    %463 = vector.broadcast %cst_414 : f32 to vector<1x72xf32>
    %464 = arith.maximumf %463, %462 : vector<1x72xf32>
    %465 = vector.broadcast %cst_415 : f32 to vector<1x72xf32>
    %466 = arith.minimumf %465, %464 : vector<1x72xf32>
    %cst_416 = arith.constant 0.166666672 : f32
    %467 = vector.broadcast %cst_416 : f32 to vector<1x72xf32>
    %468 = arith.mulf %466, %467 : vector<1x72xf32>
    %469 = vector.shape_cast %468 : vector<1x72xf32> to vector<1x1x72xf32>
    %470 = vector.broadcast %469 : vector<1x1x72xf32> to vector<8x8x72xf32>
    %471 = arith.mulf %441, %470 : vector<8x8x72xf32>
    %472 = arith.truncf %471 : vector<8x8x72xf32> to vector<8x8x72xbf16>
    %473 = vector.extract_strided_slice %472 {offsets = [0, 0, 0], sizes = [1, 8, 72], strides = [1, 1, 1]} : vector<8x8x72xbf16> to vector<1x8x72xbf16>
    %474 = vector.shape_cast %473 : vector<1x8x72xbf16> to vector<8x72xbf16>
    %c0_417 = arith.constant 0 : index
    %c0_418 = arith.constant 0 : index
    %475 = vector.load %arg10[%c0_417, %c0_418] : memref<72x40xbf16, #tpu.memory_space<vmem>>, vector<72x40xbf16>
    %cst_419 = arith.constant dense<0.000000e+00> : vector<8x40xf32>
    %476 = tpu.matmul %474, %475, %cst_419 {dimension_numbers = #tpu.dot_dimension_numbers<[1], [0], [0], [1], [0, 0, 1, 1], [], []>} : vector<8x72xbf16>, vector<72x40xbf16>, vector<8x40xf32> -> vector<8x40xf32>
    %c0_420 = arith.constant 0 : index
    %c0_421 = arith.constant 0 : index
    %477 = vector.load %arg11[%c0_420, %c0_421] : memref<1x40xf32, #tpu.memory_space<vmem>>, vector<1x40xf32>
    %478 = vector.broadcast %477 : vector<1x40xf32> to vector<8x40xf32>
    %479 = arith.addf %476, %478 : vector<8x40xf32>
    %480 = arith.truncf %479 : vector<8x40xf32> to vector<8x40xbf16>
    %c0_422 = arith.constant 0 : index
    %c0_423 = arith.constant 0 : index
    %c0_424 = arith.constant 0 : index
    %c0_425 = arith.constant 0 : index
    %481 = vector.load %arg12[%c0_422, %c0_423, %c0_424, %c0_425] : memref<1x8x8x40xbf16, #tpu.memory_space<vmem>>, vector<1x1x8x40xbf16>
    %482 = vector.shape_cast %481 : vector<1x1x8x40xbf16> to vector<8x40xbf16>
    %483 = vector.shape_cast %480 : vector<8x40xbf16> to vector<1x1x8x40xbf16>
    tpu.vector_store %arg12[%c0_422, %c0_423, %c0_424, %c0_425], %483 {strides = array<i32>} : memref<1x8x8x40xbf16, #tpu.memory_space<vmem>>, vector<1x1x8x40xbf16>,
    %484 = vector.extract_strided_slice %472 {offsets = [1, 0, 0], sizes = [1, 8, 72], strides = [1, 1, 1]} : vector<8x8x72xbf16> to vector<1x8x72xbf16>
    %485 = vector.shape_cast %484 : vector<1x8x72xbf16> to vector<8x72xbf16>
    %c0_426 = arith.constant 0 : index
    %c0_427 = arith.constant 0 : index
    %486 = vector.load %arg10[%c0_426, %c0_427] : memref<72x40xbf16, #tpu.memory_space<vmem>>, vector<72x40xbf16>
    %cst_428 = arith.constant dense<0.000000e+00> : vector<8x40xf32>
    %487 = tpu.matmul %485, %486, %cst_428 {dimension_numbers = #tpu.dot_dimension_numbers<[1], [0], [0], [1], [0, 0, 1, 1], [], []>} : vector<8x72xbf16>, vector<72x40xbf16>, vector<8x40xf32> -> vector<8x40xf32>
    %c0_429 = arith.constant 0 : index
    %c0_430 = arith.constant 0 : index
    %488 = vector.load %arg11[%c0_429, %c0_430] : memref<1x40xf32, #tpu.memory_space<vmem>>, vector<1x40xf32>
    %489 = vector.broadcast %488 : vector<1x40xf32> to vector<8x40xf32>
    %490 = arith.addf %487, %489 : vector<8x40xf32>
    %491 = arith.truncf %490 : vector<8x40xf32> to vector<8x40xbf16>
    %c0_431 = arith.constant 0 : index
    %c1_432 = arith.constant 1 : index
    %c0_433 = arith.constant 0 : index
    %c0_434 = arith.constant 0 : index
    %492 = vector.load %arg12[%c0_431, %c1_432, %c0_433, %c0_434] : memref<1x8x8x40xbf16, #tpu.memory_space<vmem>>, vector<1x1x8x40xbf16>
    %493 = vector.shape_cast %492 : vector<1x1x8x40xbf16> to vector<8x40xbf16>
    %494 = vector.shape_cast %491 : vector<8x40xbf16> to vector<1x1x8x40xbf16>
    tpu.vector_store %arg12[%c0_431, %c1_432, %c0_433, %c0_434], %494 {strides = array<i32>} : memref<1x8x8x40xbf16, #tpu.memory_space<vmem>>, vector<1x1x8x40xbf16>,
    %495 = vector.extract_strided_slice %472 {offsets = [2, 0, 0], sizes = [1, 8, 72], strides = [1, 1, 1]} : vector<8x8x72xbf16> to vector<1x8x72xbf16>
    %496 = vector.shape_cast %495 : vector<1x8x72xbf16> to vector<8x72xbf16>
    %c0_435 = arith.constant 0 : index
    %c0_436 = arith.constant 0 : index
    %497 = vector.load %arg10[%c0_435, %c0_436] : memref<72x40xbf16, #tpu.memory_space<vmem>>, vector<72x40xbf16>
    %cst_437 = arith.constant dense<0.000000e+00> : vector<8x40xf32>
    %498 = tpu.matmul %496, %497, %cst_437 {dimension_numbers = #tpu.dot_dimension_numbers<[1], [0], [0], [1], [0, 0, 1, 1], [], []>} : vector<8x72xbf16>, vector<72x40xbf16>, vector<8x40xf32> -> vector<8x40xf32>
    %c0_438 = arith.constant 0 : index
    %c0_439 = arith.constant 0 : index
    %499 = vector.load %arg11[%c0_438, %c0_439] : memref<1x40xf32, #tpu.memory_space<vmem>>, vector<1x40xf32>
    %500 = vector.broadcast %499 : vector<1x40xf32> to vector<8x40xf32>
    %501 = arith.addf %498, %500 : vector<8x40xf32>
    %502 = arith.truncf %501 : vector<8x40xf32> to vector<8x40xbf16>
    %c0_440 = arith.constant 0 : index
    %c2_441 = arith.constant 2 : index
    %c0_442 = arith.constant 0 : index
    %c0_443 = arith.constant 0 : index
    %503 = vector.load %arg12[%c0_440, %c2_441, %c0_442, %c0_443] : memref<1x8x8x40xbf16, #tpu.memory_space<vmem>>, vector<1x1x8x40xbf16>
    %504 = vector.shape_cast %503 : vector<1x1x8x40xbf16> to vector<8x40xbf16>
    %505 = vector.shape_cast %502 : vector<8x40xbf16> to vector<1x1x8x40xbf16>
    tpu.vector_store %arg12[%c0_440, %c2_441, %c0_442, %c0_443], %505 {strides = array<i32>} : memref<1x8x8x40xbf16, #tpu.memory_space<vmem>>, vector<1x1x8x40xbf16>,
    %506 = vector.extract_strided_slice %472 {offsets = [3, 0, 0], sizes = [1, 8, 72], strides = [1, 1, 1]} : vector<8x8x72xbf16> to vector<1x8x72xbf16>
    %507 = vector.shape_cast %506 : vector<1x8x72xbf16> to vector<8x72xbf16>
    %c0_444 = arith.constant 0 : index
    %c0_445 = arith.constant 0 : index
    %508 = vector.load %arg10[%c0_444, %c0_445] : memref<72x40xbf16, #tpu.memory_space<vmem>>, vector<72x40xbf16>
    %cst_446 = arith.constant dense<0.000000e+00> : vector<8x40xf32>
    %509 = tpu.matmul %507, %508, %cst_446 {dimension_numbers = #tpu.dot_dimension_numbers<[1], [0], [0], [1], [0, 0, 1, 1], [], []>} : vector<8x72xbf16>, vector<72x40xbf16>, vector<8x40xf32> -> vector<8x40xf32>
    %c0_447 = arith.constant 0 : index
    %c0_448 = arith.constant 0 : index
    %510 = vector.load %arg11[%c0_447, %c0_448] : memref<1x40xf32, #tpu.memory_space<vmem>>, vector<1x40xf32>
    %511 = vector.broadcast %510 : vector<1x40xf32> to vector<8x40xf32>
    %512 = arith.addf %509, %511 : vector<8x40xf32>
    %513 = arith.truncf %512 : vector<8x40xf32> to vector<8x40xbf16>
    %c0_449 = arith.constant 0 : index
    %c3_450 = arith.constant 3 : index
    %c0_451 = arith.constant 0 : index
    %c0_452 = arith.constant 0 : index
    %514 = vector.load %arg12[%c0_449, %c3_450, %c0_451, %c0_452] : memref<1x8x8x40xbf16, #tpu.memory_space<vmem>>, vector<1x1x8x40xbf16>
    %515 = vector.shape_cast %514 : vector<1x1x8x40xbf16> to vector<8x40xbf16>
    %516 = vector.shape_cast %513 : vector<8x40xbf16> to vector<1x1x8x40xbf16>
    tpu.vector_store %arg12[%c0_449, %c3_450, %c0_451, %c0_452], %516 {strides = array<i32>} : memref<1x8x8x40xbf16, #tpu.memory_space<vmem>>, vector<1x1x8x40xbf16>,
    %517 = vector.extract_strided_slice %472 {offsets = [4, 0, 0], sizes = [1, 8, 72], strides = [1, 1, 1]} : vector<8x8x72xbf16> to vector<1x8x72xbf16>
    %518 = vector.shape_cast %517 : vector<1x8x72xbf16> to vector<8x72xbf16>
    %c0_453 = arith.constant 0 : index
    %c0_454 = arith.constant 0 : index
    %519 = vector.load %arg10[%c0_453, %c0_454] : memref<72x40xbf16, #tpu.memory_space<vmem>>, vector<72x40xbf16>
    %cst_455 = arith.constant dense<0.000000e+00> : vector<8x40xf32>
    %520 = tpu.matmul %518, %519, %cst_455 {dimension_numbers = #tpu.dot_dimension_numbers<[1], [0], [0], [1], [0, 0, 1, 1], [], []>} : vector<8x72xbf16>, vector<72x40xbf16>, vector<8x40xf32> -> vector<8x40xf32>
    %c0_456 = arith.constant 0 : index
    %c0_457 = arith.constant 0 : index
    %521 = vector.load %arg11[%c0_456, %c0_457] : memref<1x40xf32, #tpu.memory_space<vmem>>, vector<1x40xf32>
    %522 = vector.broadcast %521 : vector<1x40xf32> to vector<8x40xf32>
    %523 = arith.addf %520, %522 : vector<8x40xf32>
    %524 = arith.truncf %523 : vector<8x40xf32> to vector<8x40xbf16>
    %c0_458 = arith.constant 0 : index
    %c4_459 = arith.constant 4 : index
    %c0_460 = arith.constant 0 : index
    %c0_461 = arith.constant 0 : index
    %525 = vector.load %arg12[%c0_458, %c4_459, %c0_460, %c0_461] : memref<1x8x8x40xbf16, #tpu.memory_space<vmem>>, vector<1x1x8x40xbf16>
    %526 = vector.shape_cast %525 : vector<1x1x8x40xbf16> to vector<8x40xbf16>
    %527 = vector.shape_cast %524 : vector<8x40xbf16> to vector<1x1x8x40xbf16>
    tpu.vector_store %arg12[%c0_458, %c4_459, %c0_460, %c0_461], %527 {strides = array<i32>} : memref<1x8x8x40xbf16, #tpu.memory_space<vmem>>, vector<1x1x8x40xbf16>,
    %528 = vector.extract_strided_slice %472 {offsets = [5, 0, 0], sizes = [1, 8, 72], strides = [1, 1, 1]} : vector<8x8x72xbf16> to vector<1x8x72xbf16>
    %529 = vector.shape_cast %528 : vector<1x8x72xbf16> to vector<8x72xbf16>
    %c0_462 = arith.constant 0 : index
    %c0_463 = arith.constant 0 : index
    %530 = vector.load %arg10[%c0_462, %c0_463] : memref<72x40xbf16, #tpu.memory_space<vmem>>, vector<72x40xbf16>
    %cst_464 = arith.constant dense<0.000000e+00> : vector<8x40xf32>
    %531 = tpu.matmul %529, %530, %cst_464 {dimension_numbers = #tpu.dot_dimension_numbers<[1], [0], [0], [1], [0, 0, 1, 1], [], []>} : vector<8x72xbf16>, vector<72x40xbf16>, vector<8x40xf32> -> vector<8x40xf32>
    %c0_465 = arith.constant 0 : index
    %c0_466 = arith.constant 0 : index
    %532 = vector.load %arg11[%c0_465, %c0_466] : memref<1x40xf32, #tpu.memory_space<vmem>>, vector<1x40xf32>
    %533 = vector.broadcast %532 : vector<1x40xf32> to vector<8x40xf32>
    %534 = arith.addf %531, %533 : vector<8x40xf32>
    %535 = arith.truncf %534 : vector<8x40xf32> to vector<8x40xbf16>
    %c0_467 = arith.constant 0 : index
    %c5_468 = arith.constant 5 : index
    %c0_469 = arith.constant 0 : index
    %c0_470 = arith.constant 0 : index
    %536 = vector.load %arg12[%c0_467, %c5_468, %c0_469, %c0_470] : memref<1x8x8x40xbf16, #tpu.memory_space<vmem>>, vector<1x1x8x40xbf16>
    %537 = vector.shape_cast %536 : vector<1x1x8x40xbf16> to vector<8x40xbf16>
    %538 = vector.shape_cast %535 : vector<8x40xbf16> to vector<1x1x8x40xbf16>
    tpu.vector_store %arg12[%c0_467, %c5_468, %c0_469, %c0_470], %538 {strides = array<i32>} : memref<1x8x8x40xbf16, #tpu.memory_space<vmem>>, vector<1x1x8x40xbf16>,
    %539 = vector.extract_strided_slice %472 {offsets = [6, 0, 0], sizes = [1, 8, 72], strides = [1, 1, 1]} : vector<8x8x72xbf16> to vector<1x8x72xbf16>
    %540 = vector.shape_cast %539 : vector<1x8x72xbf16> to vector<8x72xbf16>
    %c0_471 = arith.constant 0 : index
    %c0_472 = arith.constant 0 : index
    %541 = vector.load %arg10[%c0_471, %c0_472] : memref<72x40xbf16, #tpu.memory_space<vmem>>, vector<72x40xbf16>
    %cst_473 = arith.constant dense<0.000000e+00> : vector<8x40xf32>
    %542 = tpu.matmul %540, %541, %cst_473 {dimension_numbers = #tpu.dot_dimension_numbers<[1], [0], [0], [1], [0, 0, 1, 1], [], []>} : vector<8x72xbf16>, vector<72x40xbf16>, vector<8x40xf32> -> vector<8x40xf32>
    %c0_474 = arith.constant 0 : index
    %c0_475 = arith.constant 0 : index
    %543 = vector.load %arg11[%c0_474, %c0_475] : memref<1x40xf32, #tpu.memory_space<vmem>>, vector<1x40xf32>
    %544 = vector.broadcast %543 : vector<1x40xf32> to vector<8x40xf32>
    %545 = arith.addf %542, %544 : vector<8x40xf32>
    %546 = arith.truncf %545 : vector<8x40xf32> to vector<8x40xbf16>
    %c0_476 = arith.constant 0 : index
    %c6_477 = arith.constant 6 : index
    %c0_478 = arith.constant 0 : index
    %c0_479 = arith.constant 0 : index
    %547 = vector.load %arg12[%c0_476, %c6_477, %c0_478, %c0_479] : memref<1x8x8x40xbf16, #tpu.memory_space<vmem>>, vector<1x1x8x40xbf16>
    %548 = vector.shape_cast %547 : vector<1x1x8x40xbf16> to vector<8x40xbf16>
    %549 = vector.shape_cast %546 : vector<8x40xbf16> to vector<1x1x8x40xbf16>
    tpu.vector_store %arg12[%c0_476, %c6_477, %c0_478, %c0_479], %549 {strides = array<i32>} : memref<1x8x8x40xbf16, #tpu.memory_space<vmem>>, vector<1x1x8x40xbf16>,
    %550 = vector.extract_strided_slice %472 {offsets = [7, 0, 0], sizes = [1, 8, 72], strides = [1, 1, 1]} : vector<8x8x72xbf16> to vector<1x8x72xbf16>
    %551 = vector.shape_cast %550 : vector<1x8x72xbf16> to vector<8x72xbf16>
    %c0_480 = arith.constant 0 : index
    %c0_481 = arith.constant 0 : index
    %552 = vector.load %arg10[%c0_480, %c0_481] : memref<72x40xbf16, #tpu.memory_space<vmem>>, vector<72x40xbf16>
    %cst_482 = arith.constant dense<0.000000e+00> : vector<8x40xf32>
    %553 = tpu.matmul %551, %552, %cst_482 {dimension_numbers = #tpu.dot_dimension_numbers<[1], [0], [0], [1], [0, 0, 1, 1], [], []>} : vector<8x72xbf16>, vector<72x40xbf16>, vector<8x40xf32> -> vector<8x40xf32>
    %c0_483 = arith.constant 0 : index
    %c0_484 = arith.constant 0 : index
    %554 = vector.load %arg11[%c0_483, %c0_484] : memref<1x40xf32, #tpu.memory_space<vmem>>, vector<1x40xf32>
    %555 = vector.broadcast %554 : vector<1x40xf32> to vector<8x40xf32>
    %556 = arith.addf %553, %555 : vector<8x40xf32>
    %557 = arith.truncf %556 : vector<8x40xf32> to vector<8x40xbf16>
    %c0_485 = arith.constant 0 : index
    %c7_486 = arith.constant 7 : index
    %c0_487 = arith.constant 0 : index
    %c0_488 = arith.constant 0 : index
    %558 = vector.load %arg12[%c0_485, %c7_486, %c0_487, %c0_488] : memref<1x8x8x40xbf16, #tpu.memory_space<vmem>>, vector<1x1x8x40xbf16>
    %559 = vector.shape_cast %558 : vector<1x1x8x40xbf16> to vector<8x40xbf16>
    %560 = vector.shape_cast %557 : vector<8x40xbf16> to vector<1x1x8x40xbf16>
    tpu.vector_store %arg12[%c0_485, %c7_486, %c0_487, %c0_488], %560 {strides = array<i32>} : memref<1x8x8x40xbf16, #tpu.memory_space<vmem>>, vector<1x1x8x40xbf16>,
    return
  }
  func.func @transform_0(%arg0: i32) -> (i32, i32, i32, i32) {
    %c0_i32 = arith.constant 0 : i32
    %c0_i32_0 = arith.constant 0 : i32
    %c0_i32_1 = arith.constant 0 : i32
    %c0_i32_2 = arith.constant 0 : i32
    return %arg0, %c0_i32, %c0_i32_0, %c0_i32_1 : i32, i32, i32, i32
  }
  func.func @transform_1(%arg0: i32) -> (i32, i32) {
    %c0_i32 = arith.constant 0 : i32
    %c0_i32_0 = arith.constant 0 : i32
    %c0_i32_1 = arith.constant 0 : i32
    return %c0_i32, %c0_i32_0 : i32, i32
  }
  func.func @transform_2(%arg0: i32) -> (i32, i32) {
    %c0_i32 = arith.constant 0 : i32
    %c0_i32_0 = arith.constant 0 : i32
    %c0_i32_1 = arith.constant 0 : i32
    return %c0_i32, %c0_i32_0 : i32, i32
  }
  func.func @transform_3(%arg0: i32) -> (i32, i32, i32) {
    %c0_i32 = arith.constant 0 : i32
    %c0_i32_0 = arith.constant 0 : i32
    %c0_i32_1 = arith.constant 0 : i32
    %c0_i32_2 = arith.constant 0 : i32
    return %c0_i32, %c0_i32_0, %c0_i32_1 : i32, i32, i32
  }
  func.func @transform_4(%arg0: i32) -> (i32, i32) {
    %c0_i32 = arith.constant 0 : i32
    %c0_i32_0 = arith.constant 0 : i32
    %c0_i32_1 = arith.constant 0 : i32
    return %c0_i32, %c0_i32_0 : i32, i32
  }
  func.func @transform_5(%arg0: i32) -> (i32, i32) {
    %c0_i32 = arith.constant 0 : i32
    %c0_i32_0 = arith.constant 0 : i32
    %c0_i32_1 = arith.constant 0 : i32
    return %c0_i32, %c0_i32_0 : i32, i32
  }
  func.func @transform_6(%arg0: i32) -> (i32, i32) {
    %c0_i32 = arith.constant 0 : i32
    %c0_i32_0 = arith.constant 0 : i32
    %c0_i32_1 = arith.constant 0 : i32
    return %c0_i32, %c0_i32_0 : i32, i32
  }
  func.func @transform_7(%arg0: i32) -> (i32, i32) {
    %c0_i32 = arith.constant 0 : i32
    %c0_i32_0 = arith.constant 0 : i32
    %c0_i32_1 = arith.constant 0 : i32
    return %c0_i32, %c0_i32_0 : i32, i32
  }
  func.func @transform_8(%arg0: i32) -> (i32, i32) {
    %c0_i32 = arith.constant 0 : i32
    %c0_i32_0 = arith.constant 0 : i32
    %c0_i32_1 = arith.constant 0 : i32
    return %c0_i32, %c0_i32_0 : i32, i32
  }
  func.func @transform_9(%arg0: i32) -> (i32, i32) {
    %c0_i32 = arith.constant 0 : i32
    %c0_i32_0 = arith.constant 0 : i32
    %c0_i32_1 = arith.constant 0 : i32
    return %c0_i32, %c0_i32_0 : i32, i32
  }
  func.func @transform_10(%arg0: i32) -> (i32, i32) {
    %c0_i32 = arith.constant 0 : i32
    %c0_i32_0 = arith.constant 0 : i32
    %c0_i32_1 = arith.constant 0 : i32
    return %c0_i32, %c0_i32_0 : i32, i32
  }
  func.func @transform_11(%arg0: i32) -> (i32, i32, i32, i32) {
    %c0_i32 = arith.constant 0 : i32
    %c0_i32_0 = arith.constant 0 : i32
    %c0_i32_1 = arith.constant 0 : i32
    %c0_i32_2 = arith.constant 0 : i32
    return %arg0, %c0_i32, %c0_i32_0, %c0_i32_1 : i32, i32, i32, i32
  }
}

</mosaic_0001>

<bundles_post_ra>
// kernel: tpu_custom_call.1
= control target key start
LH: loop header
LB: loop body
LE: loop exit
PB: predicated region body
PF: predicated region fallthrough
CT: control target
= control target key end

     0   :  { %s6609_s0 = inlined_call_operand.vmem [shape: bf16[2,4,64,24], index: 0, kind: input, shape index: {}]   ;;  %s6610_s1 = inlined_call_operand.vmem [shape: bf16[24,72], index: 1, kind: input, shape index: {}]   ;;  %s6611_s2 = inlined_call_operand.vmem [shape: f32[1,72], index: 2, kind: input, shape index: {}]   ;;  %s6612_s3 = inlined_call_operand.vmem [shape: f32[25,1,72], index: 3, kind: input, shape index: {}]   ;;  %s6613_s4 = inlined_call_operand.vmem [shape: f32[1,72], index: 4, kind: input, shape index: {}]   ;;  %s6614_s5 = inlined_call_operand.vmem [shape: bf16[72,24], index: 5, kind: input, shape index: {}]   ;;  %s6615_s6 = inlined_call_operand.vmem [shape: f32[1,24], index: 6, kind: input, shape index: {}]   ;;  %s6616_s7 = inlined_call_operand.vmem [shape: bf16[24,72], index: 7, kind: input, shape index: {}]   ;;  %s6617_s8 = inlined_call_operand.vmem [shape: f32[1,72], index: 8, kind: input, shape index: {}]   ;;  %s6618_s9 = inlined_call_operand.vmem [shape: bf16[72,40], index: 9, kind: input, shape index: {}]   ;;  %s6619_s10 = inlined_call_operand.vmem [shape: f32[1,40], index: 10, kind: input, shape index: {}]   ;;  %s6620_s11 = inlined_call_operand.hbm [shape: bf16[2,8,8,40], index: 11, kind: output, shape index: {}]  }
   0x1   :  { %6754 = sst [smem:[#allocation60_spill]] %s6609_s0 }
   0x2   :  { %16 = vsyncpa [#allocation4], 0 }
   0x3   :  { %18 = vsyncpa [#allocation4 + $0x1], 0  ;;  %s4503_s17 = smov 0   ;;  %s4505_s18 = smov 0  }
   0x4   :  { %s4507_s19 = smov 0   ;;  %s4509_s20 = smov 0  }
   0x5 LB: > { %s4524_s21 = sadd.s32 4294967295, %s4437_s20   ;;  %s3909_s22 = sadd.s32 4294967294, %s4437_s20   ;;  %s4437_s20 = sphi %s4509_s20, %s7033_s20   ;;  %s4433_s19 = sphi %s4507_s19, %s7032_s19   ;;  %s4429_s18 = sphi %s4505_s18, %s7031_s18   ;;  %s4425_s17 = sphi %s4503_s17, %s7030_s17  }
   0x6   : > { %s4528_s23 = sadd.s32 1, %s4437_s20   ;;  %s267_s24 = sadd.s32 1, %s4433_s19 }
   0x7   : > { %s264_s25 = ssub.s32 %s4437_s20, %s4528_s23  ;;  %p277_p0 = scmp.ne.s32.totalorder %s4433_s19, %s4429_s18 }
   0x8   : > { %p265_p1 = scmp.eq.s32.totalorder %s264_s25, 0  ;;  %p278_p2 = scmp.eq.s32.totalorder %s4524_s21, 1 }
   0x9   : > { %p283_p3 = scmp.ne.s32.totalorder %s4429_s18, %s4425_s17  ;;  %p284_p4 = scmp.eq.s32.totalorder %s3909_s22, 1 }
   0xa   : > { %s4539_s26 = scalar_select %p265_p1, %s4433_s19, %s267_s24  }
   0xb   : > { %p4541_p5 = por %p278_p2, %p277_p0  ;;  %p4545_p6 = por %p284_p4, %p283_p3 }
   0xc   : > { %p3912_p7 = scmp.ge.s32.totalorder %s4437_s20, 1  ;;  %p340_p8 = scmp.lt.s32.totalorder %s4437_s20, 3 }
   0xe   : > { %p341_p9 = pnand %p3912_p7, %p340_p8 }
  0x10   : > { %344 = sbr.rel (%p341_p9) target bundleno = 1028 (0x404), region = 64 }
  0x15   : > { %v468_v0 = vld [vmem:[%s6610_s1 + $0x8] sm:$0xf]  ;;  %p380_p10 = scmp.lt.s32.totalorder %s4524_s21, 1  ;;  %vm515_vm0 = vcmask 1043456   ;;  %v4235_v12 = vld [vmem:[%s6610_s1] sm:$0xff]  ;;  %s6757_s0 = sld [smem:[#allocation60_spill]] }
  0x16   : > { %v779_v1 = vld [vmem:[%s6610_s1 + $0x8] sm:$0xf]  ;;  %v498_v2 = vunpack.c.l.b16 %v468_v0  ;;  %v4240_v15 = vld [vmem:[%s6610_s1] sm:$0xff]  ;;  %vm502_vm1 = vcmask 195584   ;;  %vm388_vm2 = vcmask 581632   ;;  %vm386_vm7 = vcmask 584704  }
  0x17   : > { %v809_v3 = vunpack.c.l.b16 %v779_v1  ;;  %v1086_v4 = vld [vmem:[%s6610_s1 + $0x8] sm:$0xf]  ;;  %s381_s24 = scalar_select %p380_p10, %s4524_s21, 1  ;;  %v4245_v18 = vld [vmem:[%s6610_s1] sm:$0xff]  ;;  %vm394_vm3 = vsmask.f32 256 }
  0x18   : > { %v1393_v5 = vld [vmem:[%s6610_s1 + $0x8] sm:$0xf]  ;;  %v1116_v6 = vunpack.c.l.b16 %v1086_v4  ;;  %v500_v8 = vpack.c.b16 %v498_v2, %v498_v2  ;;  %v4250_v19 = vld [vmem:[%s6610_s1] sm:$0xff]  ;;  %vm4603_vm4 = vmand %vm388_vm2, %vm394_vm3  ;;  %vm426_vm5 = vsmask.f32 7938  ;;  %vm1967_vm9 = vcmask 1046528  }
  0x19   : > { %v1423_v7 = vunpack.c.l.b16 %v1393_v5  ;;  %v811_v9 = vpack.c.b16 %v809_v3, %v809_v3  ;;  %s4230_s13 = sshll.u32 %s381_s24, 7  ;;  %v399_v28 = vld [vmem:[#allocation2 + $0x8] sm:$0x1]  ;;  %v431_v30 = vld [vmem:[#allocation2 + $0xc] sm:$0x1]  ;;  %vm4611_vm6 = vmand %vm388_vm2, %vm426_vm5  ;;  %vm2814_vm10 = vcmask 1045504  }
  0x1a   : > { %v1118_v10 = vpack.c.b16 %v1116_v6, %v1116_v6  ;;  %v517_v13 = vsel %vm515_vm0, %v500_v8, 0  ;;  %v400_v31 = vsel %vm4603_vm4, 0, %v399_v28  ;;  %v432_v33 = vsel %vm4611_vm6, 0, %v431_v30  ;;  %v1018_v42 = vld [vmem:[#allocation2 + $0xa8] sm:$0x1]  ;;  %vm4705_vm8 = vmand %vm386_vm7, %vm426_vm5  ;;  %s6753_s15 = sand.u32 1, %s4429_s18  }
  0x1b   : > { %v1425_v11 = vpack.c.b16 %v1423_v7, %v1423_v7  ;;  %v826_v14 = vsel %vm515_vm0, %v811_v9, 0  ;;  %525 = vmatpush.bf16.msra.mxu0 %v517_v13  ;;  %s4578_s16 = scalar_lea.vmem %s6757_s0, %s4230_s13  ;;  %401 = vst [vmem:[#allocation2 + $0x8] sm:$0x1] %v400_v31  ;;  %v1048_v43 = vld [vmem:[#allocation2 + $0xac] sm:$0x1]  ;;  %v1019_v44 = vsel %vm4603_vm4, 0, %v1018_v42 }
  0x1c   : > { %834 = vmatpush.bf16.msra.mxu1 %v826_v14  ;;  %v1133_v16 = vsel %vm515_vm0, %v1118_v10, 0  ;;  %v4231_v20 = vld [vmem:[%s4578_s16] sm:$0xff]  ;;  %v4232_v24 = vld [vmem:[%s4578_s16 + $0x8] sm:$0xff]  ;;  %433 = vst [vmem:[#allocation2 + $0xc] sm:$0x1] %v432_v33  ;;  %v4233_v34 = vld [vmem:[%s4578_s16 + $0x10] sm:$0xff] }
  0x1d   : > { %v1440_v17 = vsel %vm515_vm0, %v1425_v11, 0  ;;  %1141 = vmatpush.bf16.msra.mxu2 %v1133_v16  ;;  %v4236_v21 = vld [vmem:[%s4578_s16 + $0x20] sm:$0xff]  ;;  %v4237_v25 = vld [vmem:[%s4578_s16 + $0x28] sm:$0xff]  ;;  %v4238_v35 = vld [vmem:[%s4578_s16 + $0x30] sm:$0xff]  ;;  %v1049_v45 = vsel %vm4611_vm6, 0, %v1048_v43  ;;  %vm3191_vm11 = vcmask 588800  }
  0x1e   : > { %1448 = vmatpush.bf16.msra.mxu3 %v1440_v17  ;;  %v4241_v22 = vld [vmem:[%s4578_s16 + $0x40] sm:$0xff]  ;;  %v4242_v26 = vld [vmem:[%s4578_s16 + $0x48] sm:$0xff]  ;;  %v4243_v36 = vld [vmem:[%s4578_s16 + $0x50] sm:$0xff]  ;;  %1020 = vst [vmem:[#allocation2 + $0xa8] sm:$0x1] %v1019_v44  ;;  %s3913_s29 = sshll.u32 %s6753_s15, 5 }
  0x1f   : > { %v4246_v23 = vld [vmem:[%s4578_s16 + $0x60] sm:$0xff]  ;;  %526 = vmatpush.bf16.msra.mxu0 %v4235_v12  ;;  %v4247_v27 = vld [vmem:[%s4578_s16 + $0x68] sm:$0xff]  ;;  %v4248_v37 = vld [vmem:[%s4578_s16 + $0x70] sm:$0xff]  ;;  %1050 = vst [vmem:[#allocation2 + $0xac] sm:$0x1] %v1049_v45  ;;  %vm3395_vm13 = vcmask 322560  }
  0x20   : > { %835 = vmatpush.bf16.msra.mxu1 %v4240_v15  ;;  %v4234_v38 = vld [vmem:[%s4578_s16 + $0x18] sm:$0xff]  ;;  %v402_v53 = vld [vmem:[#allocation2 + $0x10] sm:$0x1]  ;;  %v434_v56 = vld [vmem:[#allocation2 + $0x14] sm:$0x1]  ;;  %s4288_s30 = sshll.u32 %s4524_s21, 5 }
  0x21   : > { %1142 = vmatpush.bf16.msra.mxu2 %v4245_v18  ;;  %v4239_v39 = vld [vmem:[%s4578_s16 + $0x38] sm:$0xff]  ;;  %v403_v55 = vsel %vm4603_vm4, 0, %v402_v53  ;;  %v435_v57 = vsel %vm4611_vm6, 0, %v434_v56  ;;  %v714_v58 = vld [vmem:[#allocation2 + $0x60] sm:$0x1]  ;;  %s3843_s24 = scalar_lea.hbm %s6620_s11, %s4288_s30  ;;  %s4395_s25 = scalar_lea.hbm %s6620_s11, 64 }
  0x22   : > { %1449 = vmatpush.bf16.msra.mxu3 %v4250_v19  ;;  %3936 = vmatmul.msk.bf16.vlgmr.msra.gmra.mxu0 %vm502_vm1, %v4231_v20  ;;  %v4244_v40 = vld [vmem:[%s4578_s16 + $0x58] sm:$0xff]  ;;  %404 = vst [vmem:[#allocation2 + $0x10] sm:$0x1] %v403_v55  ;;  %v715_v59 = vsel %vm4603_vm4, 0, %v714_v58  ;;  %v744_v60 = vld [vmem:[#allocation2 + $0x64] sm:$0x1] }
  0x23   : > { %3968 = vmatmul.msk.bf16.vlgmr.msra.gmra.mxu1 %vm502_vm1, %v4236_v21  ;;  %v4249_v41 = vld [vmem:[%s4578_s16 + $0x78] sm:$0xff]  ;;  %436 = vst [vmem:[#allocation2 + $0x14] sm:$0x1] %v435_v57  ;;  %v745_v61 = vsel %vm4611_vm6, 0, %v744_v60  ;;  %v1021_v62 = vld [vmem:[#allocation2 + $0xb0] sm:$0x1] }
  0x24   : > { %4000 = vmatmul.msk.bf16.vlgmr.msra.gmra.mxu2 %vm502_vm1, %v4241_v22  ;;  %v711_v46 = vld [vmem:[#allocation2 + $0x58] sm:$0x1]  ;;  %v741_v47 = vld [vmem:[#allocation2 + $0x5c] sm:$0x1]  ;;  %716 = vst [vmem:[#allocation2 + $0x60] sm:$0x1] %v715_v59 }
  0x25   : > { %4032 = vmatmul.msk.bf16.vlgmr.msra.gmra.mxu3 %vm502_vm1, %v4246_v23  ;;  %v712_v48 = vsel %vm4603_vm4, 0, %v711_v46  ;;  %v742_v49 = vsel %vm4611_vm6, 0, %v741_v47  ;;  %v1325_v50 = vld [vmem:[#allocation2 + $0xf8] sm:$0x1]  ;;  %v1355_v52 = vld [vmem:[#allocation2 + $0xfc] sm:$0x1] }
  0x26   : > { %713 = vst [vmem:[#allocation2 + $0x58] sm:$0x1] %v712_v48  ;;  %v1326_v51 = vsel %vm4603_vm4, 0, %v1325_v50  ;;  %v1356_v54 = vsel %vm4611_vm6, 0, %v1355_v52  ;;  %v1051_v63 = vld [vmem:[#allocation2 + $0xb4] sm:$0x1] }
  0x27   : > { %743 = vst [vmem:[#allocation2 + $0x5c] sm:$0x1] %v742_v49  ;;  %v1022_v0 = vsel %vm4603_vm4, 0, %v1021_v62  ;;  %v1052_v1 = vsel %vm4611_vm6, 0, %v1051_v63  ;;  %v1328_v2 = vld [vmem:[#allocation2 + $0x100] sm:$0x1] }
  0x28   : > { %1327 = vst [vmem:[#allocation2 + $0xf8] sm:$0x1] %v1326_v51  ;;  %v1329_v3 = vsel %vm4603_vm4, 0, %v1328_v2  ;;  %v4662_v4 = vld [vmem:[%s6611_s2] ss:$0 sm:$0xff]  ;;  %s6545_s16 = scalar_lea.vmem [#allocation3], %s3913_s29 }
  0x29   : > { %1357 = vst [vmem:[#allocation2 + $0xfc] sm:$0x1] %v1356_v54  ;;  %v1358_v5 = vld [vmem:[#allocation2 + $0x104] sm:$0x1]  ;;  %v4667_v6 = vld [vmem:[%s6611_s2] ss:$0 sm:$0xff] }
  0x2a   : > { %746 = vst [vmem:[#allocation2 + $0x64] sm:$0x1] %v745_v61  ;;  %v1359_v7 = vsel %vm4611_vm6, 0, %v1358_v5  ;;  %v405_v8 = vld [vmem:[#allocation2 + $0x18] sm:$0x1]  ;;  %s3844_s21 = sshll.u32 %s6545_s16, 4  ;;  %s3845_s21 = int_to_ptr.vmem [resolvable:$true] %s3844_s21 }
  0x2b   : > { %1023 = vst [vmem:[#allocation2 + $0xb0] sm:$0x1] %v1022_v0  ;;  %v406_v9 = vsel %vm4603_vm4, 0, %v405_v8  ;;  %v437_v10 = vld [vmem:[#allocation2 + $0x1c] sm:$0x1]  ;;  %s3846_s15 = sshll.u32 %s3843_s24, 4  ;;  %s3847_s15 = int_to_ptr.hbm [resolvable:$true] %s3846_s15 }
  0x2c   : > { %1053 = vst [vmem:[#allocation2 + $0xb4] sm:$0x1] %v1052_v1  ;;  %v438_v11 = vsel %vm4611_vm6, 0, %v437_v10  ;;  %v717_v12 = vld [vmem:[#allocation2 + $0x68] sm:$0x1]  ;;  %s7029_s29 = sand.u32 1, %s4429_s18  }
  0x2d   : > { %1330 = vst [vmem:[#allocation2 + $0x100] sm:$0x1] %v1329_v3  ;;  %v718_v13 = vsel %vm4603_vm4, 0, %v717_v12  ;;  %v1024_v16 = vld [vmem:[#allocation2 + $0xb8] sm:$0x1]  ;;  %s3832_s30 = scalar_lea.sflag [#allocation4], %s7029_s29 }
  0x2e   : > { %1360 = vst [vmem:[#allocation2 + $0x104] sm:$0x1] %v1359_v7  ;;  %v1025_v19 = vsel %vm4603_vm4, 0, %v1024_v16  ;;  %v1054_v20 = vld [vmem:[#allocation2 + $0xbc] sm:$0x1]  ;;  %s4389_s12 = sshra.s32 %s3847_s15, 4  ;;  %s4390_s12 = int_to_ptr.hbm [resolvable:$true] %s4389_s12 }
  0x2f   : > { %407 = vst [vmem:[#allocation2 + $0x18] sm:$0x1] %v406_v9  ;;  %v4684_v21 = vld [vmem:[%s6611_s2] ss:$0 sm:$0xff]  ;;  %v747_v22 = vld [vmem:[#allocation2 + $0x6c] sm:$0x1]  ;;  %p4396_p0 = scmp.lt.s32.totalorder %s4390_s12, %s6620_s11 }
  0x30   : > { %439 = vst [vmem:[#allocation2 + $0x1c] sm:$0x1] %v438_v11  ;;  %v4693_v28 = vld [vmem:[%s6611_s2] ss:$0 sm:$0xff]  ;;  %v577_v42 = vld [vmem:[#allocation2 + $0x8] sm:$0xf] }
  0x31   : > { %719 = vst [vmem:[#allocation2 + $0x68] sm:$0x1] %v718_v13  ;;  %v408_v47 = vld [vmem:[#allocation2 + $0x20] sm:$0x1]  ;;  %v440_v48 = vld [vmem:[#allocation2 + $0x24] sm:$0x1] }
  0x32   : > { %3937 = vmatmul.msk.bf16.gmra.mxu0 %vm502_vm1, %v4232_v24  ;;  %1026 = vst [vmem:[#allocation2 + $0xb8] sm:$0x1] %v1025_v19  ;;  %v580_v50 = vld [vmem:[#allocation2 + $0xc] sm:$0x1]  ;;  %v884_v52 = vld [vmem:[#allocation2 + $0x58] sm:$0xf] }
  0x33   : > { %3969 = vmatmul.msk.bf16.gmra.mxu1 %vm502_vm1, %v4237_v25  ;;  %v748_v25 = vsel %vm4611_vm6, 0, %v747_v22  ;;  %v887_v56 = vld [vmem:[#allocation2 + $0x5c] sm:$0x1]  ;;  %v409_v59 = vsel %vm4603_vm4, 0, %v408_v47  ;;  %v441_v60 = vsel %vm4611_vm6, 0, %v440_v48  ;;  %s4391_s13 = scalar_lea.hbm %s4390_s12, 32 }
  0x34   : > { %4001 = vmatmul.msk.bf16.gmra.mxu2 %vm502_vm1, %v4242_v26  ;;  %v1055_v26 = vsel %vm4611_vm6, 0, %v1054_v20  ;;  %749 = vst [vmem:[#allocation2 + $0x6c] sm:$0x1] %v748_v25  ;;  %v720_v1 = vld [vmem:[#allocation2 + $0x70] sm:$0x1]  ;;  %p4392_p11 = scmp.ne.s32.totalorder %s4390_s12, %s4391_s13  ;;  %p4397_p1 = scmp.lt.s32.totalorder %s4395_s25, %s4391_s13 }
  0x35   : > { %4033 = vmatmul.msk.bf16.gmra.mxu3 %vm502_vm1, %v4247_v27  ;;  %v1331_v27 = vld [vmem:[#allocation2 + $0x108] sm:$0x1]  ;;  %1056 = vst [vmem:[#allocation2 + $0xbc] sm:$0x1] %v1055_v26  ;;  %v750_v8 = vld [vmem:[#allocation2 + $0x74] sm:$0x1] }
  0x36   : > { %v1332_v30 = vsel %vm4603_vm4, 0, %v1331_v27  ;;  %410 = vst [vmem:[#allocation2 + $0x20] sm:$0x1] %v409_v59  ;;  %v1498_v19 = vld [vmem:[#allocation2 + $0xf8] sm:$0xf]  ;;  %v721_v25 = vsel %vm4603_vm4, 0, %v720_v1  ;;  %p4393_p12 = pnand %p4392_p11, %p4541_p5  ;;  %p4398_p2 = por %p4397_p1, %p4396_p0 }
  0x37   : > { %1333 = vst [vmem:[#allocation2 + $0x108] sm:$0x1] %v1332_v30  ;;  %v751_v26 = vsel %vm4611_vm6, 0, %v750_v8  ;;  %v901_v59 = vld [vmem:[#allocation2 + $0x60] sm:$0xf] }
  0x38   : > { %442 = vst [vmem:[#allocation2 + $0x24] sm:$0x1] %v441_v60  ;;  %p4394_p13 = pneg %p4393_p12 }
  0x39   : > { %722 = vst [vmem:[#allocation2 + $0x70] sm:$0x1] %v721_v25 }
  0x3a   : > { %752 = vst [vmem:[#allocation2 + $0x74] sm:$0x1] %v751_v26  ;;  %p4399_p3 = pnand %p4398_p2, %p4394_p13 }
  0x42   : > { %3938 = vmatmul.msk.bf16.gmra.mxu0 %vm502_vm1, %v4233_v34  ;;  %v1361_v34 = vld [vmem:[#allocation2 + $0x10c] sm:$0x1] }
  0x43   : > { %3970 = vmatmul.msk.bf16.gmra.mxu1 %vm502_vm1, %v4238_v35  ;;  %v1362_v35 = vsel %vm4611_vm6, 0, %v1361_v34 }
  0x44   : > { %4002 = vmatmul.msk.bf16.gmra.mxu2 %vm502_vm1, %v4243_v36  ;;  %1363 = vst [vmem:[#allocation2 + $0x10c] sm:$0x1] %v1362_v35 }
  0x45   : > { %4034 = vmatmul.msk.bf16.gmra.mxu3 %vm502_vm1, %v4248_v37 }
  0x52   : > { %3939 = vmatmul.msk.bf16.gmra.mxu0 %vm502_vm1, %v4234_v38 }
  0x53   : > { %3971 = vmatmul.msk.bf16.gmra.mxu1 %vm502_vm1, %v4239_v39 }
  0x54   : > { %4003 = vmatmul.msk.bf16.gmra.mxu2 %vm502_vm1, %v4244_v40 }
  0x55   : > { %4035 = vmatmul.msk.bf16.gmra.mxu3 %vm502_vm1, %v4249_v41 }
  0x9f   : > { %v528_v14 = vpop.f32.mrf.mxu0 }
  0xa0   : > { %v837_v15 = vpop.f32.mrf.mxu1  ;;  %v529_v17 = vadd.f32 %v4662_v4, %v528_v14 }
  0xa1   : > { %v838_v18 = vadd.f32 %v4667_v6, %v837_v15 }
  0xa2   : > { %v548_v23 = vmax.f32 %v529_v17, 0.0  ;;  %v1191_v17 = vld [vmem:[#allocation2 + $0xa8] sm:$0xf] }
  0xa3   : > { %v857_v24 = vmax.f32 %v838_v18, 0.0  ;;  %v1194_v18 = vld [vmem:[#allocation2 + $0xac] sm:$0x1] }
  0xa4   : > { %v556_v31 = vpack.c.bf16 %v548_v23, %v548_v23 }
  0xa5   : > { %v865_v33 = vpack.c.bf16 %v857_v24, %v857_v24 }
  0xa6   : > { %v565_v36 = vshrl.u32 %v556_v31, 16  ;;  %v568_v37 = vshll.u32 %v556_v31, 16  ;;  %v1501_v31 = vld [vmem:[#allocation2 + $0xfc] sm:$0x1] }
  0xa7   : > { %v874_v38 = vshrl.u32 %v865_v33, 16  ;;  %v877_v39 = vshll.u32 %v865_v33, 16  ;;  %v1144_v40 = vpop.f32.mrf.mxu2  ;;  %v530_v45 = vpop.f32.mrf.mxu0 }
  0xa8   : > { %v1451_v41 = vpop.f32.mrf.mxu3  ;;  %v1145_v43 = vadd.f32 %v4684_v21, %v1144_v40  ;;  %v839_v46 = vpop.f32.mrf.mxu1  ;;  %v567_v49 = vrot.slane %v565_v36, 7  ;;  %v531_v53 = vadd.f32 %v4662_v4, %v530_v45 }
  0xa9   : > { %v1452_v44 = vadd.f32 %v4693_v28, %v1451_v41  ;;  %v876_v51 = vrot.slane %v874_v38, 7  ;;  %v840_v54 = vadd.f32 %v4667_v6, %v839_v46 }
  0xaa   : > { %v1164_v57 = vmax.f32 %v1145_v43, 0.0  ;;  %v570_v61 = vor.u32 %v568_v37, %v567_v49  ;;  %v571_v62 = vrot.slane %v567_v49, 4  ;;  %v549_v5 = vmax.f32 %v531_v53, 0.0  ;;  %v597_v53 = vld [vmem:[#allocation2 + $0x14] sm:$0x1] }
  0xab   : > { %v1471_v58 = vmax.f32 %v1452_v44, 0.0  ;;  %v879_v63 = vor.u32 %v877_v39, %v876_v51  ;;  %v880_v0 = vrot.slane %v876_v51, 4  ;;  %v858_v7 = vmax.f32 %v840_v54, 0.0 }
  0xac   : > { %v1172_v2 = vpack.c.bf16 %v1164_v57, %v1164_v57  ;;  %v578_v9 = vsel %vm4705_vm8, %v570_v61, %v577_v42  ;;  %v581_v10 = vsel %vm4603_vm4, %v571_v62, %v580_v50  ;;  %v557_v20 = vpack.c.bf16 %v549_v5, %v549_v5  ;;  %v904_v61 = vld [vmem:[#allocation2 + $0x64] sm:$0x1] }
  0xad   : > { %v1479_v3 = vpack.c.bf16 %v1471_v58, %v1471_v58  ;;  %v885_v11 = vsel %vm4705_vm8, %v879_v63, %v884_v52  ;;  %v888_v12 = vsel %vm4603_vm4, %v880_v0, %v887_v56  ;;  %579 = vst [vmem:[#allocation2 + $0x8] sm:$0xf] %v578_v9  ;;  %v866_v22 = vpack.c.bf16 %v858_v7, %v858_v7  ;;  %v594_v52 = vld [vmem:[#allocation2 + $0x10] sm:$0xf] }
  0xae   : > { %v1181_v13 = vshrl.u32 %v1172_v2, 16  ;;  %v1184_v14 = vshll.u32 %v1172_v2, 16  ;;  %582 = vst [vmem:[#allocation2 + $0xc] sm:$0x1] %v581_v10  ;;  %v584_v35 = vshrl.u32 %v557_v20, 16  ;;  %v587_v36 = vshll.u32 %v557_v20, 16 }
  0xaf   : > { %v1488_v15 = vshrl.u32 %v1479_v3, 16  ;;  %v1491_v16 = vshll.u32 %v1479_v3, 16  ;;  %v1146_v23 = vpop.f32.mrf.mxu2  ;;  %886 = vst [vmem:[#allocation2 + $0x58] sm:$0xf] %v885_v11  ;;  %v891_v37 = vshrl.u32 %v866_v22, 16  ;;  %v894_v38 = vshll.u32 %v866_v22, 16  ;;  %v533_v47 = vpop.f32.mrf.mxu0 }
  0xb0   : > { %v1453_v24 = vpop.f32.mrf.mxu3  ;;  %v1183_v27 = vrot.slane %v1181_v13, 7  ;;  %v1147_v33 = vadd.f32 %v4684_v21, %v1146_v23  ;;  %889 = vst [vmem:[#allocation2 + $0x5c] sm:$0x1] %v888_v12  ;;  %v586_v43 = vrot.slane %v584_v35, 7  ;;  %v842_v60 = vpop.f32.mrf.mxu1  ;;  %v534_v0 = vadd.f32 %v4662_v4, %v533_v47  ;;  %v1208_v10 = vld [vmem:[#allocation2 + $0xb0] sm:$0xf] }
  0xb1   : > { %v1490_v30 = vrot.slane %v1488_v15, 7  ;;  %v1454_v34 = vadd.f32 %v4693_v28, %v1453_v24  ;;  %v893_v44 = vrot.slane %v891_v37, 7  ;;  %v1211_v11 = vld [vmem:[#allocation2 + $0xb4] sm:$0x1]  ;;  %v843_v13 = vadd.f32 %v4667_v6, %v842_v60 }
  0xb2   : > { %v1186_v39 = vor.u32 %v1184_v14, %v1183_v27  ;;  %v1187_v40 = vrot.slane %v1183_v27, 4  ;;  %v1165_v45 = vmax.f32 %v1147_v33, 0.0  ;;  %v589_v54 = vor.u32 %v587_v36, %v586_v43 }
  0xb3   : > { %v1493_v41 = vor.u32 %v1491_v16, %v1490_v30  ;;  %v1494_v42 = vrot.slane %v1490_v30, 4  ;;  %v1472_v46 = vmax.f32 %v1454_v34, 0.0  ;;  %v590_v56 = vrot.slane %v586_v43, 4  ;;  %v1518_v30 = vld [vmem:[#allocation2 + $0x104] sm:$0x1] }
  0xb4   : > { %v1192_v48 = vsel %vm4705_vm8, %v1186_v39, %v1191_v17  ;;  %v1195_v49 = vsel %vm4603_vm4, %v1187_v40, %v1194_v18  ;;  %v896_v57 = vor.u32 %v894_v38, %v893_v44  ;;  %v897_v58 = vrot.slane %v893_v44, 4 }
  0xb5   : > { %v1499_v50 = vsel %vm4705_vm8, %v1493_v41, %v1498_v19  ;;  %v1502_v51 = vsel %vm4603_vm4, %v1494_v42, %v1501_v31  ;;  %1193 = vst [vmem:[#allocation2 + $0xa8] sm:$0xf] %v1192_v48  ;;  %v1173_v62 = vpack.c.bf16 %v1165_v45, %v1165_v45  ;;  %v1480_v63 = vpack.c.bf16 %v1472_v46, %v1472_v46  ;;  %v1515_v19 = vld [vmem:[#allocation2 + $0x100] sm:$0xf]  ;;  %v611_v41 = vld [vmem:[#allocation2 + $0x18] sm:$0xf] }
  0xb6   : > { %1196 = vst [vmem:[#allocation2 + $0xac] sm:$0x1] %v1195_v49  ;;  %v595_v1 = vsel %vm4705_vm8, %v589_v54, %v594_v52  ;;  %v598_v2 = vsel %vm4603_vm4, %v590_v56, %v597_v53  ;;  %v902_v5 = vsel %vm4705_vm8, %v896_v57, %v901_v59  ;;  %v905_v7 = vsel %vm4603_vm4, %v897_v58, %v904_v61  ;;  %v614_v45 = vld [vmem:[#allocation2 + $0x1c] sm:$0x1]  ;;  %v921_v57 = vld [vmem:[#allocation2 + $0x6c] sm:$0x1] }
  0xb7   : > { %1500 = vst [vmem:[#allocation2 + $0xf8] sm:$0xf] %v1499_v50  ;;  %v1149_v3 = vpop.f32.mrf.mxu2  ;;  %v1198_v8 = vshrl.u32 %v1173_v62, 16  ;;  %v1505_v9 = vshrl.u32 %v1480_v63, 16  ;;  %v550_v12 = vmax.f32 %v534_v0, 0.0  ;;  %v1201_v16 = vshll.u32 %v1173_v62, 16  ;;  %v535_v37 = vpop.f32.mrf.mxu0 }
  0xb8   : > { %1503 = vst [vmem:[#allocation2 + $0xfc] sm:$0x1] %v1502_v51  ;;  %v1150_v14 = vadd.f32 %v4684_v21, %v1149_v3  ;;  %v1508_v18 = vshll.u32 %v1480_v63, 16  ;;  %v859_v22 = vmax.f32 %v843_v13, 0.0  ;;  %v1456_v24 = vpop.f32.mrf.mxu3  ;;  %v844_v42 = vpop.f32.mrf.mxu1  ;;  %v918_v50 = vld [vmem:[#allocation2 + $0x68] sm:$0xf]  ;;  %v536_v52 = vadd.f32 %v4662_v4, %v535_v37 }
  0xb9   : > { %596 = vst [vmem:[#allocation2 + $0x10] sm:$0xf] %v595_v1  ;;  %v1200_v15 = vrot.slane %v1198_v8, 7  ;;  %v1507_v17 = vrot.slane %v1505_v9, 7  ;;  %v558_v20 = vpack.c.bf16 %v550_v12, %v550_v12  ;;  %v1457_v31 = vadd.f32 %v4693_v28, %v1456_v24  ;;  %v1027_v62 = vld [vmem:[#allocation2 + $0xc0] sm:$0x1] }
  0xba   : > { %599 = vst [vmem:[#allocation2 + $0x14] sm:$0x1] %v598_v2  ;;  %v1166_v23 = vmax.f32 %v1150_v14, 0.0  ;;  %v867_v36 = vpack.c.bf16 %v859_v22, %v859_v22  ;;  %v845_v58 = vadd.f32 %v4667_v6, %v844_v42  ;;  %v1532_v14 = vld [vmem:[#allocation2 + $0x108] sm:$0xf] }
  0xbb   : > { %903 = vst [vmem:[#allocation2 + $0x60] sm:$0xf] %v902_v5  ;;  %v1203_v25 = vor.u32 %v1201_v16, %v1200_v15  ;;  %v1204_v26 = vrot.slane %v1200_v15, 4  ;;  %v1510_v27 = vor.u32 %v1508_v18, %v1507_v17  ;;  %v1511_v33 = vrot.slane %v1507_v17, 4  ;;  %v1225_v5 = vld [vmem:[#allocation2 + $0xb8] sm:$0xf] }
  0xbc   : > { %906 = vst [vmem:[#allocation2 + $0x64] sm:$0x1] %v905_v7  ;;  %v601_v34 = vshrl.u32 %v558_v20, 16  ;;  %v604_v35 = vshll.u32 %v558_v20, 16  ;;  %v908_v46 = vshrl.u32 %v867_v36, 16  ;;  %v1174_v47 = vpack.c.bf16 %v1166_v23, %v1166_v23 }
  0xbd   : > { %v1209_v38 = vsel %vm4705_vm8, %v1203_v25, %v1208_v10  ;;  %v1212_v39 = vsel %vm4603_vm4, %v1204_v26, %v1211_v11  ;;  %v1516_v40 = vsel %vm4705_vm8, %v1510_v27, %v1515_v19  ;;  %v1519_v43 = vsel %vm4603_vm4, %v1511_v33, %v1518_v30  ;;  %v1228_v7 = vld [vmem:[#allocation2 + $0xbc] sm:$0x1]  ;;  %v1057_v22 = vld [vmem:[#allocation2 + $0xc4] sm:$0x1]  ;;  %v1535_v23 = vld [vmem:[#allocation2 + $0x10c] sm:$0x1] }
  0xbe   : > { %1210 = vst [vmem:[#allocation2 + $0xb0] sm:$0xf] %v1209_v38  ;;  %v603_v44 = vrot.slane %v601_v34, 7  ;;  %v911_v49 = vshll.u32 %v867_v36, 16  ;;  %v1473_v51 = vmax.f32 %v1457_v31, 0.0  ;;  %v910_v56 = vrot.slane %v908_v46, 7 }
  0xbf   : > { %v1151_v48 = vpop.f32.mrf.mxu2  ;;  %1213 = vst [vmem:[#allocation2 + $0xb4] sm:$0x1] %v1212_v39  ;;  %v1215_v59 = vshrl.u32 %v1174_v47, 16  ;;  %v1218_v60 = vshll.u32 %v1174_v47, 16  ;;  %v551_v11 = vmax.f32 %v536_v52, 0.0  ;;  %v860_v15 = vmax.f32 %v845_v58, 0.0 }
  0xc0   : > { %1517 = vst [vmem:[#allocation2 + $0x100] sm:$0xf] %v1516_v40  ;;  %v606_v53 = vor.u32 %v604_v35, %v603_v44  ;;  %v607_v54 = vrot.slane %v603_v44, 4  ;;  %v1481_v61 = vpack.c.bf16 %v1473_v51, %v1473_v51  ;;  %v1152_v63 = vadd.f32 %v4684_v21, %v1151_v48  ;;  %v1458_v36 = vpop.f32.mrf.mxu3  ;;  %v628_v39 = vld [vmem:[#allocation2 + $0x20] sm:$0xf]  ;;  %v538_v44 = vpop.f32.mrf.mxu0 }
  0xc1   : > { %1520 = vst [vmem:[#allocation2 + $0x104] sm:$0x1] %v1519_v43  ;;  %v913_v2 = vor.u32 %v911_v49, %v910_v56  ;;  %v914_v3 = vrot.slane %v910_v56, 4  ;;  %v1217_v8 = vrot.slane %v1215_v59, 7  ;;  %v1028_v16 = vsel %vm4603_vm4, 0, %v1027_v62  ;;  %v847_v62 = vpop.f32.mrf.mxu1 }
  0xc2   : > { %v612_v0 = vsel %vm4705_vm8, %v606_v53, %v611_v41  ;;  %v615_v1 = vsel %vm4603_vm4, %v607_v54, %v614_v45  ;;  %v1522_v9 = vshrl.u32 %v1481_v61, 16  ;;  %v1525_v10 = vshll.u32 %v1481_v61, 16  ;;  %1029 = vst [vmem:[#allocation2 + $0xc0] sm:$0x1] %v1028_v16  ;;  %v631_v40 = vld [vmem:[#allocation2 + $0x24] sm:$0x1] }
  0xc3   : > { %613 = vst [vmem:[#allocation2 + $0x18] sm:$0xf] %v612_v0  ;;  %v919_v12 = vsel %vm4705_vm8, %v913_v2, %v918_v50  ;;  %v922_v13 = vsel %vm4603_vm4, %v914_v3, %v921_v57  ;;  %v1220_v17 = vor.u32 %v1218_v60, %v1217_v8  ;;  %v1221_v18 = vrot.slane %v1217_v8, 4  ;;  %v1334_v43 = vld [vmem:[#allocation2 + $0x110] sm:$0x1] }
  0xc4   : > { %616 = vst [vmem:[#allocation2 + $0x1c] sm:$0x1] %v615_v1  ;;  %v1524_v19 = vrot.slane %v1522_v9, 7  ;;  %v559_v20 = vpack.c.bf16 %v551_v11, %v551_v11  ;;  %v868_v24 = vpack.c.bf16 %v860_v15, %v860_v15  ;;  %v1167_v25 = vmax.f32 %v1152_v63, 0.0  ;;  %v935_v48 = vld [vmem:[#allocation2 + $0x70] sm:$0xf] }
  0xc5   : > { %920 = vst [vmem:[#allocation2 + $0x68] sm:$0xf] %v919_v12  ;;  %v1226_v26 = vsel %vm4705_vm8, %v1220_v17, %v1225_v5  ;;  %v1229_v27 = vsel %vm4603_vm4, %v1221_v18, %v1228_v7  ;;  %v1058_v35 = vsel %vm4611_vm6, 0, %v1057_v22  ;;  %v1459_v50 = vadd.f32 %v4693_v28, %v1458_v36  ;;  %v938_v54 = vld [vmem:[#allocation2 + $0x74] sm:$0x1] }
  0xc6   : > { %923 = vst [vmem:[#allocation2 + $0x6c] sm:$0x1] %v922_v13  ;;  %v1527_v30 = vor.u32 %v1525_v10, %v1524_v19  ;;  %v1528_v31 = vrot.slane %v1524_v19, 4  ;;  %v618_v33 = vshrl.u32 %v559_v20, 16  ;;  %v925_v34 = vshrl.u32 %v868_v24, 16 }
  0xc7   : > { %1227 = vst [vmem:[#allocation2 + $0xb8] sm:$0xf] %v1226_v26  ;;  %v928_v41 = vshll.u32 %v868_v24, 16  ;;  %v1175_v42 = vpack.c.bf16 %v1167_v25, %v1167_v25  ;;  %v621_v46 = vshll.u32 %v559_v20, 16  ;;  %v539_v56 = vadd.f32 %v4662_v4, %v538_v44  ;;  %v1364_v61 = vld [vmem:[#allocation2 + $0x114] sm:$0x1]  ;;  %v1154_v24 = vpop.f32.mrf.mxu2 }
  0xc8   : > { %1230 = vst [vmem:[#allocation2 + $0xbc] sm:$0x1] %v1229_v27  ;;  %v1533_v37 = vsel %vm4705_vm8, %v1527_v30, %v1532_v14  ;;  %v1536_v38 = vsel %vm4603_vm4, %v1528_v31, %v1535_v23  ;;  %v620_v45 = vrot.slane %v618_v33, 7  ;;  %v927_v47 = vrot.slane %v925_v34, 7  ;;  %v411_v3 = vld [vmem:[#allocation2 + $0x28] sm:$0x1]  ;;  %v1461_v44 = vpop.f32.mrf.mxu3 }
  0xc9   : > { %1534 = vst [vmem:[#allocation2 + $0x108] sm:$0xf] %v1533_v37  ;;  %v1232_v49 = vshrl.u32 %v1175_v42, 16  ;;  %v1235_v59 = vshll.u32 %v1175_v42, 16  ;;  %v1335_v60 = vsel %vm4603_vm4, 0, %v1334_v43  ;;  %v848_v5 = vadd.f32 %v4667_v6, %v847_v62 }
  0xca   : > { %1537 = vst [vmem:[#allocation2 + $0x10c] sm:$0x1] %v1536_v38  ;;  %v623_v51 = vor.u32 %v621_v46, %v620_v45  ;;  %v624_v52 = vrot.slane %v620_v45, 4  ;;  %v930_v53 = vor.u32 %v928_v41, %v927_v47  ;;  %v931_v57 = vrot.slane %v927_v47, 4  ;;  %v1242_v2 = vld [vmem:[#allocation2 + $0xc0] sm:$0xf] }
  0xcb   : > { %1059 = vst [vmem:[#allocation2 + $0xc4] sm:$0x1] %v1058_v35  ;;  %v1234_v58 = vrot.slane %v1232_v49, 7  ;;  %v1474_v9 = vmax.f32 %v1459_v50, 0.0  ;;  %v443_v10 = vld [vmem:[#allocation2 + $0x2c] sm:$0x1]  ;;  %v849_v49 = vpop.f32.mrf.mxu1 }
  0xcc   : > { %v629_v63 = vsel %vm4705_vm8, %v623_v51, %v628_v39  ;;  %v632_v0 = vsel %vm4603_vm4, %v624_v52, %v631_v40  ;;  %v936_v1 = vsel %vm4705_vm8, %v930_v53, %v935_v48  ;;  %1336 = vst [vmem:[#allocation2 + $0x110] sm:$0x1] %v1335_v60  ;;  %v939_v7 = vsel %vm4603_vm4, %v931_v57, %v938_v54  ;;  %v723_v13 = vld [vmem:[#allocation2 + $0x78] sm:$0x1]  ;;  %v753_v17 = vld [vmem:[#allocation2 + $0x7c] sm:$0x1]  ;;  %v540_v40 = vpop.f32.mrf.mxu0 }
  0xcd   : > { %630 = vst [vmem:[#allocation2 + $0x20] sm:$0xf] %v629_v63  ;;  %v1237_v8 = vor.u32 %v1235_v59, %v1234_v58  ;;  %v1238_v11 = vrot.slane %v1234_v58, 4  ;;  %v552_v12 = vmax.f32 %v539_v56, 0.0  ;;  %v1365_v15 = vsel %vm4611_vm6, 0, %v1364_v61 }
  0xce   : > { %633 = vst [vmem:[#allocation2 + $0x24] sm:$0x1] %v632_v0  ;;  %v1482_v16 = vpack.c.bf16 %v1474_v9, %v1474_v9  ;;  %v412_v18 = vsel %vm4603_vm4, 0, %v411_v3  ;;  %v444_v19 = vsel %vm4611_vm6, 0, %v443_v10  ;;  %v861_v22 = vmax.f32 %v848_v5, 0.0 }
  0xcf   : > { %937 = vst [vmem:[#allocation2 + $0x70] sm:$0xf] %v936_v1  ;;  %v1243_v14 = vsel %vm4705_vm8, %v1237_v8, %v1242_v2  ;;  %v560_v20 = vpack.c.bf16 %v552_v12, %v552_v12  ;;  %v1030_v23 = vld [vmem:[#allocation2 + $0xc8] sm:$0x1]  ;;  %v724_v27 = vsel %vm4603_vm4, 0, %v723_v13  ;;  %v754_v33 = vsel %vm4611_vm6, 0, %v753_v17  ;;  %v1156_v17 = vpop.f32.mrf.mxu2 }
  0xd0   : > { %940 = vst [vmem:[#allocation2 + $0x74] sm:$0x1] %v939_v7  ;;  %v1539_v26 = vshrl.u32 %v1482_v16, 16  ;;  %v869_v34 = vpack.c.bf16 %v861_v22, %v861_v22  ;;  %v1060_v35 = vld [vmem:[#allocation2 + $0xcc] sm:$0x1]  ;;  %v1542_v37 = vshll.u32 %v1482_v16, 16  ;;  %v1155_v39 = vadd.f32 %v4684_v21, %v1154_v24 }
  0xd1   : > { %1244 = vst [vmem:[#allocation2 + $0xc0] sm:$0xf] %v1243_v14  ;;  %v635_v31 = vshrl.u32 %v560_v20, 16  ;;  %v638_v38 = vshll.u32 %v560_v20, 16  ;;  %v1031_v46 = vsel %vm4603_vm4, 0, %v1030_v23  ;;  %v1462_v48 = vadd.f32 %v4693_v28, %v1461_v44 }
  0xd2   : > { %v1245_v25 = vld [vmem:[#allocation2 + $0xc4] sm:$0x1]  ;;  %1366 = vst [vmem:[#allocation2 + $0x114] sm:$0x1] %v1365_v15  ;;  %v1541_v36 = vrot.slane %v1539_v26, 7  ;;  %v942_v43 = vshrl.u32 %v869_v34, 16  ;;  %v541_v53 = vadd.f32 %v4662_v4, %v540_v40  ;;  %v850_v60 = vadd.f32 %v4667_v6, %v849_v49 }
  0xd3   : > { %v1246_v30 = vsel %vm4603_vm4, %v1238_v11, %v1245_v25  ;;  %v1549_v41 = vld [vmem:[#allocation2 + $0x110] sm:$0xf]  ;;  %413 = vst [vmem:[#allocation2 + $0x28] sm:$0x1] %v412_v18  ;;  %v637_v42 = vrot.slane %v635_v31, 7  ;;  %v945_v52 = vshll.u32 %v869_v34, 16  ;;  %v1157_v40 = vadd.f32 %v4684_v21, %v1156_v17 }
  0xd4   : > { %1247 = vst [vmem:[#allocation2 + $0xc4] sm:$0x1] %v1246_v30  ;;  %v1544_v45 = vor.u32 %v1542_v37, %v1541_v36  ;;  %v1337_v47 = vld [vmem:[#allocation2 + $0x118] sm:$0x1]  ;;  %v1545_v50 = vrot.slane %v1541_v36, 4  ;;  %v944_v51 = vrot.slane %v942_v43, 7  ;;  %v1463_v37 = vpop.f32.mrf.mxu3 }
  0xd5   : > { %445 = vst [vmem:[#allocation2 + $0x2c] sm:$0x1] %v444_v19  ;;  %v1061_v56 = vsel %vm4611_vm6, 0, %v1060_v35  ;;  %v1168_v57 = vmax.f32 %v1155_v39, 0.0  ;;  %v640_v58 = vor.u32 %v638_v38, %v637_v42  ;;  %v641_v59 = vrot.slane %v637_v42, 4 }
  0xd6   : > { %725 = vst [vmem:[#allocation2 + $0x78] sm:$0x1] %v724_v27  ;;  %v1550_v54 = vsel %vm4705_vm8, %v1544_v45, %v1549_v41  ;;  %v1338_v63 = vsel %vm4603_vm4, 0, %v1337_v47  ;;  %v1475_v0 = vmax.f32 %v1462_v48, 0.0  ;;  %v947_v2 = vor.u32 %v945_v52, %v944_v51  ;;  %v1367_v3 = vld [vmem:[#allocation2 + $0x11c] sm:$0x1] }
  0xd7   : > { %755 = vst [vmem:[#allocation2 + $0x7c] sm:$0x1] %v754_v33  ;;  %v1176_v62 = vpack.c.bf16 %v1168_v57, %v1168_v57  ;;  %v553_v5 = vmax.f32 %v541_v53, 0.0  ;;  %v948_v8 = vrot.slane %v944_v51, 4  ;;  %v414_v14 = vld [vmem:[#allocation2 + $0x30] sm:$0x1]  ;;  %v1464_v48 = vadd.f32 %v4693_v28, %v1463_v37 }
  0xd8   : > { %1551 = vst [vmem:[#allocation2 + $0x110] sm:$0xf] %v1550_v54  ;;  %v1483_v10 = vpack.c.bf16 %v1475_v0, %v1475_v0  ;;  %v862_v16 = vmax.f32 %v850_v60, 0.0  ;;  %v1368_v25 = vsel %vm4611_vm6, 0, %v1367_v3  ;;  %v446_v27 = vld [vmem:[#allocation2 + $0x34] sm:$0x1]  ;;  %v1159_v3 = vpop.f32.mrf.mxu2 }
  0xd9   : > { %v1552_v61 = vld [vmem:[#allocation2 + $0x114] sm:$0x1]  ;;  %1032 = vst [vmem:[#allocation2 + $0xc8] sm:$0x1] %v1031_v46  ;;  %v1249_v9 = vshrl.u32 %v1176_v62, 16  ;;  %v1252_v13 = vshll.u32 %v1176_v62, 16  ;;  %v4821_v15 = vpack.c.bf16 %v553_v5, %v553_v5 }
  0xda   : > { %v1553_v1 = vsel %vm4603_vm4, %v1545_v50, %v1552_v61  ;;  %1062 = vst [vmem:[#allocation2 + $0xcc] sm:$0x1] %v1061_v56  ;;  %v645_v7 = vld [vmem:[#allocation2 + $0x28] sm:$0xf]  ;;  %v1556_v22 = vshrl.u32 %v1483_v10, 16  ;;  %v1559_v26 = vshll.u32 %v1483_v10, 16  ;;  %v4829_v30 = vpack.c.bf16 %v862_v16, %v862_v16 }
  0xdb   : > { %1554 = vst [vmem:[#allocation2 + $0x114] sm:$0x1] %v1553_v1  ;;  %v646_v11 = vsel %vm4705_vm8, %v640_v58, %v645_v7  ;;  %v1251_v20 = vrot.slane %v1249_v9, 7  ;;  %v726_v36 = vld [vmem:[#allocation2 + $0x80] sm:$0x1]  ;;  %v652_v39 = vshrl.u32 %v4821_v15, 16  ;;  %v543_v58 = vpop.f32.mrf.mxu0 }
  0xdc   : > { %v648_v12 = vld [vmem:[#allocation2 + $0x2c] sm:$0x1]  ;;  %1339 = vst [vmem:[#allocation2 + $0x118] sm:$0x1] %v1338_v63  ;;  %v1558_v35 = vrot.slane %v1556_v22, 7  ;;  %v415_v44 = vsel %vm4603_vm4, 0, %v414_v14  ;;  %v544_v9 = vadd.f32 %v4662_v4, %v543_v58  ;;  %v1160_v4 = vadd.f32 %v4684_v21, %v1159_v3 }
  0xdd   : > { %647 = vst [vmem:[#allocation2 + $0x28] sm:$0xf] %v646_v11  ;;  %v649_v18 = vsel %vm4603_vm4, %v641_v59, %v648_v12  ;;  %v952_v19 = vld [vmem:[#allocation2 + $0x78] sm:$0xf]  ;;  %v1254_v33 = vor.u32 %v1252_v13, %v1251_v20  ;;  %v1255_v34 = vrot.slane %v1251_v20, 4  ;;  %v447_v50 = vsel %vm4611_vm6, 0, %v446_v27 }
  0xde   : > { %650 = vst [vmem:[#allocation2 + $0x2c] sm:$0x1] %v649_v18  ;;  %v953_v23 = vsel %vm4705_vm8, %v947_v2, %v952_v19  ;;  %v955_v24 = vld [vmem:[#allocation2 + $0x7c] sm:$0x1]  ;;  %v1561_v43 = vor.u32 %v1559_v26, %v1558_v35  ;;  %v756_v46 = vld [vmem:[#allocation2 + $0x84] sm:$0x1]  ;;  %v852_v2 = vpop.f32.mrf.mxu1 }
  0xdf   : > { %954 = vst [vmem:[#allocation2 + $0x78] sm:$0xf] %v953_v23  ;;  %v956_v31 = vsel %vm4603_vm4, %v948_v8, %v955_v24  ;;  %v1033_v47 = vld [vmem:[#allocation2 + $0xd0] sm:$0x1]  ;;  %v959_v51 = vshrl.u32 %v4829_v30, 16  ;;  %v654_v54 = vrot.slane %v652_v39, 7  ;;  %v853_v10 = vadd.f32 %v4667_v6, %v852_v2 }
  0xe0   : > { %957 = vst [vmem:[#allocation2 + $0x7c] sm:$0x1] %v956_v31  ;;  %v1259_v38 = vld [vmem:[#allocation2 + $0xc8] sm:$0xf]  ;;  %v1063_v52 = vld [vmem:[#allocation2 + $0xd4] sm:$0x1] }
  0xe1   : > { %v1260_v41 = vsel %vm4705_vm8, %v1254_v33, %v1259_v38  ;;  %v1262_v42 = vld [vmem:[#allocation2 + $0xcc] sm:$0x1]  ;;  %1369 = vst [vmem:[#allocation2 + $0x11c] sm:$0x1] %v1368_v25  ;;  %v727_v56 = vsel %vm4603_vm4, 0, %v726_v36  ;;  %v1169_v57 = vmax.f32 %v1157_v40, 0.0 }
  0xe2   : > { %1261 = vst [vmem:[#allocation2 + $0xc8] sm:$0xf] %v1260_v41  ;;  %v1263_v45 = vsel %vm4603_vm4, %v1255_v34, %v1262_v42  ;;  %v1562_v59 = vrot.slane %v1558_v35, 4  ;;  %v757_v60 = vsel %vm4611_vm6, 0, %v756_v46  ;;  %v1340_v61 = vld [vmem:[#allocation2 + $0x120] sm:$0x1] }
  0xe3   : > { %1264 = vst [vmem:[#allocation2 + $0xcc] sm:$0x1] %v1263_v45  ;;  %v1566_v49 = vld [vmem:[#allocation2 + $0x118] sm:$0xf]  ;;  %v655_v62 = vshll.u32 %v4821_v15, 16  ;;  %v1034_v63 = vsel %vm4603_vm4, 0, %v1033_v47  ;;  %v1177_v0 = vpack.c.bf16 %v1169_v57, %v1169_v57 }
  0xe4   : > { %v1567_v53 = vsel %vm4705_vm8, %v1561_v43, %v1566_v49  ;;  %416 = vst [vmem:[#allocation2 + $0x30] sm:$0x1] %v415_v44  ;;  %v1476_v1 = vmax.f32 %v1464_v48, 0.0  ;;  %v961_v5 = vrot.slane %v959_v51, 7  ;;  %v962_v7 = vshll.u32 %v4829_v30, 16  ;;  %v1466_v30 = vpop.f32.mrf.mxu3 }
  0xe5   : > { %1568 = vst [vmem:[#allocation2 + $0x118] sm:$0xf] %v1567_v53  ;;  %v1370_v8 = vld [vmem:[#allocation2 + $0x124] sm:$0x1]  ;;  %v657_v12 = vor.u32 %v655_v62, %v654_v54  ;;  %v1064_v13 = vsel %vm4611_vm6, 0, %v1063_v52  ;;  %v1266_v14 = vshrl.u32 %v1177_v0, 16  ;;  %v1467_v36 = vadd.f32 %v4693_v28, %v1466_v30  ;;  %v1161_v30 = vpop.f32.mrf.mxu2 }
  0xe6   : > { %448 = vst [vmem:[#allocation2 + $0x34] sm:$0x1] %v447_v50  ;;  %v1484_v15 = vpack.c.bf16 %v1476_v1, %v1476_v1  ;;  %v658_v17 = vrot.slane %v654_v54, 4  ;;  %v1341_v18 = vsel %vm4603_vm4, 0, %v1340_v61  ;;  %v417_v19 = vld [vmem:[#allocation2 + $0x38] sm:$0x1]  ;;  %v964_v25 = vor.u32 %v962_v7, %v961_v5 }
  0xe7   : > { %728 = vst [vmem:[#allocation2 + $0x80] sm:$0x1] %v727_v56  ;;  %v1268_v6 = vrot.slane %v1266_v14, 7  ;;  %v1269_v20 = vshll.u32 %v1177_v0, 16  ;;  %v1371_v22 = vsel %vm4611_vm6, 0, %v1370_v8  ;;  %v554_v26 = vmax.f32 %v544_v9, 0.0 }
  0xe8   : > { %v1569_v11 = vld [vmem:[#allocation2 + $0x11c] sm:$0x1]  ;;  %758 = vst [vmem:[#allocation2 + $0x84] sm:$0x1] %v757_v60  ;;  %v1573_v23 = vshrl.u32 %v1484_v15, 16  ;;  %v863_v27 = vmax.f32 %v853_v10, 0.0 }
  0xe9   : > { %v1570_v16 = vsel %vm4603_vm4, %v1562_v59, %v1569_v11  ;;  %1035 = vst [vmem:[#allocation2 + $0xd0] sm:$0x1] %v1034_v63  ;;  %v965_v33 = vrot.slane %v961_v5, 4  ;;  %v449_v35 = vld [vmem:[#allocation2 + $0x3c] sm:$0x1]  ;;  %v1271_v38 = vor.u32 %v1269_v20, %v1268_v6  ;;  %v562_v39 = vpack.c.bf16 %v554_v26, %v554_v26 }
  0xea   : > { %1571 = vst [vmem:[#allocation2 + $0x11c] sm:$0x1] %v1570_v16  ;;  %v1575_v34 = vrot.slane %v1573_v23, 7  ;;  %v1170_v40 = vmax.f32 %v1160_v4, 0.0  ;;  %v1576_v43 = vshll.u32 %v1484_v15, 16  ;;  %v418_v44 = vsel %vm4603_vm4, 0, %v417_v19 }
  0xeb   : > { %v662_v24 = vld [vmem:[#allocation2 + $0x30] sm:$0xf]  ;;  %1065 = vst [vmem:[#allocation2 + $0xd4] sm:$0x1] %v1064_v13  ;;  %v1272_v28 = vrot.slane %v1268_v6, 4  ;;  %v669_v47 = vshrl.u32 %v562_v39, 16  ;;  %v871_v48 = vpack.c.bf16 %v863_v27, %v863_v27  ;;  %v854_v6 = vpop.f32.mrf.mxu1 }
  0xec   : > { %v663_v31 = vsel %vm4705_vm8, %v657_v12, %v662_v24  ;;  %1342 = vst [vmem:[#allocation2 + $0x120] sm:$0x1] %v1341_v18  ;;  %v1578_v51 = vor.u32 %v1576_v43, %v1575_v34  ;;  %v450_v52 = vsel %vm4611_vm6, 0, %v449_v35  ;;  %v1477_v53 = vmax.f32 %v1467_v36, 0.0  ;;  %v729_v58 = vld [vmem:[#allocation2 + $0x88] sm:$0x1] }
  0xed   : > { %664 = vst [vmem:[#allocation2 + $0x30] sm:$0xf] %v663_v31  ;;  %v665_v37 = vld [vmem:[#allocation2 + $0x34] sm:$0x1]  ;;  %v1579_v56 = vrot.slane %v1575_v34, 4  ;;  %v672_v57 = vshll.u32 %v562_v39, 16  ;;  %v1178_v59 = vpack.c.bf16 %v1170_v40, %v1170_v40 }
  0xee   : > { %v666_v41 = vsel %vm4603_vm4, %v658_v17, %v665_v37  ;;  %v969_v42 = vld [vmem:[#allocation2 + $0x80] sm:$0xf]  ;;  %1372 = vst [vmem:[#allocation2 + $0x124] sm:$0x1] %v1371_v22  ;;  %v759_v61 = vld [vmem:[#allocation2 + $0x8c] sm:$0x1]  ;;  %v1485_v5 = vpack.c.bf16 %v1477_v53, %v1477_v53  ;;  %v545_v17 = vpop.f32.mrf.mxu0 }
  0xef   : > { %667 = vst [vmem:[#allocation2 + $0x34] sm:$0x1] %v666_v41  ;;  %v970_v45 = vsel %vm4705_vm8, %v964_v25, %v969_v42  ;;  %v972_v46 = vld [vmem:[#allocation2 + $0x84] sm:$0x1]  ;;  %v671_v0 = vrot.slane %v669_v47, 7  ;;  %v976_v1 = vshrl.u32 %v871_v48, 16 }
  0xf0   : > { %971 = vst [vmem:[#allocation2 + $0x80] sm:$0xf] %v970_v45  ;;  %v973_v49 = vsel %vm4603_vm4, %v965_v33, %v972_v46  ;;  %v1276_v50 = vld [vmem:[#allocation2 + $0xd0] sm:$0xf]  ;;  %v1036_v3 = vld [vmem:[#allocation2 + $0xd8] sm:$0x1]  ;;  %v1468_v45 = vpop.f32.mrf.mxu3 }
  0xf1   : > { %974 = vst [vmem:[#allocation2 + $0x84] sm:$0x1] %v973_v49  ;;  %v1277_v54 = vsel %vm4705_vm8, %v1271_v38, %v1276_v50  ;;  %v730_v8 = vsel %vm4603_vm4, 0, %v729_v58  ;;  %v1283_v9 = vshrl.u32 %v1178_v59, 16  ;;  %v760_v11 = vsel %vm4611_vm6, 0, %v759_v61 }
  0xf2   : > { %1278 = vst [vmem:[#allocation2 + $0xd0] sm:$0xf] %v1277_v54  ;;  %v1279_v60 = vld [vmem:[#allocation2 + $0xd4] sm:$0x1]  ;;  %v1066_v12 = vld [vmem:[#allocation2 + $0xdc] sm:$0x1]  ;;  %v674_v13 = vor.u32 %v672_v57, %v671_v0 }
  0xf3   : > { %v1280_v62 = vsel %vm4603_vm4, %v1272_v28, %v1279_v60  ;;  %v1583_v63 = vld [vmem:[#allocation2 + $0x120] sm:$0xf]  ;;  %419 = vst [vmem:[#allocation2 + $0x38] sm:$0x1] %v418_v44  ;;  %v978_v14 = vrot.slane %v976_v1, 7  ;;  %v979_v15 = vshll.u32 %v871_v48, 16  ;;  %v1162_v44 = vadd.f32 %v4684_v21, %v1161_v30 }
  0xf4   : > { %1281 = vst [vmem:[#allocation2 + $0xd4] sm:$0x1] %v1280_v62  ;;  %v1584_v2 = vsel %vm4705_vm8, %v1578_v51, %v1583_v63  ;;  %v1037_v16 = vsel %vm4603_vm4, 0, %v1036_v3  ;;  %v1067_v18 = vsel %vm4611_vm6, 0, %v1066_v12  ;;  %v1343_v19 = vld [vmem:[#allocation2 + $0x128] sm:$0x1] }
  0xf5   : > { %1585 = vst [vmem:[#allocation2 + $0x120] sm:$0xf] %v1584_v2  ;;  %v1586_v7 = vld [vmem:[#allocation2 + $0x124] sm:$0x1]  ;;  %v1590_v4 = vshrl.u32 %v1485_v5, 16  ;;  %v675_v20 = vrot.slane %v671_v0, 4  ;;  %v981_v37 = vor.u32 %v979_v15, %v978_v14 }
  0xf6   : > { %v1587_v10 = vsel %vm4603_vm4, %v1579_v56, %v1586_v7  ;;  %451 = vst [vmem:[#allocation2 + $0x3c] sm:$0x1] %v450_v52  ;;  %v1285_v22 = vrot.slane %v1283_v9, 7  ;;  %v1344_v23 = vsel %vm4603_vm4, 0, %v1343_v19  ;;  %v1373_v25 = vld [vmem:[#allocation2 + $0x12c] sm:$0x1] }
  0xf7   : > { %1588 = vst [vmem:[#allocation2 + $0x124] sm:$0x1] %v1587_v10  ;;  %v4372_v26 = vld [vmem:[%s6611_s2] ss:$0 sm:$0xff]  ;;  %v1286_v33 = vshll.u32 %v1178_v59, 16  ;;  %v1374_v34 = vsel %vm4611_vm6, 0, %v1373_v25 }
  0xf8   : > { %731 = vst [vmem:[#allocation2 + $0x88] sm:$0x1] %v730_v8  ;;  %v546_v27 = vadd.f32 %v4372_v26, %v545_v17  ;;  %v4373_v35 = vld [vmem:[%s6611_s2] ss:$0 sm:$0xff]  ;;  %v1592_v38 = vrot.slane %v1590_v4, 7  ;;  %v1593_v39 = vshll.u32 %v1485_v5, 16 }
  0xf9   : > { %761 = vst [vmem:[#allocation2 + $0x8c] sm:$0x1] %v760_v11  ;;  %v855_v36 = vadd.f32 %v4373_v35, %v854_v6  ;;  %v420_v40 = vld [vmem:[#allocation2 + $0x40] sm:$0x1]  ;;  %v982_v42 = vrot.slane %v978_v14, 4  ;;  %v1288_v28 = vor.u32 %v1286_v33, %v1285_v22  ;;  %v1289_v50 = vrot.slane %v1285_v22, 4 }
  0xfa   : > { %v679_v24 = vld [vmem:[#allocation2 + $0x38] sm:$0xf]  ;;  %1038 = vst [vmem:[#allocation2 + $0xd8] sm:$0x1] %v1037_v16  ;;  %v421_v43 = vsel %vm4603_vm4, 0, %v420_v40  ;;  %v555_v48 = vmax.f32 %v546_v27, 0.0  ;;  %v1595_v54 = vor.u32 %v1593_v39, %v1592_v38 }
  0xfb   : > { %v680_v31 = vsel %vm4705_vm8, %v674_v13, %v679_v24  ;;  %1068 = vst [vmem:[#allocation2 + $0xdc] sm:$0x1] %v1067_v18  ;;  %v452_v47 = vld [vmem:[#allocation2 + $0x44] sm:$0x1]  ;;  %v864_v51 = vmax.f32 %v855_v36, 0.0  ;;  %v1596_v61 = vrot.slane %v1592_v38, 4 }
  0xfc   : > { %681 = vst [vmem:[#allocation2 + $0x38] sm:$0xf] %v680_v31  ;;  %v563_v56 = vpack.c.bf16 %v555_v48, %v555_v48  ;;  %v732_v21 = vld [vmem:[#allocation2 + $0x90] sm:$0x1]  ;;  %v4374_v57 = vld [vmem:[%s6611_s2] ss:$0 sm:$0xff] }
  0xfd   : > { %v682_v41 = vld [vmem:[#allocation2 + $0x3c] sm:$0x1]  ;;  %1345 = vst [vmem:[#allocation2 + $0x128] sm:$0x1] %v1344_v23  ;;  %v1469_v58 = vadd.f32 %v4374_v57, %v1468_v45  ;;  %v872_v62 = vpack.c.bf16 %v864_v51, %v864_v51  ;;  %v1171_v63 = vmax.f32 %v1162_v44, 0.0  ;;  %v453_v2 = vsel %vm4611_vm6, 0, %v452_v47 }
  0xfe   : > { %v683_v46 = vsel %vm4603_vm4, %v675_v20, %v682_v41  ;;  %1375 = vst [vmem:[#allocation2 + $0x12c] sm:$0x1] %v1374_v34  ;;  %v686_v3 = vshrl.u32 %v563_v56, 16  ;;  %v689_v7 = vshll.u32 %v563_v56, 16  ;;  %v762_v8 = vld [vmem:[#allocation2 + $0x94] sm:$0x1] }
  0xff   : > { %684 = vst [vmem:[#allocation2 + $0x3c] sm:$0x1] %v683_v46  ;;  %v986_v49 = vld [vmem:[#allocation2 + $0x88] sm:$0xf]  ;;  %v993_v9 = vshrl.u32 %v872_v62, 16  ;;  %v4925_v10 = vpack.c.bf16 %v1171_v63, %v1171_v63  ;;  %v1478_v13 = vmax.f32 %v1469_v58, 0.0 }
 0x100   : > { %v987_v52 = vsel %vm4705_vm8, %v981_v37, %v986_v49  ;;  %v989_v53 = vld [vmem:[#allocation2 + $0x8c] sm:$0x1]  ;;  %422 = vst [vmem:[#allocation2 + $0x40] sm:$0x1] %v421_v43  ;;  %v688_v12 = vrot.slane %v686_v3, 7  ;;  %v733_v16 = vsel %vm4603_vm4, 0, %v732_v21 }
 0x101   : > { %988 = vst [vmem:[#allocation2 + $0x88] sm:$0xf] %v987_v52  ;;  %v990_v59 = vsel %vm4603_vm4, %v982_v42, %v989_v53  ;;  %v1293_v60 = vld [vmem:[#allocation2 + $0xd8] sm:$0xf]  ;;  %v1624_v17 = vld [vmem:[#allocation2 + $0x8] sm:$0xf]  ;;  %v4950_v31 = vpack.c.bf16 %v1478_v13, %v1478_v13 }
 0x102   : > { %991 = vst [vmem:[#allocation2 + $0x8c] sm:$0x1] %v990_v59  ;;  %v1294_v0 = vsel %vm4705_vm8, %v1288_v28, %v1293_v60  ;;  %v1296_v1 = vld [vmem:[#allocation2 + $0xdc] sm:$0x1]  ;;  %v691_v19 = vor.u32 %v689_v7, %v688_v12  ;;  %v4936_v4 = vld [vmem:[%s6612_s3] ss:$0 sm:$0xff]  ;;  %v4952_v33 = vunpack.c.l.bf16 %v1624_v17 }
 0x103   : > { %1295 = vst [vmem:[#allocation2 + $0xd8] sm:$0xf] %v1294_v0  ;;  %v1297_v5 = vsel %vm4603_vm4, %v1289_v50, %v1296_v1  ;;  %v1893_v6 = vld [vmem:[#allocation2 + $0xc] sm:$0x1]  ;;  %v763_v22 = vsel %vm4611_vm6, 0, %v762_v8  ;;  %v1300_v23 = vshrl.u32 %v4925_v10, 16 }
 0x104   : > { %1298 = vst [vmem:[#allocation2 + $0xdc] sm:$0x1] %v1297_v5  ;;  %v1600_v11 = vld [vmem:[#allocation2 + $0x128] sm:$0xf]  ;;  %v4948_v26 = vrot.slane %v993_v9, 7  ;;  %v996_v27 = vshll.u32 %v872_v62, 16  ;;  %v4963_v46 = vunpack.c.l.bf16 %v1893_v6  ;;  %v4970_v52 = vmul.f32 %v4936_v4, %v4952_v33 }
 0x105   : > { %v1601_v14 = vsel %vm4705_vm8, %v1595_v54, %v1600_v11  ;;  %v1603_v15 = vld [vmem:[#allocation2 + $0x12c] sm:$0x1]  ;;  %454 = vst [vmem:[#allocation2 + $0x44] sm:$0x1] %v453_v2  ;;  %v4944_v24 = vld [vmem:[%s6612_s3 + $0xa] ss:$0 sm:$0xff] }
 0x106   : > { %1602 = vst [vmem:[#allocation2 + $0x128] sm:$0xf] %v1601_v14  ;;  %v1604_v18 = vsel %vm4603_vm4, %v1596_v61, %v1603_v15  ;;  %v1039_v30 = vld [vmem:[#allocation2 + $0xe0] sm:$0x1]  ;;  %v692_v34 = vrot.slane %v688_v12, 4  ;;  %v1607_v41 = vshrl.u32 %v4950_v31, 16  ;;  %v998_v50 = vor.u32 %v996_v27, %v4948_v26 }
 0x107   : > { %1605 = vst [vmem:[#allocation2 + $0x12c] sm:$0x1] %v1604_v18  ;;  %v696_v20 = vld [vmem:[#allocation2 + $0x40] sm:$0xf]  ;;  %v1040_v35 = vsel %vm4603_vm4, 0, %v1039_v30  ;;  %v4959_v43 = vrot.slane %v1300_v23, 7  ;;  %v4982_v59 = vmul.f32 %v4944_v24, %v4952_v33 }
 0x108   : > { %v697_v25 = vsel %vm4705_vm8, %v691_v19, %v696_v20  ;;  %734 = vst [vmem:[#allocation2 + $0x90] sm:$0x1] %v733_v16  ;;  %v1069_v36 = vld [vmem:[#allocation2 + $0xe4] sm:$0x1]  ;;  %v1750_v37 = vld [vmem:[#allocation2 + $0x58] sm:$0xf] }
 0x109   : > { %698 = vst [vmem:[#allocation2 + $0x40] sm:$0xf] %v697_v25  ;;  %v1644_v38 = vld [vmem:[#allocation2 + $0xa8] sm:$0xf]  ;;  %v1070_v39 = vsel %vm4611_vm6, 0, %v1069_v36  ;;  %v1303_v21 = vshll.u32 %v4925_v10, 16  ;;  %v4985_v0 = vunpack.c.l.bf16 %v1750_v37 }
 0x10a   : > { %764 = vst [vmem:[#allocation2 + $0x94] sm:$0x1] %v763_v22  ;;  %v1346_v40 = vld [vmem:[#allocation2 + $0x130] sm:$0x1]  ;;  %v1770_v42 = vld [vmem:[#allocation2 + $0xf8] sm:$0xf]  ;;  %v4987_v1 = vunpack.c.l.bf16 %v1644_v38 }
 0x10b   : > { %1041 = vst [vmem:[#allocation2 + $0xe0] sm:$0x1] %v1040_v35  ;;  %v1347_v44 = vsel %vm4603_vm4, 0, %v1346_v40  ;;  %v1376_v45 = vld [vmem:[#allocation2 + $0x134] sm:$0x1]  ;;  %v4975_v57 = vrot.slane %v1607_v41, 7  ;;  %v1305_v8 = vor.u32 %v1303_v21, %v4959_v43  ;;  %v4991_v10 = vunpack.c.l.bf16 %v1770_v42 }
 0x10c   : > { %6764 = vst [vmem:[#allocation6_spill] sm:$0xff] %v4963_v46  ;;  %v1625_v28 = vld [vmem:[#allocation2 + $0x10] sm:$0xf]  ;;  %v1894_v47 = vld [vmem:[#allocation2 + $0x14] sm:$0x1]  ;;  %v1377_v51 = vsel %vm4611_vm6, 0, %v1376_v45 }
 0x10d   : > { %v1751_v48 = vld [vmem:[#allocation2 + $0x60] sm:$0xf]  ;;  %v699_v49 = vld [vmem:[#allocation2 + $0x44] sm:$0x1]  ;;  %1071 = vst [vmem:[#allocation2 + $0xe4] sm:$0x1] %v1070_v39  ;;  %v4998_v18 = vunpack.c.l.bf16 %v1625_v28  ;;  %v5000_v19 = vunpack.c.l.bf16 %v1894_v47 }
 0x10e   : > { %v1645_v53 = vld [vmem:[#allocation2 + $0xb0] sm:$0xf]  ;;  %v1771_v54 = vld [vmem:[#allocation2 + $0x100] sm:$0xf]  ;;  %v700_v56 = vsel %vm4603_vm4, %v692_v34, %v699_v49  ;;  %1348 = vst [vmem:[#allocation2 + $0x130] sm:$0x1] %v1347_v44  ;;  %v5002_v6 = vunpack.c.l.bf16 %v1751_v48 }
 0x10f   : > { %v3232_v58 = vld [vmem:[%s6614_s5 + $0x20] sm:$0xf]  ;;  %v1626_v60 = vld [vmem:[#allocation2 + $0x18] sm:$0xf]  ;;  %v1895_v61 = vld [vmem:[#allocation2 + $0x1c] sm:$0x1]  ;;  %v5005_v30 = vunpack.c.l.bf16 %v1645_v53 }
 0x110   : > { %701 = vst [vmem:[#allocation2 + $0x44] sm:$0x1] %v700_v56  ;;  %v999_v62 = vrot.slane %v4948_v26, 4  ;;  %v3251_v63 = vunpack.c.l.b16 %v3232_v58  ;;  %v1752_v2 = vld [vmem:[#allocation2 + $0x68] sm:$0xf]  ;;  %v1610_v9 = vshll.u32 %v4950_v31, 16  ;;  %v5007_v31 = vunpack.c.l.bf16 %v1771_v54 }
 0x111   : > { %6765 = vst [vmem:[#allocation7_spill] sm:$0xff] %v4985_v0  ;;  %v1646_v3 = vld [vmem:[#allocation2 + $0xb8] sm:$0xf]  ;;  %v1772_v5 = vld [vmem:[#allocation2 + $0x108] sm:$0xf]  ;;  %v1306_v15 = vrot.slane %v4959_v43, 4  ;;  %v5014_v40 = vunpack.c.l.bf16 %v1626_v60  ;;  %v5016_v41 = vunpack.c.l.bf16 %v1895_v61  ;;  %v5024_v47 = vunpack.c.l.bf16 %v1752_v2 }
 0x112   : > { %6766 = vst [vmem:[#allocation8_spill] sm:$0xff] %v4987_v1  ;;  %v1003_v7 = vld [vmem:[#allocation2 + $0x90] sm:$0xf]  ;;  %v1627_v11 = vld [vmem:[#allocation2 + $0x20] sm:$0xf]  ;;  %v3256_v16 = vpack.c.b16 %v3251_v63, %v3251_v63  ;;  %v6624_v17 = vmov 0   ;;  %v1612_v27 = vor.u32 %v1610_v9, %v4975_v57  ;;  %v5026_v48 = vunpack.c.l.bf16 %v1646_v3 }
 0x113   : > { %1378 = vst [vmem:[#allocation2 + $0x134] sm:$0x1] %v1377_v51  ;;  %v1896_v12 = vld [vmem:[#allocation2 + $0x24] sm:$0x1]  ;;  %v1753_v13 = vld [vmem:[#allocation2 + $0x70] sm:$0xf]  ;;  %v1004_v14 = vsel %vm4705_vm8, %v998_v50, %v1003_v7  ;;  %v5028_v49 = vunpack.c.l.bf16 %v1772_v5  ;;  %v5032_v54 = vunpack.c.l.bf16 %v1627_v11 }
 0x114   : > { %6767 = vst [vmem:[#allocation9_spill] sm:$0xff] %v4991_v10  ;;  %v1647_v20 = vld [vmem:[#allocation2 + $0xc0] sm:$0xf]  ;;  %v1773_v22 = vld [vmem:[#allocation2 + $0x110] sm:$0xf]  ;;  %v3265_v39 = vsel %vm515_vm0, %v3256_v16, 0  ;;  %v5034_v56 = vunpack.c.l.bf16 %v1896_v12  ;;  %v5036_v21 = vunpack.c.l.bf16 %v1753_v13 }
 0x115   : > { %387 = vst.msk [vmem:[#allocation2] sm:$0xf] %vm386_vm7, %v6624_v17  ;;  %v1628_v23 = vld [vmem:[#allocation2 + $0x28] sm:$0xf]  ;;  %v1897_v25 = vld [vmem:[#allocation2 + $0x2c] sm:$0x1]  ;;  %3270 = vmatpush.bf16.msrb.mxu0 %v3265_v39  ;;  %v5040_v61 = vunpack.c.l.bf16 %v1647_v20 }
 0x116   : > { %6768 = vst [vmem:[#allocation10_spill] sm:$0xff] %v5000_v19  ;;  %v1006_v26 = vld [vmem:[#allocation2 + $0x94] sm:$0x1]  ;;  %v1754_v34 = vld [vmem:[#allocation2 + $0x78] sm:$0xf]  ;;  %v1613_v45 = vrot.slane %v4975_v57, 4  ;;  %v5044_v63 = vunpack.c.l.bf16 %v1628_v23  ;;  %v5046_v2 = vunpack.c.l.bf16 %v1897_v25 }
 0x117   : > { %6769 = vst [vmem:[#allocation11_spill] sm:$0xff] %v5002_v6  ;;  %v1648_v35 = vld [vmem:[#allocation2 + $0xc8] sm:$0xf]  ;;  %v1629_v36 = vld [vmem:[#allocation2 + $0x30] sm:$0xf]  ;;  %v1007_v37 = vsel %vm4603_vm4, %v999_v62, %v1006_v26  ;;  %v4254_v28 = vld [vmem:[%s6614_s5 + $0x18] sm:$0xff]  ;;  %v5042_v62 = vunpack.c.l.bf16 %v1773_v22  ;;  %v5048_v7 = vunpack.c.l.bf16 %v1754_v34  ;;  %v1668_v34 = vmul.f32 %v4936_v4, %v5014_v40 }
 0x118   : > { %1005 = vst [vmem:[#allocation2 + $0x90] sm:$0xf] %v1004_v14  ;;  %v1310_v38 = vld [vmem:[#allocation2 + $0xe0] sm:$0xf]  ;;  %v1898_v42 = vld [vmem:[#allocation2 + $0x34] sm:$0x1]  ;;  %v5052_v9 = vunpack.c.l.bf16 %v1629_v36  ;;  %v1670_v39 = vmul.f32 %v4936_v4, %v5044_v63 }
 0x119   : > { %6770 = vst [vmem:[#allocation12_spill] sm:$0xff] %v5005_v30  ;;  %v1311_v43 = vsel %vm4705_vm8, %v1305_v8, %v1310_v38  ;;  %v1313_v44 = vld [vmem:[#allocation2 + $0xe4] sm:$0x1]  ;;  %v1755_v50 = vld [vmem:[#allocation2 + $0x80] sm:$0xf]  ;;  %v5050_v8 = vunpack.c.l.bf16 %v1648_v35  ;;  %3271 = vmatpush.bf16.msrb.mxu0 %v4254_v28  ;;  %v4253_v11 = vld [vmem:[%s6614_s5 + $0x10] sm:$0xff]  ;;  %v5061_v13 = vunpack.c.l.bf16 %v1898_v42  ;;  %v1669_v38 = vmul.f32 %v4936_v4, %v5032_v54 }
 0x11a   : > { %6771 = vst [vmem:[#allocation13_spill] sm:$0xff] %v5007_v31  ;;  %v1314_v51 = vsel %vm4603_vm4, %v1306_v15, %v1313_v44  ;;  %v1617_v53 = vld [vmem:[#allocation2 + $0x130] sm:$0xf]  ;;  %v1630_v58 = vld [vmem:[#allocation2 + $0x38] sm:$0xf]  ;;  %v5063_v14 = vunpack.c.l.bf16 %v1755_v50  ;;  %v4252_v42 = vld [vmem:[%s6614_s5 + $0x8] sm:$0xff] }
 0x11b   : > { %389 = vst.msk [vmem:[#allocation2 + $0x4] sm:$0x1] %vm388_vm2, %v6624_v17  ;;  %v1649_v57 = vld [vmem:[#allocation2 + $0xd0] sm:$0xf]  ;;  %v1618_v60 = vsel %vm4705_vm8, %v1612_v27, %v1617_v53  ;;  %v1899_v3 = vld [vmem:[#allocation2 + $0x3c] sm:$0x1]  ;;  %v5074_v22 = vunpack.c.l.bf16 %v1630_v58  ;;  %v1667_v27 = vmul.f32 %v4936_v4, %v4998_v18 }
 0x11c   : > { %6772 = vst [vmem:[#allocation14_spill] sm:$0xff] %v5016_v41  ;;  %v1620_v5 = vld [vmem:[#allocation2 + $0x134] sm:$0x1]  ;;  %v396_v12 = vld [vmem:[#allocation2] sm:$0x1]  ;;  %v5065_v15 = vunpack.c.l.bf16 %v1649_v57  ;;  %v5076_v23 = vunpack.c.l.bf16 %v1899_v3  ;;  %v1692_v3 = vmul.f32 %v4944_v24, %v4998_v18 }
 0x11d   : > { %1008 = vst [vmem:[#allocation2 + $0x94] sm:$0x1] %v1007_v37  ;;  %v1621_v55 = vsel %vm4603_vm4, %v1613_v45, %v1620_v5  ;;  %v397_v16 = vsel %vm4603_vm4, 0, %v396_v12  ;;  %v5072_v20 = vld [vmem:[%s6612_s3 + $0x5] ss:$0 sm:$0xff]  ;;  %3272 = vmatpush.bf16.msrb.mxu0 %v4253_v11  ;;  %v1671_v45 = vmul.f32 %v4936_v4, %v5052_v9  ;;  %v1672_v28 = vmul.f32 %v4936_v4, %v5074_v22 }
 0x11e   : > { %6773 = vst [vmem:[#allocation15_spill] sm:$0xff] %v5024_v47  ;;  %v1631_v26 = vld [vmem:[#allocation2 + $0x40] sm:$0xf]  ;;  %v1650_v37 = vld [vmem:[#allocation2 + $0xd8] sm:$0xf]  ;;  %v1679_v50 = vmul.f32 %v5072_v20, %v4987_v1  ;;  %v1680_v53 = vmul.f32 %v5072_v20, %v5005_v30  ;;  %v1681_v57 = vmul.f32 %v5072_v20, %v5026_v48  ;;  %v5114_v58 = vmul.f32 %v5072_v20, %v5040_v61 }
 0x11f   : > { %6774 = vst [vmem:[#allocation16_spill] sm:$0xff] %v5026_v48  ;;  %v5086_v36 = vunpack.c.l.bf16 %v1631_v26  ;;  %v5097_v44 = vunpack.c.l.bf16 %v1650_v37  ;;  %v1693_v5 = vmul.f32 %v4944_v24, %v5014_v40  ;;  %v1695_v12 = vmul.f32 %v4944_v24, %v5044_v63 }
 0x120   : > { %6775 = vst [vmem:[#allocation17_spill] sm:$0xff] %v5028_v49 }
 0x121   : > { %1312 = vst [vmem:[#allocation2 + $0xe0] sm:$0xf] %v1311_v43  ;;  %v1698_v26 = vmul.f32 %v4944_v24, %v5086_v36  ;;  %3273 = vmatpush.bf16.msrb.mxu0 %v4252_v42  ;;  %v4339_v42 = vld [vmem:[%s6612_s3 + $0xf] ss:$0 sm:$0xff] }
 0x122   : > { %6776 = vst [vmem:[#allocation18_spill] sm:$0xff] %v5034_v56  ;;  %v428_v25 = vld [vmem:[#allocation2 + $0x4] sm:$0x1]  ;;  %v5163_v56 = vadd.f32 %v1695_v12, %v1669_v38  ;;  %v1757_v12 = vld [vmem:[#allocation2 + $0x90] sm:$0xf] }
 0x123   : > { %6777 = vst [vmem:[#allocation19_spill] sm:$0xff] %v5036_v21  ;;  %v429_v35 = vsel %vm4611_vm6, 0, %v428_v25  ;;  %v1697_v25 = vmul.f32 %v4944_v24, %v5074_v22  ;;  %v5178_v38 = vadd.f32 %v1698_v26, %v1672_v28  ;;  %v1717_v28 = vmul.f32 %v4339_v42, %v5065_v15 }
 0x124   : > { %1315 = vst [vmem:[#allocation2 + $0xe4] sm:$0x1] %v1314_v51  ;;  %v5147_v51 = vmul.f32 %v5072_v20, %v5065_v15 }
 0x125   : > { %6778 = vst [vmem:[#allocation20_spill] sm:$0xff] %v5040_v61  ;;  %v5173_v46 = vadd.f32 %v1697_v25, %v1671_v45  ;;  %v1718_v25 = vmul.f32 %v4339_v42, %v5097_v44 }
 0x126   : > { %6779 = vst [vmem:[#allocation21_spill] sm:$0xff] %v5042_v62 }
 0x127   : > { %6780 = vst [vmem:[#allocation22_spill] sm:$0xff] %v5044_v63 }
 0x128   : > { %6781 = vst [vmem:[#allocation23_spill] sm:$0xff] %v5046_v2  ;;  %v5095_v43 = vld [vmem:[#allocation2 + $0xe0] sm:$0xf]  ;;  %v5159_v2 = vadd.f32 %v1693_v5, %v1667_v27  ;;  %v1714_v27 = vmul.f32 %v4339_v42, %v5026_v48  ;;  %v1716_v5 = vmul.f32 %v4339_v42, %v5050_v8 }
 0x129   : > { %1619 = vst [vmem:[#allocation2 + $0x130] sm:$0xf] %v1618_v60  ;;  %v5120_v60 = vmul.f32 %v5072_v20, %v5050_v8 }
 0x12a   : > { %6782 = vst [vmem:[#allocation24_spill] sm:$0xff] %v5048_v7  ;;  %v5207_v48 = vadd.f32 %v1714_v27, %v1680_v53 }
 0x12b   : > { %6783 = vst [vmem:[#allocation25_spill] sm:$0xff] %v5050_v8 }
 0x12c   : > { %6784 = vst [vmem:[#allocation26_spill] sm:$0xff] %v5052_v9 }
 0x12d   : > { %391 = vst.msk [vmem:[#allocation2 + $0x48] sm:$0xf] %vm386_vm7, %v6624_v17 }
 0x12e   : > { %6785 = vst [vmem:[#allocation27_spill] sm:$0xff] %v5061_v13  ;;  %v1756_v13 = vld [vmem:[#allocation2 + $0x88] sm:$0xf] }
 0x12f   : > { %6786 = vst [vmem:[#allocation28_spill] sm:$0xff] %v5063_v14  ;;  %v5185_v45 = vunpack.c.l.bf16 %v1756_v13 }
 0x130   : > { %6787 = vst [vmem:[#allocation29_spill] sm:$0xff] %v5065_v15 }
 0x131   : > { %1622 = vst [vmem:[#allocation2 + $0x134] sm:$0x1] %v1621_v55  ;;  %v1694_v55 = vmul.f32 %v4944_v24, %v5032_v54 }
 0x132   : > { %6788 = vst [vmem:[#allocation30_spill] sm:$0xff] %v5074_v22 }
 0x133   : > { %6789 = vst [vmem:[#allocation31_spill] sm:$0xff] %v5076_v23  ;;  %v5151_v23 = vmul.f32 %v5072_v20, %v5097_v44 }
 0x134   : > { %392 = vst.msk [vmem:[#allocation2 + $0x4c] sm:$0x1] %vm388_vm2, %v6624_v17  ;;  %v423_v11 = vld [vmem:[#allocation2 + $0x48] sm:$0x1] }
 0x135   : > { %398 = vst [vmem:[#allocation2] sm:$0x1] %v397_v16  ;;  %v1696_v16 = vmul.f32 %v4944_v24, %v5052_v9  ;;  %v424_v37 = vsel %vm4603_vm4, 0, %v423_v11  ;;  %v5154_v24 = vadd.f32 %v1692_v3, %v4970_v52  ;;  %v6793_v52 = vmov 0  }
 0x136   : > { %6790 = vst [vmem:[#allocation32_spill] sm:$0xff] %v5086_v36 }
 0x137   : > { %430 = vst [vmem:[#allocation2 + $0x4] sm:$0x1] %v429_v35  ;;  %v4251_v35 = vld [vmem:[%s6614_s5] sm:$0xff]  ;;  %v5165_v41 = vadd.f32 %v1696_v16, %v1670_v39  ;;  %v1715_v39 = vmul.f32 %v4339_v42, %v5040_v61 }
 0x138   : > { %6791 = vst [vmem:[#allocation33_spill] sm:$0xff] %v5095_v43  ;;  %3274 = vmatpush.bf16.msrb.mxu0 %v4251_v35  ;;  %v6795_v35 = vunpack.c.l.bf16 %v5095_v43 }
 0x139   : > { %6792 = vst [vmem:[#allocation34_spill] sm:$0xff] %v5097_v44 }
 0x13a   : > { %703 = vst.msk [vmem:[#allocation2 + $0x50] sm:$0xf] %vm386_vm7, %v6624_v17  ;;  %v1719_v8 = vmul.f32 %v4339_v42, %v6795_v35  ;;  %v1725_v35 = vadd.f32 %v1717_v28, %v5120_v60  ;;  %v4341_v60 = vld [vmem:[%s6612_s3 + $0x1] ss:$0 sm:$0xff] }
 0x13b   : > { %704 = vst.msk [vmem:[#allocation2 + $0x54] sm:$0x1] %vm388_vm2, %v6624_v17  ;;  %v455_v11 = vld [vmem:[#allocation2 + $0x4c] sm:$0x1] }
 0x13c   : > { %706 = vst.msk [vmem:[#allocation2 + $0x98] sm:$0xf] %vm386_vm7, %v6624_v17  ;;  %v456_v19 = vsel %vm4611_vm6, 0, %v455_v11  ;;  %v5171_v3 = vld [vmem:[#allocation2] sm:$0xf] }
 0x13d   : > { %707 = vst.msk [vmem:[#allocation2 + $0x9c] sm:$0x1] %vm388_vm2, %v6624_v17  ;;  %v5161_v17 = vadd.f32 %v1694_v55, %v1668_v34  ;;  %v6644_v34 = vunpack.c.l.bf16 %v5171_v3  ;;  %v4340_v55 = vld [vmem:[%s6612_s3 + $0x14] ss:$0 sm:$0xff] }
 0x13e   : > { %425 = vst [vmem:[#allocation2 + $0x48] sm:$0x1] %v424_v37  ;;  %v1713_v37 = vmul.f32 %v4339_v42, %v5005_v30  ;;  %v5211_v30 = vunpack.c.l.bf16 %v1757_v12  ;;  %v1734_v27 = vmul.f32 %v4340_v55, %v5014_v40  ;;  %v1775_v12 = vld [vmem:[#allocation2 + $0x120] sm:$0xf] }
 0x13f   : > { %1010 = vst.msk [vmem:[#allocation2 + $0xa0] sm:$0xf] %vm386_vm7, %v6793_v52  ;;  %v1665_v13 = vmul.f32 %v4936_v4, %v6644_v34  ;;  %v5238_v34 = vld [vmem:[#allocation2 + $0x130] sm:$0xf] }
 0x140   : > { %457 = vst [vmem:[#allocation2 + $0x4c] sm:$0x1] %v456_v19  ;;  %v5190_v19 = vmul.f32 %v4339_v42, %v4987_v1  ;;  %v5203_v61 = vadd.f32 %v1713_v37, %v1679_v50  ;;  %v5217_v50 = vadd.f32 %v1716_v5, %v5114_v58  ;;  %v1733_v37 = vmul.f32 %v4340_v55, %v4998_v18 }
 0x141   : > { %6794 = vst [vmem:[#allocation35_spill] sm:$0xff] %v5185_v45  ;;  %v708_v16 = vld [vmem:[#allocation2 + $0x50] sm:$0x1]  ;;  %v1699_v42 = vadd.f32 %v4982_v59, %v1665_v13  ;;  %v1737_v5 = vmul.f32 %v4340_v55, %v5052_v9  ;;  %v1742_v9 = vadd.f32 %v1734_v27, %v5154_v24 }
 0x142   : > { %1011 = vst.msk [vmem:[#allocation2 + $0xa4] sm:$0x1] %vm388_vm2, %v6793_v52  ;;  %v709_v26 = vsel %vm4603_vm4, 0, %v708_v16  ;;  %v738_v11 = vld [vmem:[#allocation2 + $0x54] sm:$0x1]  ;;  %v5209_v16 = vadd.f32 %v1715_v39, %v1681_v57  ;;  %v1735_v39 = vmul.f32 %v4340_v55, %v5032_v54 }
 0x143   : > { %1013 = vst.msk [vmem:[#allocation2 + $0xe8] sm:$0xf] %vm386_vm7, %v6793_v52  ;;  %v735_v15 = vld [vmem:[#allocation2 + $0x98] sm:$0x1]  ;;  %v739_v44 = vsel %vm4611_vm6, 0, %v738_v11 }
 0x144   : > { %710 = vst [vmem:[#allocation2 + $0x50] sm:$0x1] %v709_v26  ;;  %v736_v1 = vsel %vm4603_vm4, 0, %v735_v15  ;;  %v765_v4 = vld [vmem:[#allocation2 + $0x9c] sm:$0x1]  ;;  %v1736_v15 = vmul.f32 %v4340_v55, %v5044_v63  ;;  %v1739_v26 = vmul.f32 %v4340_v55, %v5086_v36  ;;  %v1743_v63 = vadd.f32 %v1735_v39, %v5159_v2 }
 0x145   : > { %6796 = vst [vmem:[#allocation36_spill] sm:$0xff] %v5211_v30  ;;  %v766_v53 = vsel %vm4611_vm6, 0, %v765_v4  ;;  %v5222_v57 = vld [vmem:[#allocation2 + $0x48] sm:$0xf]  ;;  %v1726_v4 = vadd.f32 %v1718_v25, %v5147_v51  ;;  %v1794_v39 = vmul.f32 %v4341_v60, %v5002_v6 }
 0x146   : > { %740 = vst [vmem:[#allocation2 + $0x54] sm:$0x1] %v739_v44  ;;  %v1774_v44 = vld [vmem:[#allocation2 + $0x118] sm:$0xf]  ;;  %v1015_v59 = vld [vmem:[#allocation2 + $0xa0] sm:$0x1]  ;;  %v6799_v43 = vunpack.c.l.bf16 %v5222_v57  ;;  %v1747_v24 = vadd.f32 %v1739_v26, %v5173_v46  ;;  %v1793_v46 = vmul.f32 %v4341_v60, %v4985_v0 }
 0x147   : > { %737 = vst [vmem:[#allocation2 + $0x98] sm:$0x1] %v736_v1  ;;  %v1738_v1 = vmul.f32 %v4340_v55, %v5074_v22  ;;  %v1776_v11 = vld [vmem:[#allocation2 + $0x128] sm:$0xf]  ;;  %v1016_v13 = vsel %vm4603_vm4, 0, %v1015_v59  ;;  %v5242_v22 = vadd.f32 %v1733_v37, %v1699_v42  ;;  %v5261_v25 = vunpack.c.l.bf16 %v1774_v44 }
 0x148   : > { %6797 = vst [vmem:[#allocation37_spill] sm:$0xff] %v5222_v57  ;;  %v1740_v36 = vmul.f32 %v4340_v55, %v6799_v43  ;;  %v1745_v43 = vadd.f32 %v1737_v5, %v5163_v56  ;;  %v5263_v42 = vunpack.c.l.bf16 %v1775_v12  ;;  %v5267_v56 = vunpack.c.l.bf16 %v1776_v11 }
 0x149   : > { %767 = vst [vmem:[#allocation2 + $0x9c] sm:$0x1] %v766_v53  ;;  %v1727_v53 = vadd.f32 %v1719_v8, %v5151_v23  ;;  %v1045_v58 = vld [vmem:[#allocation2 + $0xa4] sm:$0x1]  ;;  %v1744_v23 = vadd.f32 %v1736_v15, %v5161_v17  ;;  %v1746_v55 = vadd.f32 %v1738_v1, %v5165_v41  ;;  %v1795_v15 = vmul.f32 %v4341_v60, %v5024_v47 }
 0x14a   : > { %1014 = vst.msk [vmem:[#allocation2 + $0xec] sm:$0x1] %vm388_vm2, %v6793_v52  ;;  %v1042_v51 = vld [vmem:[#allocation2 + $0xe8] sm:$0x1]  ;;  %v1046_v8 = vsel %vm4611_vm6, 0, %v1045_v58  ;;  %v1748_v37 = vadd.f32 %v1740_v36, %v5178_v38  ;;  %v1796_v44 = vmul.f32 %v4341_v60, %v5036_v21  ;;  %v1797_v12 = vmul.f32 %v4341_v60, %v5048_v7 }
 0x14b   : > { %6798 = vst [vmem:[#allocation38_spill] sm:$0xff] %v5238_v34  ;;  %v1043_v2 = vsel %vm4603_vm4, 0, %v1042_v51  ;;  %v5259_v28 = vld [vmem:[#allocation2 + $0x50] sm:$0xf]  ;;  %v5281_v36 = vld [vmem:[%s6612_s3 + $0x6] ss:$0 sm:$0xff]  ;;  %v1798_v59 = vmul.f32 %v4341_v60, %v5063_v14  ;;  %v1799_v58 = vmul.f32 %v4341_v60, %v5185_v45  ;;  %v1801_v26 = vadd.f32 %v1793_v46, %v5203_v61 }
 0x14c   : > { %1017 = vst [vmem:[#allocation2 + $0xa0] sm:$0x1] %v1016_v13  ;;  %v6655_v17 = vunpack.c.l.bf16 %v5259_v28  ;;  %v1802_v11 = vadd.f32 %v1794_v39, %v5207_v48  ;;  %v1803_v13 = vadd.f32 %v1795_v15, %v5209_v16  ;;  %v1805_v38 = vadd.f32 %v1797_v12, %v1725_v35 }
 0x14d   : > { %1317 = vst.msk [vmem:[#allocation2 + $0xf0] sm:$0xf] %vm386_vm7, %v6793_v52  ;;  %v1806_v41 = vadd.f32 %v1798_v59, %v1726_v4  ;;  %v1814_v61 = vmul.f32 %v5281_v36, %v4991_v10  ;;  %v1815_v48 = vmul.f32 %v5281_v36, %v5007_v31  ;;  %v1816_v46 = vmul.f32 %v5281_v36, %v5028_v49  ;;  %v4343_v4 = vld [vmem:[%s6612_s3 + $0xb] ss:$0 sm:$0xff] }
 0x14e   : > { %1047 = vst [vmem:[#allocation2 + $0xa4] sm:$0x1] %v1046_v8  ;;  %v5272_v27 = vld [vmem:[#allocation2 + $0x98] sm:$0xf]  ;;  %v1792_v1 = vmul.f32 %v4341_v60, %v6655_v17  ;;  %v1807_v60 = vadd.f32 %v1799_v58, %v1727_v53  ;;  %v1818_v35 = vmul.f32 %v5281_v36, %v5261_v25  ;;  %v1819_v39 = vmul.f32 %v5281_v36, %v5263_v42 }
 0x14f   : > { %6800 = vst [vmem:[#allocation39_spill] sm:$0xff] %v5259_v28  ;;  %v1820_v15 = vmul.f32 %v5281_v36, %v5267_v56  ;;  %v1823_v59 = vadd.f32 %v1815_v48, %v1743_v63  ;;  %v1824_v58 = vadd.f32 %v1816_v46, %v1744_v23  ;;  %v1834_v23 = vmul.f32 %v4343_v4, %v4985_v0 }
 0x150   : > { %6801 = vst [vmem:[#allocation40_spill] sm:$0xff] %v5261_v25  ;;  %v1827_v57 = vadd.f32 %v1819_v39, %v1747_v24  ;;  %v1839_v29 = vmul.f32 %v4343_v4, %v5063_v14  ;;  %v1840_v48 = vmul.f32 %v4343_v4, %v5185_v45  ;;  %v1841_v46 = vmul.f32 %v4343_v4, %v5211_v30 }
 0x151   : > { %6802 = vst [vmem:[#allocation41_spill] sm:$0xff] %v5263_v42  ;;  %v1072_v5 = vld [vmem:[#allocation2 + $0xec] sm:$0x1] }
 0x152   : > { %1044 = vst [vmem:[#allocation2 + $0xe8] sm:$0x1] %v1043_v2  ;;  %v1073_v51 = vsel %vm4611_vm6, 0, %v1072_v5  ;;  %v1804_v2 = vadd.f32 %v1796_v44, %v5217_v50  ;;  %v1817_v50 = vmul.f32 %v5281_v36, %v5042_v62  ;;  %v1822_v44 = vadd.f32 %v1814_v61, %v1742_v9 }
 0x153   : > { %6803 = vst [vmem:[#allocation42_spill] sm:$0xff] %v5267_v56  ;;  %v5298_v8 = vld [vmem:[#allocation2 + $0xa0] sm:$0xf]  ;;  %v1838_v61 = vmul.f32 %v4343_v4, %v5048_v7  ;;  %v1847_v32 = vadd.f32 %v1839_v29, %v1805_v38 }
 0x154   : > { %1318 = vst.msk [vmem:[#allocation2 + $0xf4] sm:$0x1] %vm388_vm2, %v6793_v52  ;;  %v6657_v28 = vunpack.c.l.bf16 %v5298_v8  ;;  %v1825_v5 = vadd.f32 %v1817_v50, %v1745_v43  ;;  %v1835_v43 = vmul.f32 %v4343_v4, %v5002_v6 }
 0x155   : > { %6804 = vst [vmem:[#allocation43_spill] sm:$0xff] %v5272_v27 }
 0x156   : > { %1320 = vst.msk [vmem:[#allocation2 + $0x138] sm:$0xf] %vm386_vm7, %v6793_v52  ;;  %v1678_v53 = vmul.f32 %v5072_v20, %v6657_v28  ;;  %v1828_v20 = vadd.f32 %v1820_v15, %v1748_v37  ;;  %v4344_v28 = vld [vmem:[%s6612_s3 + $0x10] ss:$0 sm:$0xff]  ;;  %v1837_v37 = vmul.f32 %v4343_v4, %v5036_v21  ;;  %v1843_v50 = vadd.f32 %v1835_v43, %v1801_v26  ;;  %v4345_v26 = vld [vmem:[%s6612_s3 + $0x15] ss:$0 sm:$0xff] }
 0x157   : > { %1321 = vst.msk [vmem:[#allocation2 + $0x13c] sm:$0x1] %vm388_vm2, %v6793_v52  ;;  %v1322_v52 = vld [vmem:[#allocation2 + $0xf0] sm:$0x1]  ;;  %v1846_v15 = vadd.f32 %v1838_v61, %v1804_v2  ;;  %v1860_v38 = vmul.f32 %v4344_v28, %v5263_v42  ;;  %v1877_v61 = vmul.f32 %v4345_v26, %v5024_v47  ;;  %v1876_v29 = vmul.f32 %v4345_v26, %v5002_v6  ;;  %v1918_v42 = vld [vmem:[#allocation2 + $0xd4] sm:$0x1] }
 0x158   : > { %1074 = vst [vmem:[#allocation2 + $0xec] sm:$0x1] %v1073_v51  ;;  %v1323_v16 = vsel %vm4603_vm4, 0, %v1322_v52  ;;  %v1826_v51 = vadd.f32 %v1818_v35, %v1746_v55  ;;  %v1720_v17 = vadd.f32 %v5190_v19, %v1678_v53  ;;  %v1836_v55 = vmul.f32 %v4343_v4, %v5024_v47 }
 0x159   : > { %1324 = vst [vmem:[#allocation2 + $0xf0] sm:$0x1] %v1323_v16  ;;  %v1845_v39 = vadd.f32 %v1837_v37, %v1803_v13  ;;  %v1858_v4 = vmul.f32 %v4344_v28, %v5042_v62  ;;  %v6806_v13 = vunpack.c.l.bf16 %v5238_v34  ;;  %v6828_v62 = vld [vmem:[#allocation27_spill] sm:$0xff] }
 0x15a   : > { %v1800_v24 = vadd.f32 %v1792_v1, %v1720_v17  ;;  %v1844_v53 = vadd.f32 %v1836_v55, %v1802_v11  ;;  %v1848_v17 = vadd.f32 %v1840_v48, %v1806_v41  ;;  %v1849_v1 = vadd.f32 %v1841_v46, %v1807_v60  ;;  %v1900_v46 = vld [vmem:[#allocation2 + $0x44] sm:$0x1] }
 0x15b   : > { %v1352_v12 = vld [vmem:[#allocation2 + $0xf4] sm:$0x1]  ;;  %v1859_v11 = vmul.f32 %v4344_v28, %v5261_v25  ;;  %v1861_v41 = vmul.f32 %v4344_v28, %v5267_v56  ;;  %v1862_v2 = vmul.f32 %v4344_v28, %v6806_v13  ;;  %v5364_v55 = vadd.f32 %v1858_v4, %v1824_v58  ;;  %v1915_v13 = vld [vmem:[#allocation2 + $0xbc] sm:$0x1] }
 0x15c   : > { %v1353_v16 = vsel %vm4611_vm6, 0, %v1352_v12  ;;  %v1842_v35 = vadd.f32 %v1834_v23, %v1800_v24  ;;  %v5368_v24 = vadd.f32 %v1860_v38, %v1826_v51  ;;  %v1880_v51 = vmul.f32 %v4345_v26, %v5063_v14  ;;  %v1919_v25 = vld [vmem:[#allocation2 + $0xdc] sm:$0x1]  ;;  %v5444_v14 = vld [vmem:[#allocation2 + $0xe4] sm:$0x1] }
 0x15d   : > { %v1349_v52 = vld [vmem:[#allocation2 + $0x138] sm:$0x1]  ;;  %1354 = vst [vmem:[#allocation2 + $0xf4] sm:$0x1] %v1353_v16  ;;  %v5370_v37 = vadd.f32 %v1861_v41, %v1827_v57  ;;  %v5379_v58 = vadd.f32 %v1862_v2, %v1828_v20  ;;  %v6808_v57 = vunpack.c.l.bf16 %v5272_v27  ;;  %v1882_v4 = vmul.f32 %v4345_v26, %v5211_v30  ;;  %v5394_v20 = vld [vmem:[#allocation2 + $0xa4] sm:$0x1] }
 0x15e   : > { %v1350_v9 = vsel %vm4603_vm4, 0, %v1349_v52  ;;  %v1379_v63 = vld [vmem:[#allocation2 + $0x13c] sm:$0x1]  ;;  %v1855_v52 = vmul.f32 %v4344_v28, %v4991_v10  ;;  %v5392_v38 = vadd.f32 %v1877_v61, %v1843_v50  ;;  %6810 = vst [vmem:[#allocation47_spill] sm:$0xff] %v5394_v20  ;;  %v1914_v41 = vld [vmem:[#allocation2 + $0xb4] sm:$0x1] }
 0x15f   : > { %1351 = vst [vmem:[#allocation2 + $0x138] sm:$0x1] %v1350_v9  ;;  %v1380_v19 = vsel %vm4611_vm6, 0, %v1379_v63  ;;  %v1856_v9 = vmul.f32 %v4344_v28, %v5007_v31  ;;  %v1857_v63 = vmul.f32 %v4344_v28, %v5028_v49  ;;  %v1883_v48 = vmul.f32 %v4345_v26, %v6808_v57  ;;  %v6824_v27 = vld [vmem:[#allocation18_spill] sm:$0xff] }
 0x160   : > { %1381 = vst [vmem:[#allocation2 + $0x13c] sm:$0x1] %v1380_v19  ;;  %v5342_v12 = vld [vmem:[#allocation2 + $0xf0] sm:$0xf]  ;;  %v5366_v19 = vadd.f32 %v1859_v11, %v1825_v5  ;;  %v1878_v5 = vmul.f32 %v4345_v26, %v5036_v21  ;;  %v5390_v11 = vadd.f32 %v1876_v29, %v1842_v35  ;;  %v5400_v57 = vadd.f32 %v1880_v51, %v1846_v15  ;;  %v4346_v35 = vld [vmem:[%s6612_s3 + $0x2] ss:$0 sm:$0xff] }
 0x161   : > { %6805 = vst [vmem:[#allocation44_spill] sm:$0xff] %v5342_v12  ;;  %v6658_v16 = vunpack.c.l.bf16 %v5342_v12  ;;  %v5360_v23 = vadd.f32 %v1856_v9, %v1822_v44  ;;  %v5362_v43 = vadd.f32 %v1857_v63, %v1823_v59  ;;  %v1881_v44 = vmul.f32 %v4345_v26, %v5185_v45  ;;  %v5377_v59 = vld [vmem:[#allocation2 + $0x4] sm:$0x1]  ;;  %v5385_v9 = vld [vmem:[#allocation2 + $0x4c] sm:$0x1] }
 0x162   : > { %6807 = vst [vmem:[#allocation45_spill] sm:$0xff] %v5377_v59  ;;  %v5396_v2 = vadd.f32 %v1878_v5, %v1844_v53  ;;  %v5410_v61 = vadd.f32 %v1883_v48, %v1849_v1  ;;  %v5412_v53 = vunpack.c.l.bf16 %v1900_v46  ;;  %v5420_v5 = vunpack.c.l.bf16 %v1915_v13  ;;  %v6821_v46 = vld [vmem:[#allocation6_spill] sm:$0xff]  ;;  %v6830_v12 = vld [vmem:[#allocation31_spill] sm:$0xff] }
 0x163   : > { %v1813_v60 = vmul.f32 %v5281_v36, %v6658_v16  ;;  %v1879_v36 = vmul.f32 %v4345_v26, %v5048_v7  ;;  %6809 = vst [vmem:[#allocation46_spill] sm:$0xff] %v5385_v9  ;;  %v6662_v16 = vunpack.c.l.bf16 %v5377_v59  ;;  %v5406_v50 = vadd.f32 %v1881_v44, %v1847_v32  ;;  %v6826_v59 = vld [vmem:[#allocation23_spill] sm:$0xff]  ;;  %v6827_v30 = vld [vmem:[#allocation26_spill] sm:$0xff] }
 0x164   : > { %v5408_v26 = vadd.f32 %v1882_v4, %v1848_v17  ;;  %6813 = vst [vmem:[#allocation50_spill] sm:$0xff] %v5410_v61  ;;  %v6820_v17 = vunpack.c.l.bf16 %v5171_v3  ;;  %v1937_v48 = vmul.f32 %v4346_v35, %v4952_v33  ;;  %v1938_v4 = vmul.f32 %v4346_v35, %v6821_v46  ;;  %v6829_v31 = vld [vmem:[#allocation30_spill] sm:$0xff] }
 0x165   : > { %v1821_v28 = vadd.f32 %v1813_v60, %v5242_v22  ;;  %v1913_v22 = vld [vmem:[#allocation2 + $0xac] sm:$0x1]  ;;  %v5398_v60 = vadd.f32 %v1879_v36, %v1845_v39  ;;  %6811 = vst [vmem:[#allocation48_spill] sm:$0xff] %v5406_v50  ;;  %v5418_v36 = vunpack.c.l.bf16 %v1914_v41  ;;  %v1936_v44 = vmul.f32 %v4346_v35, %v6662_v16  ;;  %v6822_v41 = vld [vmem:[#allocation10_spill] sm:$0xff] }
 0x166   : > { %6812 = vst [vmem:[#allocation49_spill] sm:$0xff] %v5408_v26  ;;  %v5416_v29 = vunpack.c.l.bf16 %v1913_v22  ;;  %v1935_v1 = vmul.f32 %v4346_v35, %v6820_v17  ;;  %v1939_v22 = vmul.f32 %v4346_v35, %v4998_v18  ;;  %v1940_v39 = vmul.f32 %v4346_v35, %v6822_v41  ;;  %v6825_v17 = vld [vmem:[#allocation22_spill] sm:$0xff] }
 0x167   : > { %v5387_v63 = vadd.f32 %v1855_v52, %v1821_v28  ;;  %v1916_v52 = vld [vmem:[#allocation2 + $0xc4] sm:$0x1]  ;;  %v1917_v28 = vld [vmem:[#allocation2 + $0xcc] sm:$0x1]  ;;  %6814 = vst [vmem:[#allocation51_spill] sm:$0xff] %v5412_v53  ;;  %v1941_v13 = vmul.f32 %v4346_v35, %v5014_v40  ;;  %v1944_v3 = vmul.f32 %v4346_v35, %v6824_v27  ;;  %v1945_v34 = vmul.f32 %v4346_v35, %v6825_v17 }
 0x168   : > { %6815 = vst [vmem:[#allocation52_spill] sm:$0xff] %v5416_v29  ;;  %v5422_v51 = vunpack.c.l.bf16 %v1916_v52  ;;  %v5424_v32 = vunpack.c.l.bf16 %v1917_v28  ;;  %v6823_v52 = vld [vmem:[#allocation14_spill] sm:$0xff]  ;;  %v1943_v28 = vmul.f32 %v4346_v35, %v5032_v54  ;;  %v1946_v16 = vmul.f32 %v4346_v35, %v6826_v59 }
 0x169   : > { %6816 = vst [vmem:[#allocation53_spill] sm:$0xff] %v5418_v36  ;;  %v1942_v15 = vmul.f32 %v4346_v35, %v6823_v52  ;;  %v1947_v56 = vmul.f32 %v4346_v35, %v6827_v30  ;;  %v1948_v49 = vmul.f32 %v4346_v35, %v6828_v62  ;;  %v1949_v10 = vmul.f32 %v4346_v35, %v6829_v31 }
 0x16a   : > { %6817 = vst [vmem:[#allocation54_spill] sm:$0xff] %v5420_v5  ;;  %v1950_v45 = vmul.f32 %v4346_v35, %v6830_v12  ;;  %v1968_v7 = vrot.slane %v1935_v1, 1  ;;  %v1969_v21 = vrot.slane %v1936_v44, 1  ;;  %v1971_v47 = vrot.slane %v1937_v48, 1 }
 0x16b   : > { %6818 = vst [vmem:[#allocation55_spill] sm:$0xff] %v5422_v51  ;;  %v1972_v6 = vrot.slane %v1938_v4, 1  ;;  %v1974_v0 = vrot.slane %v1939_v22, 1  ;;  %v1975_v9 = vrot.slane %v1940_v39, 1  ;;  %v1977_v61 = vrot.slane %v1941_v13, 1  ;;  %v6840_v13 = vld [vmem:[#allocation25_spill] sm:$0xff] }
 0x16c   : > { %6819 = vst [vmem:[#allocation56_spill] sm:$0xff] %v5424_v32  ;;  %v1978_v26 = vrot.slane %v1942_v15, 1  ;;  %v5446_v50 = vunpack.c.l.bf16 %v1918_v42  ;;  %v5448_v53 = vunpack.c.l.bf16 %v1919_v25  ;;  %v1980_v62 = vrot.slane %v1943_v28, 1  ;;  %v4347_v42 = vld [vmem:[%s6612_s3 + $0x7] ss:$0 sm:$0xff] }
 0x16d   : > { %6831 = vst [vmem:[#allocation57_spill] sm:$0xff] %v5444_v14  ;;  %v1981_v30 = vrot.slane %v1944_v3, 1  ;;  %v1970_v35 = vsel %vm1967_vm9, %v1968_v7, %v1969_v21  ;;  %v1983_v12 = vrot.slane %v1945_v34, 1  ;;  %v1984_v59 = vrot.slane %v1946_v16, 1 }
 0x16e   : > { %6832 = vst [vmem:[#allocation58_spill] sm:$0xff] %v5446_v50  ;;  %v1973_v1 = vsel %vm1967_vm9, %v1971_v47, %v1972_v6  ;;  %v1986_v44 = vrot.slane %v1947_v56, 1  ;;  %v1987_v48 = vrot.slane %v1948_v49, 1  ;;  %v1989_v4 = vrot.slane %v1949_v10, 1 }
 0x16f   : > { %6833 = vst [vmem:[#allocation59_spill] sm:$0xff] %v5448_v53  ;;  %v1976_v25 = vsel %vm1967_vm9, %v1974_v0, %v1975_v9  ;;  %v1979_v39 = vsel %vm1967_vm9, %v1977_v61, %v1978_v26  ;;  %v1982_v15 = vsel %vm1967_vm9, %v1980_v62, %v1981_v30  ;;  %v1990_v22 = vrot.slane %v1950_v45, 1 }
 0x170   : > { %v1985_v21 = vsel %vm1967_vm9, %v1983_v12, %v1984_v59  ;;  %v1988_v7 = vsel %vm1967_vm9, %v1986_v44, %v1987_v48  ;;  %v5462_v6 = vadd.f32 %v1970_v35, %v5387_v63  ;;  %v5465_v10 = vadd.f32 %v1973_v1, %v5360_v23  ;;  %v6836_v12 = vld [vmem:[#allocation8_spill] sm:$0xff]  ;;  %v6841_v35 = vld [vmem:[#allocation29_spill] sm:$0xff]  ;;  %v6842_v48 = vld [vmem:[#allocation34_spill] sm:$0xff] }
 0x171   : > { %v1991_v47 = vsel %vm1967_vm9, %v1989_v4, %v1990_v22  ;;  %v5469_v49 = vadd.f32 %v1976_v25, %v5362_v43  ;;  %v5472_v0 = vadd.f32 %v1979_v39, %v5364_v55  ;;  %v5475_v30 = vadd.f32 %v1982_v15, %v5366_v19  ;;  %v6837_v59 = vld [vmem:[#allocation12_spill] sm:$0xff] }
 0x172   : > { %v6834_v62 = vunpack.c.l.bf16 %v5298_v8  ;;  %v6835_v45 = vunpack.c.l.bf16 %v5394_v20  ;;  %v2015_v16 = vmul.f32 %v4347_v42, %v6836_v12  ;;  %v2016_v23 = vmul.f32 %v4347_v42, %v5416_v29  ;;  %v6838_v63 = vld [vmem:[#allocation16_spill] sm:$0xff] }
 0x173   : > { %v2017_v9 = vmul.f32 %v4347_v42, %v6837_v59  ;;  %v2018_v43 = vmul.f32 %v4347_v42, %v5418_v36  ;;  %v2019_v55 = vmul.f32 %v4347_v42, %v6838_v63  ;;  %v2020_v26 = vmul.f32 %v4347_v42, %v5420_v5  ;;  %v6839_v19 = vld [vmem:[#allocation20_spill] sm:$0xff] }
 0x174   : > { %v2013_v34 = vmul.f32 %v4347_v42, %v6834_v62  ;;  %v2014_v56 = vmul.f32 %v4347_v42, %v6835_v45  ;;  %v2021_v61 = vmul.f32 %v4347_v42, %v6839_v19  ;;  %v2022_v8 = vmul.f32 %v4347_v42, %v5422_v51 }
 0x175   : > { %v2023_v28 = vmul.f32 %v4347_v42, %v6840_v13  ;;  %v2024_v3 = vmul.f32 %v4347_v42, %v5424_v32  ;;  %v2025_v1 = vmul.f32 %v4347_v42, %v6841_v35  ;;  %v2026_v44 = vmul.f32 %v4347_v42, %v5446_v50 }
 0x176   : > { %v2027_v4 = vmul.f32 %v4347_v42, %v6842_v48  ;;  %v2028_v25 = vmul.f32 %v4347_v42, %v5448_v53  ;;  %v2045_v39 = vrot.slane %v2013_v34, 1  ;;  %v2046_v15 = vrot.slane %v2014_v56, 1 }
 0x177   : > { %v2048_v22 = vrot.slane %v2015_v16, 1  ;;  %v2049_v62 = vrot.slane %v2016_v23, 1  ;;  %v2051_v45 = vrot.slane %v2017_v9, 1  ;;  %v2052_v31 = vrot.slane %v2018_v43, 1 }
 0x178   : > { %v2054_v20 = vrot.slane %v2019_v55, 1  ;;  %v2055_v14 = vrot.slane %v2020_v26, 1  ;;  %v5496_v13 = vadd.f32 %v1985_v21, %v5368_v24  ;;  %v5499_v32 = vadd.f32 %v1988_v7, %v5370_v37  ;;  %v4348_v24 = vld [vmem:[%s6612_s3 + $0xc] ss:$0 sm:$0xff] }
 0x179   : > { %v2057_v35 = vrot.slane %v2021_v61, 1  ;;  %v2058_v50 = vrot.slane %v2022_v8, 1  ;;  %v5502_v48 = vadd.f32 %v1991_v47, %v5379_v58  ;;  %v2047_v42 = vsel %vm1967_vm9, %v2045_v39, %v2046_v15  ;;  %v6846_v15 = vld [vmem:[#allocation30_spill] sm:$0xff] }
 0x17a   : > { %v2060_v34 = vrot.slane %v2023_v28, 1  ;;  %v2061_v56 = vrot.slane %v2024_v3, 1  ;;  %v2050_v16 = vsel %vm1967_vm9, %v2048_v22, %v2049_v62  ;;  %v2063_v23 = vrot.slane %v2025_v1, 1  ;;  %v6847_v62 = vld [vmem:[#allocation31_spill] sm:$0xff] }
 0x17b   : > { %v2064_v9 = vrot.slane %v2026_v44, 1  ;;  %v2066_v43 = vrot.slane %v2027_v4, 1  ;;  %v2053_v37 = vsel %vm1967_vm9, %v2051_v45, %v2052_v31  ;;  %v2056_v21 = vsel %vm1967_vm9, %v2054_v20, %v2055_v14  ;;  %v6844_v4 = vld [vmem:[#allocation26_spill] sm:$0xff] }
 0x17c   : > { %v2059_v58 = vsel %vm1967_vm9, %v2057_v35, %v2058_v50  ;;  %v2067_v7 = vrot.slane %v2028_v25, 1  ;;  %v2062_v47 = vsel %vm1967_vm9, %v2060_v34, %v2061_v56  ;;  %v5515_v26 = vadd.f32 %v2047_v42, %v5390_v11  ;;  %v6845_v25 = vld [vmem:[#allocation27_spill] sm:$0xff]  ;;  %v6848_v42 = vld [vmem:[#allocation32_spill] sm:$0xff] }
 0x17d   : > { %v2065_v55 = vsel %vm1967_vm9, %v2063_v23, %v2064_v9  ;;  %v5518_v61 = vadd.f32 %v2050_v16, %v5392_v38  ;;  %v5522_v28 = vadd.f32 %v2053_v37, %v5396_v2  ;;  %v5525_v31 = vadd.f32 %v2056_v21, %v5398_v60  ;;  %v6849_v56 = vld [vmem:[#allocation51_spill] sm:$0xff] }
 0x17e   : > { %v2068_v8 = vsel %vm1967_vm9, %v2066_v43, %v2067_v7  ;;  %v5528_v14 = vadd.f32 %v2059_v58, %v5400_v57  ;;  %v2090_v20 = vmul.f32 %v4348_v24, %v4952_v33  ;;  %v2091_v50 = vmul.f32 %v4348_v24, %v6821_v46  ;;  %v6843_v57 = vld [vmem:[#allocation23_spill] sm:$0xff] }
 0x17f   : > { %v2092_v11 = vmul.f32 %v4348_v24, %v4998_v18  ;;  %v2093_v38 = vmul.f32 %v4348_v24, %v6822_v41  ;;  %v2094_v3 = vmul.f32 %v4348_v24, %v5014_v40  ;;  %v2095_v35 = vmul.f32 %v4348_v24, %v6823_v52 }
 0x180   : > { %v2096_v2 = vmul.f32 %v4348_v24, %v5032_v54  ;;  %v2097_v60 = vmul.f32 %v4348_v24, %v6824_v27  ;;  %v2098_v1 = vmul.f32 %v4348_v24, %v6825_v17  ;;  %v2099_v44 = vmul.f32 %v4348_v24, %v6843_v57  ;;  %v6850_v57 = vld [vmem:[#allocation48_spill] sm:$0xff]  ;;  %v6852_v27 = vld [vmem:[#allocation50_spill] sm:$0xff] }
 0x181   : > { %v2100_v33 = vmul.f32 %v4348_v24, %v6844_v4  ;;  %v2101_v39 = vmul.f32 %v4348_v24, %v6845_v25  ;;  %v2102_v22 = vmul.f32 %v4348_v24, %v6846_v15  ;;  %v2103_v45 = vmul.f32 %v4348_v24, %v6847_v62  ;;  %v6851_v25 = vld [vmem:[#allocation49_spill] sm:$0xff] }
 0x182   : > { %v2104_v34 = vmul.f32 %v4348_v24, %v6848_v42  ;;  %v2105_v16 = vmul.f32 %v4348_v24, %v6849_v56  ;;  %v2122_v23 = vrot.slane %v2090_v20, 1  ;;  %v2123_v9 = vrot.slane %v2091_v50, 1 }
 0x183   : > { %v2125_v43 = vrot.slane %v2092_v11, 1  ;;  %v2126_v37 = vrot.slane %v2093_v38, 1  ;;  %v2128_v21 = vrot.slane %v2094_v3, 1  ;;  %v2129_v58 = vrot.slane %v2095_v35, 1 }
 0x184   : > { %v2131_v7 = vrot.slane %v2096_v2, 1  ;;  %v2132_v46 = vrot.slane %v2097_v60, 1  ;;  %v5547_v4 = vadd.f32 %v2062_v47, %v6850_v57  ;;  %v5550_v17 = vadd.f32 %v2065_v55, %v6851_v25  ;;  %v4349_v47 = vld [vmem:[%s6612_s3 + $0x11] ss:$0 sm:$0xff] }
 0x185   : > { %v2134_v15 = vrot.slane %v2098_v1, 1  ;;  %v2135_v62 = vrot.slane %v2099_v44, 1  ;;  %v5553_v42 = vadd.f32 %v2068_v8, %v6852_v27  ;;  %v2124_v24 = vsel %vm1967_vm9, %v2122_v23, %v2123_v9  ;;  %v6855_v9 = vld [vmem:[#allocation29_spill] sm:$0xff] }
 0x186   : > { %v2137_v20 = vrot.slane %v2100_v33, 1  ;;  %v2138_v50 = vrot.slane %v2101_v39, 1  ;;  %v2127_v11 = vsel %vm1967_vm9, %v2125_v43, %v2126_v37  ;;  %v2140_v38 = vrot.slane %v2102_v22, 1  ;;  %v6856_v43 = vld [vmem:[#allocation58_spill] sm:$0xff] }
 0x187   : > { %v2141_v3 = vrot.slane %v2103_v45, 1  ;;  %v2143_v35 = vrot.slane %v2104_v34, 1  ;;  %v2130_v55 = vsel %vm1967_vm9, %v2128_v21, %v2129_v58  ;;  %v2133_v2 = vsel %vm1967_vm9, %v2131_v7, %v2132_v46  ;;  %v6853_v34 = vld [vmem:[#allocation25_spill] sm:$0xff]  ;;  %v6857_v21 = vld [vmem:[#allocation34_spill] sm:$0xff] }
 0x188   : > { %v2136_v27 = vsel %vm1967_vm9, %v2134_v15, %v2135_v62  ;;  %v2144_v8 = vrot.slane %v2105_v16, 1  ;;  %v2139_v60 = vsel %vm1967_vm9, %v2137_v20, %v2138_v50  ;;  %v5566_v57 = vadd.f32 %v2124_v24, %v5462_v6  ;;  %v6858_v7 = vld [vmem:[#allocation33_spill] sm:$0xff] }
 0x189   : > { %v2142_v1 = vsel %vm1967_vm9, %v2140_v38, %v2141_v3  ;;  %v5569_v44 = vadd.f32 %v2127_v11, %v5465_v10  ;;  %v5573_v25 = vadd.f32 %v2130_v55, %v5469_v49  ;;  %v5576_v46 = vadd.f32 %v2133_v2, %v5472_v0  ;;  %v6860_v20 = vld [vmem:[#allocation57_spill] sm:$0xff] }
 0x18a   : > { %v2145_v33 = vsel %vm1967_vm9, %v2143_v35, %v2144_v8  ;;  %v5579_v39 = vadd.f32 %v2136_v27, %v5475_v30  ;;  %v2167_v15 = vmul.f32 %v4349_v47, %v6836_v12  ;;  %v2168_v22 = vmul.f32 %v4349_v47, %v5416_v29  ;;  %v6854_v30 = vld [vmem:[#allocation56_spill] sm:$0xff] }
 0x18b   : > { %v2169_v6 = vmul.f32 %v4349_v47, %v6837_v59  ;;  %v2170_v10 = vmul.f32 %v4349_v47, %v5418_v36  ;;  %v2171_v62 = vmul.f32 %v4349_v47, %v6838_v63  ;;  %v2172_v45 = vmul.f32 %v4349_v47, %v5420_v5 }
 0x18c   : > { %v2173_v49 = vmul.f32 %v4349_v47, %v6839_v19  ;;  %v2174_v0 = vmul.f32 %v4349_v47, %v5422_v51  ;;  %v2175_v16 = vmul.f32 %v4349_v47, %v6853_v34  ;;  %v2176_v23 = vmul.f32 %v4349_v47, %v6854_v30  ;;  %v6895_v51 = vld [vmem:[#allocation35_spill] sm:$0xff] }
 0x18d   : > { %v2177_v12 = vmul.f32 %v4349_v47, %v6855_v9  ;;  %v2178_v37 = vmul.f32 %v4349_v47, %v6856_v43  ;;  %v2179_v59 = vmul.f32 %v4349_v47, %v6857_v21  ;;  %v2180_v58 = vmul.f32 %v4349_v47, %v5448_v53  ;;  %v5749_v43 = vld [vmem:[#allocation2 + $0x124] sm:$0x1] }
 0x18e   : > { %v6859_v63 = vunpack.c.l.bf16 %v6858_v7  ;;  %v6861_v50 = vunpack.c.l.bf16 %v6860_v20  ;;  %v2199_v11 = vrot.slane %v2167_v15, 1  ;;  %v2200_v38 = vrot.slane %v2168_v22, 1 }
 0x18f   : > { %v2202_v3 = vrot.slane %v2169_v6, 1  ;;  %v2203_v35 = vrot.slane %v2170_v10, 1  ;;  %v2205_v55 = vrot.slane %v2171_v62, 1  ;;  %v2206_v2 = vrot.slane %v2172_v45, 1 }
 0x190   : > { %v2181_v24 = vmul.f32 %v4349_v47, %v6859_v63  ;;  %v2182_v19 = vmul.f32 %v4349_v47, %v6861_v50  ;;  %v2208_v27 = vrot.slane %v2173_v49, 1  ;;  %v2209_v8 = vrot.slane %v2174_v0, 1 }
 0x191   : > { %v5600_v34 = vadd.f32 %v2139_v60, %v5496_v13  ;;  %v5603_v9 = vadd.f32 %v2142_v1, %v5499_v32  ;;  %v2211_v21 = vrot.slane %v2175_v16, 1  ;;  %v2212_v7 = vrot.slane %v2176_v23, 1  ;;  %v4350_v13 = vld [vmem:[%s6612_s3 + $0x16] ss:$0 sm:$0xff] }
 0x192   : > { %v5606_v63 = vadd.f32 %v2145_v33, %v5502_v48  ;;  %v2201_v47 = vsel %vm1967_vm9, %v2199_v11, %v2200_v38  ;;  %v2214_v15 = vrot.slane %v2177_v12, 1  ;;  %v2215_v22 = vrot.slane %v2178_v37, 1 }
 0x193   : > { %v2204_v6 = vsel %vm1967_vm9, %v2202_v3, %v2203_v35  ;;  %v2217_v10 = vrot.slane %v2179_v59, 1  ;;  %v2218_v62 = vrot.slane %v2180_v58, 1  ;;  %v2220_v45 = vrot.slane %v2181_v24, 1  ;;  %v6864_v3 = vld [vmem:[#allocation23_spill] sm:$0xff]  ;;  %v6865_v35 = vld [vmem:[#allocation26_spill] sm:$0xff] }
 0x194   : > { %v2207_v32 = vsel %vm1967_vm9, %v2205_v55, %v2206_v2  ;;  %v2210_v60 = vsel %vm1967_vm9, %v2208_v27, %v2209_v8  ;;  %v2213_v48 = vsel %vm1967_vm9, %v2211_v21, %v2212_v7  ;;  %v2221_v1 = vrot.slane %v2182_v19, 1  ;;  %v6862_v19 = vld [vmem:[#allocation18_spill] sm:$0xff]  ;;  %v6868_v8 = vld [vmem:[#allocation31_spill] sm:$0xff]  ;;  %v6869_v7 = vld [vmem:[#allocation32_spill] sm:$0xff] }
 0x195   : > { %v2216_v33 = vsel %vm1967_vm9, %v2214_v15, %v2215_v22  ;;  %v2219_v49 = vsel %vm1967_vm9, %v2217_v10, %v2218_v62  ;;  %v5619_v0 = vadd.f32 %v2201_v47, %v5515_v26  ;;  %v5622_v16 = vadd.f32 %v2204_v6, %v5518_v61  ;;  %v6867_v27 = vld [vmem:[#allocation30_spill] sm:$0xff]  ;;  %v6870_v15 = vld [vmem:[#allocation37_spill] sm:$0xff] }
 0x196   : > { %v2222_v23 = vsel %vm1967_vm9, %v2220_v45, %v2221_v1  ;;  %v5626_v12 = vadd.f32 %v2207_v32, %v5522_v28  ;;  %v5629_v37 = vadd.f32 %v2210_v60, %v5525_v31  ;;  %v5632_v59 = vadd.f32 %v2213_v48, %v5528_v14  ;;  %v6863_v28 = vld [vmem:[#allocation22_spill] sm:$0xff]  ;;  %v6866_v14 = vld [vmem:[#allocation27_spill] sm:$0xff] }
 0x197   : > { %v2244_v58 = vmul.f32 %v4350_v13, %v4998_v18  ;;  %v2245_v24 = vmul.f32 %v4350_v13, %v6822_v41  ;;  %v2246_v26 = vmul.f32 %v4350_v13, %v5014_v40  ;;  %v2247_v61 = vmul.f32 %v4350_v13, %v6823_v52  ;;  %v6872_v6 = vld [vmem:[#allocation46_spill] sm:$0xff]  ;;  %6893 = vst [vmem:[#allocation22_spill] sm:$0xff] %v5749_v43 }
 0x198   : > { %v2248_v50 = vmul.f32 %v4350_v13, %v5032_v54  ;;  %v2249_v11 = vmul.f32 %v4350_v13, %v6862_v19  ;;  %v2250_v38 = vmul.f32 %v4350_v13, %v6863_v28  ;;  %v2251_v31 = vmul.f32 %v4350_v13, %v6864_v3 }
 0x199   : > { %v2252_v55 = vmul.f32 %v4350_v13, %v6865_v35  ;;  %v2253_v2 = vmul.f32 %v4350_v13, %v6866_v14  ;;  %v2254_v18 = vmul.f32 %v4350_v13, %v6867_v27  ;;  %v2255_v21 = vmul.f32 %v4350_v13, %v6868_v8  ;;  %v5756_v8 = vld [vmem:[#allocation2 + $0x134] sm:$0x1] }
 0x19a   : > { %v2256_v40 = vmul.f32 %v4350_v13, %v6869_v7  ;;  %v2257_v47 = vmul.f32 %v4350_v13, %v6849_v56  ;;  %v6871_v54 = vunpack.c.l.bf16 %v6870_v15  ;;  %v6873_v10 = vunpack.c.l.bf16 %v6872_v6  ;;  %v6892_v6 = vld [vmem:[#allocation28_spill] sm:$0xff]  ;;  %6896 = vst [vmem:[#allocation30_spill] sm:$0xff] %v5756_v8 }
 0x19b   : > { %v2276_v45 = vrot.slane %v2244_v58, 1  ;;  %v2277_v32 = vrot.slane %v2245_v24, 1  ;;  %v2279_v60 = vrot.slane %v2246_v26, 1  ;;  %v2280_v48 = vrot.slane %v2247_v61, 1 }
 0x19c   : > { %v2258_v22 = vmul.f32 %v4350_v13, %v6871_v54  ;;  %v2259_v62 = vmul.f32 %v4350_v13, %v6873_v10  ;;  %v2282_v1 = vrot.slane %v2248_v50, 1  ;;  %v2283_v28 = vrot.slane %v2249_v11, 1  ;;  %v5676_v10 = vld [vmem:[#allocation2 + $0xfc] sm:$0x1] }
 0x19d   : > { %v2285_v35 = vrot.slane %v2250_v38, 1  ;;  %v2286_v27 = vrot.slane %v2251_v31, 1  ;;  %v5653_v20 = vadd.f32 %v2216_v33, %v5547_v4  ;;  %v5656_v7 = vadd.f32 %v2219_v49, %v5550_v17  ;;  %v5663_v38 = vld [vmem:[#allocation2 + $0x5c] sm:$0x1]  ;;  %v2318_v4 = vld [vmem:[#allocation2 + $0x64] sm:$0x1] }
 0x19e   : > { %v2288_v56 = vrot.slane %v2252_v55, 1  ;;  %v2289_v15 = vrot.slane %v2253_v2, 1  ;;  %v5659_v54 = vadd.f32 %v2222_v23, %v5553_v42  ;;  %v2278_v13 = vsel %vm1967_vm9, %v2276_v45, %v2277_v32  ;;  %v2316_v23 = vld [vmem:[#allocation2 + $0x54] sm:$0x1]  ;;  %v2319_v31 = vld [vmem:[#allocation2 + $0x6c] sm:$0x1] }
 0x19f   : > { %v2291_v58 = vrot.slane %v2254_v18, 1  ;;  %v2292_v24 = vrot.slane %v2255_v21, 1  ;;  %v2281_v26 = vsel %vm1967_vm9, %v2279_v60, %v2280_v48  ;;  %v2294_v61 = vrot.slane %v2256_v40, 1  ;;  %v2320_v40 = vld [vmem:[#allocation2 + $0x74] sm:$0x1] }
 0x1a0   : > { %v2295_v50 = vrot.slane %v2257_v47, 1  ;;  %v2297_v11 = vrot.slane %v2258_v22, 1  ;;  %v2284_v17 = vsel %vm1967_vm9, %v2282_v1, %v2283_v28  ;;  %v2287_v33 = vsel %vm1967_vm9, %v2285_v35, %v2286_v27  ;;  %v2321_v47 = vld [vmem:[#allocation2 + $0x7c] sm:$0x1]  ;;  %v2322_v22 = vld [vmem:[#allocation2 + $0x84] sm:$0x1] }
 0x1a1   : > { %v2290_v49 = vsel %vm1967_vm9, %v2288_v56, %v2289_v15  ;;  %v2298_v42 = vrot.slane %v2259_v62, 1  ;;  %v2293_v55 = vsel %vm1967_vm9, %v2291_v58, %v2292_v24  ;;  %v5671_v18 = vadd.f32 %v2278_v13, %v5566_v57  ;;  %v2323_v57 = vld [vmem:[#allocation2 + $0x8c] sm:$0x1]  ;;  %v5688_v60 = vld [vmem:[#allocation2 + $0x94] sm:$0x1] }
 0x1a2   : > { %v2296_v2 = vsel %vm1967_vm9, %v2294_v61, %v2295_v50  ;;  %v5674_v21 = vadd.f32 %v2281_v26, %v5569_v44  ;;  %v5680_v62 = vadd.f32 %v2284_v17, %v5573_v25  ;;  %v5683_v45 = vadd.f32 %v2287_v33, %v5576_v46  ;;  %6874 = vst [vmem:[#allocation8_spill] sm:$0xff] %v5688_v60  ;;  %v5690_v44 = vld [vmem:[#allocation2 + $0x9c] sm:$0x1]  ;;  %v5701_v46 = vld [vmem:[#allocation2 + $0xf4] sm:$0x1]  ;;  %v6889_v50 = vld [vmem:[#allocation15_spill] sm:$0xff] }
 0x1a3   : > { %v2299_v56 = vsel %vm1967_vm9, %v2297_v11, %v2298_v42  ;;  %v5686_v32 = vadd.f32 %v2290_v49, %v5579_v39  ;;  %6875 = vst [vmem:[#allocation12_spill] sm:$0xff] %v5690_v44  ;;  %v5693_v48 = vadd.f32 %v2293_v55, %v5600_v34  ;;  %v5696_v1 = vadd.f32 %v2296_v2, %v5603_v9  ;;  %v5703_v35 = vld [vmem:[#allocation2 + $0x104] sm:$0x1]  ;;  %v5705_v39 = vld [vmem:[#allocation2 + $0x10c] sm:$0x1] }
 0x1a4   : > { %v5699_v25 = vadd.f32 %v2299_v56, %v5606_v63  ;;  %v2326_v28 = vunpack.c.l.bf16 %v2316_v23  ;;  %6879 = vst [vmem:[#allocation49_spill] sm:$0xff] %v5705_v39  ;;  %v6710_v27 = vunpack.c.l.bf16 %v5663_v38  ;;  %v5708_v15 = vunpack.c.l.bf16 %v2318_v4  ;;  %v5714_v9 = vld [vmem:[#allocation2 + $0x114] sm:$0x1]  ;;  %v5716_v58 = vld [vmem:[#allocation2 + $0x11c] sm:$0x1]  ;;  %v6890_v42 = vld [vmem:[#allocation19_spill] sm:$0xff] }
 0x1a5   : > { %6876 = vst [vmem:[#allocation16_spill] sm:$0xff] %v5693_v48  ;;  %v5710_v13 = vunpack.c.l.bf16 %v2319_v31  ;;  %v5712_v34 = vunpack.c.l.bf16 %v2320_v40  ;;  %v4351_v63 = vld [vmem:[%s6612_s3 + $0x3] ss:$0 sm:$0xff]  ;;  %v5721_v24 = vunpack.c.l.bf16 %v2321_v47  ;;  %v5723_v26 = vunpack.c.l.bf16 %v2322_v22  ;;  %v6885_v31 = vld [vmem:[#allocation39_spill] sm:$0xff] }
 0x1a6   : > { %6877 = vst [vmem:[#allocation20_spill] sm:$0xff] %v5696_v1  ;;  %v5725_v61 = vunpack.c.l.bf16 %v2323_v57  ;;  %v2345_v4 = vunpack.c.l.bf16 %v5701_v46  ;;  %v6886_v55 = vunpack.c.l.bf16 %v6885_v31  ;;  %v2360_v40 = vmul.f32 %v4351_v63, %v2326_v28  ;;  %v6887_v47 = vld [vmem:[#allocation7_spill] sm:$0xff]  ;;  %v6891_v31 = vld [vmem:[#allocation24_spill] sm:$0xff] }
 0x1a7   : > { %6878 = vst [vmem:[#allocation48_spill] sm:$0xff] %v5699_v25  ;;  %v2361_v22 = vmul.f32 %v4351_v63, %v6887_v47  ;;  %v2362_v56 = vmul.f32 %v4351_v63, %v6710_v27  ;;  %v6888_v57 = vld [vmem:[#allocation11_spill] sm:$0xff]  ;;  %v2364_v11 = vmul.f32 %v4351_v63, %v5708_v15  ;;  %v2365_v33 = vmul.f32 %v4351_v63, %v6889_v50 }
 0x1a8   : > { %6880 = vst [vmem:[#allocation50_spill] sm:$0xff] %v5714_v9  ;;  %v2359_v2 = vmul.f32 %v4351_v63, %v6886_v55  ;;  %v2363_v46 = vmul.f32 %v4351_v63, %v6888_v57  ;;  %v2366_v49 = vmul.f32 %v4351_v63, %v5710_v13  ;;  %v2367_v17 = vmul.f32 %v4351_v63, %v6890_v42  ;;  %v5751_v27 = vld [vmem:[#allocation2 + $0x12c] sm:$0x1] }
 0x1a9   : > { %6881 = vst [vmem:[#allocation25_spill] sm:$0xff] %v5716_v58  ;;  %v2368_v23 = vmul.f32 %v4351_v63, %v5712_v34  ;;  %v2369_v55 = vmul.f32 %v4351_v63, %v6891_v31  ;;  %v2370_v28 = vmul.f32 %v4351_v63, %v5721_v24  ;;  %v2371_v53 = vmul.f32 %v4351_v63, %v6892_v6 }
 0x1aa   : > { %6882 = vst [vmem:[#allocation29_spill] sm:$0xff] %v5721_v24  ;;  %v2372_v30 = vmul.f32 %v4351_v63, %v5723_v26  ;;  %v2373_v5 = vmul.f32 %v4351_v63, %v6895_v51  ;;  %v2374_v36 = vmul.f32 %v4351_v63, %v5725_v61  ;;  %v2391_v29 = vrot.slane %v2359_v2, 1 }
 0x1ab   : > { %6883 = vst [vmem:[#allocation34_spill] sm:$0xff] %v5723_v26  ;;  %v2392_v14 = vrot.slane %v2360_v40, 1  ;;  %v2394_v3 = vrot.slane %v2361_v22, 1  ;;  %v2395_v19 = vrot.slane %v2362_v56, 1  ;;  %v2397_v52 = vrot.slane %v2363_v46, 1 }
 0x1ac   : > { %6884 = vst [vmem:[#allocation33_spill] sm:$0xff] %v5725_v61  ;;  %v2398_v41 = vrot.slane %v2364_v11, 1  ;;  %v2400_v44 = vrot.slane %v2365_v33, 1  ;;  %v2401_v25 = vrot.slane %v2366_v49, 1  ;;  %v2403_v1 = vrot.slane %v2367_v17, 1 }
 0x1ad   : > { %6894 = vst [vmem:[#allocation26_spill] sm:$0xff] %v5751_v27  ;;  %v6733_v48 = vunpack.c.l.bf16 %v5749_v43  ;;  %v6735_v60 = vunpack.c.l.bf16 %v5751_v27  ;;  %v2404_v26 = vrot.slane %v2368_v23, 1  ;;  %v2406_v6 = vrot.slane %v2369_v55, 1  ;;  %v4352_v17 = vld [vmem:[%s6612_s3 + $0x8] ss:$0 sm:$0xff]  ;;  %v6903_v55 = vld [vmem:[#allocation17_spill] sm:$0xff] }
 0x1ae   : > { %v2393_v63 = vsel %vm1967_vm9, %v2391_v29, %v2392_v14  ;;  %v2407_v2 = vrot.slane %v2370_v28, 1  ;;  %v2409_v61 = vrot.slane %v2371_v53, 1  ;;  %v2396_v40 = vsel %vm1967_vm9, %v2394_v3, %v2395_v19  ;;  %v6897_v19 = vld [vmem:[#allocation44_spill] sm:$0xff] }
 0x1af   : > { %v2410_v22 = vrot.slane %v2372_v30, 1  ;;  %v2412_v56 = vrot.slane %v2373_v5, 1  ;;  %v2413_v11 = vrot.slane %v2374_v36, 1  ;;  %v2399_v33 = vsel %vm1967_vm9, %v2397_v52, %v2398_v41 }
 0x1b0   : > { %v2402_v49 = vsel %vm1967_vm9, %v2400_v44, %v2401_v25  ;;  %v2405_v23 = vsel %vm1967_vm9, %v2403_v1, %v2404_v26  ;;  %v2408_v46 = vsel %vm1967_vm9, %v2406_v6, %v2407_v2  ;;  %v5772_v53 = vadd.f32 %v2393_v63, %v5619_v0  ;;  %v6899_v0 = vld [vmem:[#allocation9_spill] sm:$0xff] }
 0x1b1   : > { %v2411_v29 = vsel %vm1967_vm9, %v2409_v61, %v2410_v22  ;;  %v5775_v5 = vadd.f32 %v2396_v40, %v5622_v16  ;;  %v5778_v36 = vadd.f32 %v2399_v33, %v5626_v12  ;;  %v2414_v30 = vsel %vm1967_vm9, %v2412_v56, %v2413_v11  ;;  %v6901_v25 = vld [vmem:[#allocation13_spill] sm:$0xff]  ;;  %v6907_v22 = vld [vmem:[#allocation40_spill] sm:$0xff] }
 0x1b2   : > { %v5782_v41 = vadd.f32 %v2402_v49, %v5629_v37  ;;  %v5785_v52 = vadd.f32 %v2405_v23, %v5632_v59  ;;  %v6898_v3 = vunpack.c.l.bf16 %v6897_v19  ;;  %v2437_v6 = vmul.f32 %v4352_v17, %v2345_v4  ;;  %v6905_v63 = vld [vmem:[#allocation21_spill] sm:$0xff] }
 0x1b3   : > { %v2438_v44 = vmul.f32 %v4352_v17, %v6899_v0  ;;  %v6900_v16 = vunpack.c.l.bf16 %v5676_v10  ;;  %v2440_v12 = vmul.f32 %v4352_v17, %v6901_v25  ;;  %v6902_v26 = vunpack.c.l.bf16 %v5703_v35  ;;  %v6909_v49 = vld [vmem:[#allocation41_spill] sm:$0xff] }
 0x1b4   : > { %v2436_v14 = vmul.f32 %v4352_v17, %v6898_v3  ;;  %v2442_v37 = vmul.f32 %v4352_v17, %v6903_v55  ;;  %v6904_v28 = vunpack.c.l.bf16 %v5705_v39  ;;  %v2444_v2 = vmul.f32 %v4352_v17, %v6905_v63  ;;  %v6910_v3 = vld [vmem:[#allocation42_spill] sm:$0xff] }
 0x1b5   : > { %v2439_v1 = vmul.f32 %v4352_v17, %v6900_v16  ;;  %v2441_v61 = vmul.f32 %v4352_v17, %v6902_v26  ;;  %v6906_v40 = vunpack.c.l.bf16 %v5714_v9  ;;  %v2446_v56 = vmul.f32 %v4352_v17, %v6907_v22 }
 0x1b6   : > { %v2443_v59 = vmul.f32 %v4352_v17, %v6904_v28  ;;  %v6908_v11 = vunpack.c.l.bf16 %v5716_v58  ;;  %v2448_v23 = vmul.f32 %v4352_v17, %v6909_v49  ;;  %v2449_v19 = vmul.f32 %v4352_v17, %v6733_v48 }
 0x1b7   : > { %v2445_v4 = vmul.f32 %v4352_v17, %v6906_v40  ;;  %v2450_v16 = vmul.f32 %v4352_v17, %v6910_v3  ;;  %v2451_v26 = vmul.f32 %v4352_v17, %v6735_v60  ;;  %v2468_v28 = vrot.slane %v2436_v14, 1  ;;  %v6919_v60 = vld [vmem:[#allocation16_spill] sm:$0xff] }
 0x1b8   : > { %v2447_v33 = vmul.f32 %v4352_v17, %v6908_v11  ;;  %v2469_v51 = vrot.slane %v2437_v6, 1  ;;  %v2471_v8 = vrot.slane %v2438_v44, 1  ;;  %v2472_v9 = vrot.slane %v2439_v1, 1  ;;  %v4353_v44 = vld [vmem:[%s6612_s3 + $0xd] ss:$0 sm:$0xff] }
 0x1b9   : > { %v2474_v40 = vrot.slane %v2440_v12, 1  ;;  %v2475_v63 = vrot.slane %v2441_v61, 1  ;;  %v2477_v22 = vrot.slane %v2442_v37, 1  ;;  %v2478_v39 = vrot.slane %v2443_v59, 1 }
 0x1ba   : > { %v2480_v58 = vrot.slane %v2444_v2, 1  ;;  %v5811_v11 = vadd.f32 %v2408_v46, %v5653_v20  ;;  %v5814_v43 = vadd.f32 %v2411_v29, %v5656_v7  ;;  %v2481_v48 = vrot.slane %v2445_v4, 1 }
 0x1bb   : > { %v2483_v3 = vrot.slane %v2446_v56, 1  ;;  %v5817_v27 = vadd.f32 %v2414_v30, %v5659_v54  ;;  %v2470_v17 = vsel %vm1967_vm9, %v2468_v28, %v2469_v51  ;;  %v2484_v14 = vrot.slane %v2447_v33, 1 }
 0x1bc   : > { %v2486_v6 = vrot.slane %v2448_v23, 1  ;;  %v2473_v1 = vsel %vm1967_vm9, %v2471_v8, %v2472_v9  ;;  %v2487_v20 = vrot.slane %v2449_v19, 1  ;;  %v2489_v46 = vrot.slane %v2450_v16, 1  ;;  %v6914_v23 = vld [vmem:[#allocation35_spill] sm:$0xff] }
 0x1bd   : > { %v2490_v12 = vrot.slane %v2451_v26, 1  ;;  %v2476_v7 = vsel %vm1967_vm9, %v2474_v40, %v2475_v63  ;;  %v2479_v29 = vsel %vm1967_vm9, %v2477_v22, %v2478_v39  ;;  %v2482_v54 = vsel %vm1967_vm9, %v2480_v58, %v2481_v48  ;;  %v6916_v26 = vld [vmem:[#allocation36_spill] sm:$0xff] }
 0x1be   : > { %v2485_v30 = vsel %vm1967_vm9, %v2483_v3, %v2484_v14  ;;  %v2488_v51 = vsel %vm1967_vm9, %v2486_v6, %v2487_v20  ;;  %v5830_v61 = vadd.f32 %v2470_v17, %v5671_v18  ;;  %v5833_v37 = vadd.f32 %v2473_v1, %v5674_v21  ;;  %v6915_v3 = vld [vmem:[#allocation33_spill] sm:$0xff]  ;;  %v6917_v40 = vld [vmem:[#allocation8_spill] sm:$0xff] }
 0x1bf   : > { %v5836_v8 = vadd.f32 %v2476_v7, %v5680_v62  ;;  %v2491_v9 = vsel %vm1967_vm9, %v2489_v46, %v2490_v12  ;;  %v5840_v59 = vadd.f32 %v2479_v29, %v5683_v45  ;;  %v5843_v48 = vadd.f32 %v2482_v54, %v5686_v32 }
 0x1c0   : > { %v2513_v39 = vmul.f32 %v4353_v44, %v6887_v47  ;;  %v6911_v58 = vunpack.c.l.bf16 %v5663_v38  ;;  %v2515_v63 = vmul.f32 %v4353_v44, %v6888_v57  ;;  %v2516_v21 = vmul.f32 %v4353_v44, %v5708_v15  ;;  %v6912_v47 = vld [vmem:[#allocation28_spill] sm:$0xff]  ;;  %v6913_v38 = vld [vmem:[#allocation34_spill] sm:$0xff] }
 0x1c1   : > { %v2517_v62 = vmul.f32 %v4353_v44, %v6889_v50  ;;  %v2518_v2 = vmul.f32 %v4353_v44, %v5710_v13  ;;  %v2519_v4 = vmul.f32 %v4353_v44, %v6890_v42  ;;  %v2520_v45 = vmul.f32 %v4353_v44, %v5712_v34 }
 0x1c2   : > { %v2514_v18 = vmul.f32 %v4353_v44, %v6911_v58  ;;  %v2521_v32 = vmul.f32 %v4353_v44, %v6891_v31  ;;  %v2522_v22 = vmul.f32 %v4353_v44, %v5721_v24  ;;  %v2523_v56 = vmul.f32 %v4353_v44, %v6912_v47  ;;  %v6921_v24 = vld [vmem:[#allocation48_spill] sm:$0xff] }
 0x1c3   : > { %v2524_v33 = vmul.f32 %v4353_v44, %v6913_v38  ;;  %v2525_v19 = vmul.f32 %v4353_v44, %v6914_v23  ;;  %v2526_v16 = vmul.f32 %v4353_v44, %v6915_v3  ;;  %v2527_v28 = vmul.f32 %v4353_v44, %v6916_v26  ;;  %v6920_v23 = vld [vmem:[#allocation20_spill] sm:$0xff] }
 0x1c4   : > { %v6918_v17 = vunpack.c.l.bf16 %v6917_v40  ;;  %v2545_v6 = vrot.slane %v2513_v39, 1  ;;  %v2546_v1 = vrot.slane %v2514_v18, 1  ;;  %v2548_v20 = vrot.slane %v2515_v63, 1  ;;  %v4354_v63 = vld [vmem:[%s6612_s3 + $0x12] ss:$0 sm:$0xff] }
 0x1c5   : > { %v2549_v46 = vrot.slane %v2516_v21, 1  ;;  %v2551_v12 = vrot.slane %v2517_v62, 1  ;;  %v2552_v7 = vrot.slane %v2518_v2, 1  ;;  %v2554_v29 = vrot.slane %v2519_v4, 1 }
 0x1c6   : > { %v2528_v14 = vmul.f32 %v4353_v44, %v6918_v17  ;;  %v2555_v54 = vrot.slane %v2520_v45, 1  ;;  %v2557_v58 = vrot.slane %v2521_v32, 1  ;;  %v5864_v38 = vadd.f32 %v2485_v30, %v6919_v60 }
 0x1c7   : > { %v5867_v47 = vadd.f32 %v2488_v51, %v6920_v23  ;;  %v2558_v3 = vrot.slane %v2522_v22, 1  ;;  %v2560_v26 = vrot.slane %v2523_v56, 1  ;;  %v5870_v40 = vadd.f32 %v2491_v9, %v6921_v24 }
 0x1c8   : > { %v2547_v44 = vsel %vm1967_vm9, %v2545_v6, %v2546_v1  ;;  %v2561_v39 = vrot.slane %v2524_v33, 1  ;;  %v2563_v18 = vrot.slane %v2525_v19, 1  ;;  %v2550_v21 = vsel %vm1967_vm9, %v2548_v20, %v2549_v46  ;;  %v6927_v1 = vld [vmem:[#allocation50_spill] sm:$0xff]  ;;  %v6929_v46 = vld [vmem:[#allocation40_spill] sm:$0xff] }
 0x1c9   : > { %v2564_v60 = vrot.slane %v2526_v16, 1  ;;  %v2566_v30 = vrot.slane %v2527_v28, 1  ;;  %v2567_v62 = vrot.slane %v2528_v14, 1  ;;  %v2553_v51 = vsel %vm1967_vm9, %v2551_v12, %v2552_v7  ;;  %v6924_v28 = vld [vmem:[#allocation49_spill] sm:$0xff] }
 0x1ca   : > { %v2556_v2 = vsel %vm1967_vm9, %v2554_v29, %v2555_v54  ;;  %v2559_v24 = vsel %vm1967_vm9, %v2557_v58, %v2558_v3  ;;  %v2562_v9 = vsel %vm1967_vm9, %v2560_v26, %v2561_v39  ;;  %v5883_v45 = vadd.f32 %v2547_v44, %v5772_v53  ;;  %v6930_v12 = vld [vmem:[#allocation25_spill] sm:$0xff]  ;;  %v6932_v29 = vld [vmem:[#allocation22_spill] sm:$0xff] }
 0x1cb   : > { %v2565_v4 = vsel %vm1967_vm9, %v2563_v18, %v2564_v60  ;;  %v5886_v32 = vadd.f32 %v2550_v21, %v5775_v5  ;;  %v5889_v22 = vadd.f32 %v2553_v51, %v5778_v36  ;;  %v2568_v56 = vsel %vm1967_vm9, %v2566_v30, %v2567_v62  ;;  %v6934_v58 = vld [vmem:[#allocation42_spill] sm:$0xff] }
 0x1cc   : > { %v5893_v33 = vadd.f32 %v2556_v2, %v5782_v41  ;;  %v5896_v23 = vadd.f32 %v2559_v24, %v5785_v52  ;;  %v2590_v19 = vmul.f32 %v4354_v63, %v6899_v0  ;;  %v6922_v3 = vunpack.c.l.bf16 %v5676_v10  ;;  %v6926_v41 = vld [vmem:[#allocation21_spill] sm:$0xff]  ;;  %v6935_v44 = vld [vmem:[#allocation26_spill] sm:$0xff] }
 0x1cd   : > { %v2592_v16 = vmul.f32 %v4354_v63, %v6901_v25  ;;  %v6923_v5 = vunpack.c.l.bf16 %v5703_v35  ;;  %v2594_v36 = vmul.f32 %v4354_v63, %v6903_v55  ;;  %v6925_v17 = vunpack.c.l.bf16 %v6924_v28  ;;  %v6937_v21 = vld [vmem:[#allocation38_spill] sm:$0xff] }
 0x1ce   : > { %v2591_v53 = vmul.f32 %v4354_v63, %v6922_v3  ;;  %v2596_v6 = vmul.f32 %v4354_v63, %v6926_v41  ;;  %v6928_v52 = vunpack.c.l.bf16 %v6927_v1  ;;  %v2598_v0 = vmul.f32 %v4354_v63, %v6929_v46  ;;  %v6939_v62 = vld [vmem:[#allocation30_spill] sm:$0xff] }
 0x1cf   : > { %v2593_v26 = vmul.f32 %v4354_v63, %v6923_v5  ;;  %v2595_v14 = vmul.f32 %v4354_v63, %v6925_v17  ;;  %v6931_v10 = vunpack.c.l.bf16 %v6930_v12  ;;  %v2600_v25 = vmul.f32 %v4354_v63, %v6909_v49 }
 0x1d0   : > { %v2597_v20 = vmul.f32 %v4354_v63, %v6928_v52  ;;  %v6933_v35 = vunpack.c.l.bf16 %v6932_v29  ;;  %v2602_v55 = vmul.f32 %v4354_v63, %v6934_v58  ;;  %v6936_v39 = vunpack.c.l.bf16 %v6935_v44 }
 0x1d1   : > { %v2599_v7 = vmul.f32 %v4354_v63, %v6931_v10  ;;  %v6938_v60 = vunpack.c.l.bf16 %v6937_v21  ;;  %v6940_v51 = vunpack.c.l.bf16 %v6939_v62  ;;  %v2622_v24 = vrot.slane %v2590_v19, 1  ;;  %v6942_v21 = vld [vmem:[#allocation28_spill] sm:$0xff]  ;;  %v6944_v62 = vld [vmem:[#allocation35_spill] sm:$0xff] }
 0x1d2   : > { %v2601_v54 = vmul.f32 %v4354_v63, %v6933_v35  ;;  %v2603_v18 = vmul.f32 %v4354_v63, %v6936_v39  ;;  %v2623_v3 = vrot.slane %v2591_v53, 1  ;;  %v2625_v5 = vrot.slane %v2592_v16, 1  ;;  %v4355_v16 = vld [vmem:[%s6612_s3 + $0x17] ss:$0 sm:$0xff] }
 0x1d3   : > { %v2604_v30 = vmul.f32 %v4354_v63, %v6938_v60  ;;  %v2605_v2 = vmul.f32 %v4354_v63, %v6940_v51  ;;  %v2626_v28 = vrot.slane %v2593_v26, 1  ;;  %v2628_v17 = vrot.slane %v2594_v36, 1  ;;  %v6945_v51 = vld [vmem:[#allocation33_spill] sm:$0xff] }
 0x1d4   : > { %v2629_v49 = vrot.slane %v2595_v14, 1  ;;  %v2631_v41 = vrot.slane %v2596_v6, 1  ;;  %v2632_v1 = vrot.slane %v2597_v20, 1  ;;  %v2634_v52 = vrot.slane %v2598_v0, 1 }
 0x1d5   : > { %v5924_v46 = vadd.f32 %v2562_v9, %v5811_v11  ;;  %v5927_v12 = vadd.f32 %v2565_v4, %v5814_v43  ;;  %v2635_v10 = vrot.slane %v2599_v7, 1  ;;  %v2637_v29 = vrot.slane %v2600_v25, 1 }
 0x1d6   : > { %v5930_v35 = vadd.f32 %v2568_v56, %v5817_v27  ;;  %v2624_v63 = vsel %vm1967_vm9, %v2622_v24, %v2623_v3  ;;  %v2638_v19 = vrot.slane %v2601_v54, 1  ;;  %v2640_v53 = vrot.slane %v2602_v55, 1  ;;  %v6947_v24 = vld [vmem:[#allocation8_spill] sm:$0xff] }
 0x1d7   : > { %v2627_v26 = vsel %vm1967_vm9, %v2625_v5, %v2626_v28  ;;  %v2641_v11 = vrot.slane %v2603_v18, 1  ;;  %v2643_v9 = vrot.slane %v2604_v30, 1  ;;  %v2644_v36 = vrot.slane %v2605_v2, 1  ;;  %v6941_v18 = vld [vmem:[#allocation29_spill] sm:$0xff]  ;;  %v6946_v2 = vld [vmem:[#allocation36_spill] sm:$0xff] }
 0x1d8   : > { %v2630_v43 = vsel %vm1967_vm9, %v2628_v17, %v2629_v49  ;;  %v2633_v4 = vsel %vm1967_vm9, %v2631_v41, %v2632_v1  ;;  %v2636_v27 = vsel %vm1967_vm9, %v2634_v52, %v2635_v10  ;;  %v2639_v56 = vsel %vm1967_vm9, %v2637_v29, %v2638_v19  ;;  %v6951_v28 = vld [vmem:[#allocation12_spill] sm:$0xff] }
 0x1d9   : > { %v2642_v14 = vsel %vm1967_vm9, %v2640_v53, %v2641_v11  ;;  %v5943_v6 = vadd.f32 %v2624_v63, %v5830_v61  ;;  %v5946_v20 = vadd.f32 %v2627_v26, %v5833_v37  ;;  %v5949_v0 = vadd.f32 %v2630_v43, %v5836_v8 }
 0x1da   : > { %v2645_v7 = vsel %vm1967_vm9, %v2643_v9, %v2644_v36  ;;  %v5953_v25 = vadd.f32 %v2633_v4, %v5840_v59  ;;  %v5956_v54 = vadd.f32 %v2636_v27, %v5843_v48  ;;  %v2667_v58 = vmul.f32 %v4355_v16, %v6888_v57  ;;  %v6943_v48 = vld [vmem:[#allocation34_spill] sm:$0xff] }
 0x1db   : > { %v2668_v55 = vmul.f32 %v4355_v16, %v5708_v15  ;;  %v2669_v61 = vmul.f32 %v4355_v16, %v6889_v50  ;;  %v2670_v37 = vmul.f32 %v4355_v16, %v5710_v13  ;;  %v2671_v44 = vmul.f32 %v4355_v16, %v6890_v42  ;;  %v6949_v42 = vld [vmem:[#allocation43_spill] sm:$0xff] }
 0x1dc   : > { %v2672_v8 = vmul.f32 %v4355_v16, %v5712_v34  ;;  %v2673_v39 = vmul.f32 %v4355_v16, %v6891_v31  ;;  %v2674_v59 = vmul.f32 %v4355_v16, %v6941_v18  ;;  %v2675_v60 = vmul.f32 %v4355_v16, %v6942_v21 }
 0x1dd   : > { %v2676_v30 = vmul.f32 %v4355_v16, %v6943_v48  ;;  %v2677_v57 = vmul.f32 %v4355_v16, %v6944_v62  ;;  %v2678_v15 = vmul.f32 %v4355_v16, %v6945_v51  ;;  %v2679_v50 = vmul.f32 %v4355_v16, %v6946_v2  ;;  %v2744_v48 = vld [vmem:[#allocation2 + $0x28] sm:$0xe]  ;;  %v2746_v62 = vld [vmem:[#allocation2 + $0x38] sm:$0xe]  ;;  %v6014_v2 = vld [vmem:[#allocation2 + $0x40] sm:$0xe] }
 0x1de   : > { %v6948_v13 = vunpack.c.l.bf16 %v6947_v24  ;;  %v6950_v5 = vunpack.c.l.bf16 %v6949_v42  ;;  %v6952_v31 = vunpack.c.l.bf16 %v6951_v28  ;;  %v2699_v49 = vrot.slane %v2667_v58, 1  ;;  %v5987_v58 = vld [vmem:[#allocation2 + $0x8] sm:$0xe]  ;;  %6954 = vst [vmem:[#allocation37_spill] sm:$0xff] %v6014_v2  ;;  %v6041_v28 = vld [vmem:[#allocation2 + $0xc0] sm:$0xe] }
 0x1df   : > { %v2700_v41 = vrot.slane %v2668_v55, 1  ;;  %v2702_v1 = vrot.slane %v2669_v61, 1  ;;  %v2703_v52 = vrot.slane %v2670_v37, 1  ;;  %v2705_v10 = vrot.slane %v2671_v44, 1  ;;  %6959 = vst [vmem:[#allocation19_spill] sm:$0xff] %v6041_v28 }
 0x1e0   : > { %v2680_v3 = vmul.f32 %v4355_v16, %v6948_v13  ;;  %v2681_v34 = vmul.f32 %v4355_v16, %v6950_v5  ;;  %v2682_v17 = vmul.f32 %v4355_v16, %v6952_v31  ;;  %v2706_v29 = vrot.slane %v2672_v8, 1  ;;  %v2742_v8 = vld [vmem:[#allocation2 + $0x18] sm:$0xe]  ;;  %v4356_v31 = vld [vmem:[%s6612_s3 + $0x4] ss:$0 sm:$0xff] }
 0x1e1   : > { %v2708_v63 = vrot.slane %v2673_v39, 1  ;;  %v2709_v19 = vrot.slane %v2674_v59, 1  ;;  %v2711_v53 = vrot.slane %v2675_v60, 1  ;;  %v5978_v26 = vadd.f32 %v2639_v56, %v5864_v38  ;;  %v2741_v56 = vld [vmem:[#allocation2 + $0x10] sm:$0xe] }
 0x1e2   : > { %v5981_v11 = vadd.f32 %v2642_v14, %v5867_v47  ;;  %v2712_v9 = vrot.slane %v2676_v30, 1  ;;  %v2714_v36 = vrot.slane %v2677_v57, 1  ;;  %v5984_v43 = vadd.f32 %v2645_v7, %v5870_v40  ;;  %v2739_v7 = vld [vmem:[#allocation2] sm:$0xe]  ;;  %v2745_v30 = vld [vmem:[#allocation2 + $0x30] sm:$0xe] }
 0x1e3   : > { %v2701_v16 = vsel %vm1967_vm9, %v2699_v49, %v2700_v41  ;;  %v2715_v4 = vrot.slane %v2678_v15, 1  ;;  %v2717_v27 = vrot.slane %v2679_v50, 1  ;;  %v2704_v55 = vsel %vm1967_vm9, %v2702_v1, %v2703_v52  ;;  %v2743_v39 = vld [vmem:[#allocation2 + $0x20] sm:$0xe] }
 0x1e4   : > { %v2718_v61 = vrot.slane %v2680_v3, 1  ;;  %v2720_v37 = vrot.slane %v2681_v34, 1  ;;  %v2721_v38 = vrot.slane %v2682_v17, 1  ;;  %v2707_v47 = vsel %vm1967_vm9, %v2705_v10, %v2706_v29  ;;  %v6029_v3 = vld [vmem:[#allocation2 + $0xb0] sm:$0xe] }
 0x1e5   : > { %v2710_v14 = vsel %vm1967_vm9, %v2708_v63, %v2709_v19  ;;  %v2713_v44 = vsel %vm1967_vm9, %v2711_v53, %v2712_v9  ;;  %v2716_v40 = vsel %vm1967_vm9, %v2714_v36, %v2715_v4  ;;  %v5996_v59 = vadd.f32 %v2701_v16, %v5883_v45  ;;  %v6963_v36 = vld [vmem:[#allocation45_spill] sm:$0xff] }
 0x1e6   : > { %v2722_v18 = vsel %vm1967_vm9, %v2720_v37, %v2721_v38  ;;  %v5999_v21 = vadd.f32 %v2704_v55, %v5886_v32  ;;  %v6002_v60 = vadd.f32 %v2707_v47, %v5889_v22  ;;  %v2719_v57 = vsel %vm1967_vm9, %v2717_v27, %v2718_v61  ;;  %v6016_v32 = vld [vmem:[#allocation2 + $0x48] sm:$0xe]  ;;  %v6018_v22 = vld [vmem:[#allocation2 + $0xa0] sm:$0xe] }
 0x1e7   : > { %v6006_v51 = vadd.f32 %v2710_v14, %v5893_v33  ;;  %v6009_v15 = vadd.f32 %v2713_v44, %v5896_v23  ;;  %v6012_v45 = vadd.f32 %v2716_v40, %v5924_v46  ;;  %6955 = vst [vmem:[#allocation39_spill] sm:$0xff] %v6016_v32  ;;  %v6021_v50 = vadd.f32 %v2719_v57, %v5927_v12  ;;  %v6027_v23 = vld [vmem:[#allocation2 + $0xa8] sm:$0xe]  ;;  %v6031_v46 = vld [vmem:[#allocation2 + $0xb8] sm:$0xe]  ;;  %v6965_v55 = vld [vmem:[#allocation6_spill] sm:$0xff] }
 0x1e8   : > { %v6024_v24 = vadd.f32 %v2722_v18, %v5930_v35  ;;  %v2749_v33 = vunpack.c.l.bf16 %v2739_v7  ;;  %v6737_v13 = vunpack.c.l.bf16 %v5987_v58  ;;  %v6033_v42 = vunpack.c.l.bf16 %v2741_v56  ;;  %v6043_v35 = vld [vmem:[#allocation2 + $0xc8] sm:$0xe]  ;;  %v6966_v38 = vld [vmem:[#allocation10_spill] sm:$0xff] }
 0x1e9   : > { %6953 = vst [vmem:[#allocation32_spill] sm:$0xff] %v6012_v45  ;;  %v6035_v5 = vunpack.c.l.bf16 %v2742_v8  ;;  %v6037_v34 = vunpack.c.l.bf16 %v2743_v39  ;;  %v6039_v12 = vunpack.c.l.bf16 %v2744_v48  ;;  %v6048_v17 = vunpack.c.l.bf16 %v2745_v30  ;;  %v6967_v14 = vld [vmem:[#allocation14_spill] sm:$0xff]  ;;  %v6969_v18 = vld [vmem:[#allocation23_spill] sm:$0xff] }
 0x1ea   : > { %6956 = vst [vmem:[#allocation7_spill] sm:$0xff] %v6021_v50  ;;  %v6050_v49 = vunpack.c.l.bf16 %v2746_v62  ;;  %v2768_v52 = vunpack.c.l.bf16 %v6018_v22  ;;  %v2782_v9 = vmul.f32 %v4356_v31, %v2749_v33  ;;  %v6964_v16 = vunpack.c.l.bf16 %v6963_v36  ;;  %v6968_v7 = vld [vmem:[#allocation18_spill] sm:$0xff]  ;;  %v6970_v62 = vld [vmem:[#allocation27_spill] sm:$0xff]  ;;  %v6075_v22 = vld [vmem:[#allocation2 + $0xd0] sm:$0xe] }
 0x1eb   : > { %6957 = vst [vmem:[#allocation11_spill] sm:$0xff] %v6024_v24  ;;  %v2784_v27 = vmul.f32 %v4356_v31, %v6737_v13  ;;  %v2785_v61 = vmul.f32 %v4356_v31, %v6965_v55  ;;  %v2786_v37 = vmul.f32 %v4356_v31, %v6033_v42  ;;  %v2787_v56 = vmul.f32 %v4356_v31, %v6966_v38  ;;  %v6077_v33 = vld [vmem:[#allocation2 + $0xd8] sm:$0xe]  ;;  %v6081_v13 = vld [vmem:[#allocation2 + $0xe0] sm:$0xe] }
 0x1ec   : > { %6958 = vst [vmem:[#allocation15_spill] sm:$0xff] %v6039_v12  ;;  %v2783_v4 = vmul.f32 %v4356_v31, %v6964_v16  ;;  %v2788_v47 = vmul.f32 %v4356_v31, %v6035_v5  ;;  %v2789_v44 = vmul.f32 %v4356_v31, %v6967_v14  ;;  %v2790_v40 = vmul.f32 %v4356_v31, %v6037_v34  ;;  %v6972_v16 = vld [vmem:[#allocation31_spill] sm:$0xff] }
 0x1ed   : > { %6960 = vst [vmem:[#allocation24_spill] sm:$0xff] %v6043_v35  ;;  %v2791_v8 = vmul.f32 %v4356_v31, %v6968_v7  ;;  %v2792_v39 = vmul.f32 %v4356_v31, %v6039_v12  ;;  %v2793_v48 = vmul.f32 %v4356_v31, %v6969_v18  ;;  %v2794_v30 = vmul.f32 %v4356_v31, %v6048_v17 }
 0x1ee   : > { %6961 = vst [vmem:[#allocation44_spill] sm:$0xff] %v6048_v17  ;;  %v2795_v57 = vmul.f32 %v4356_v31, %v6970_v62  ;;  %v2796_v36 = vmul.f32 %v4356_v31, %v6050_v49  ;;  %v2797_v1 = vmul.f32 %v4356_v31, %v6972_v16  ;;  %v2815_v41 = vrot.slane %v2782_v9, 2 }
 0x1ef   : > { %6962 = vst [vmem:[#allocation9_spill] sm:$0xff] %v6050_v49  ;;  %v2816_v53 = vrot.slane %v2783_v4, 2  ;;  %v2818_v19 = vrot.slane %v2784_v27, 2  ;;  %v2819_v63 = vrot.slane %v2785_v61, 2  ;;  %v2821_v29 = vrot.slane %v2786_v37, 2 }
 0x1f0   : > { %6971 = vst [vmem:[#allocation13_spill] sm:$0xff] %v6077_v33  ;;  %v2822_v10 = vrot.slane %v2787_v56, 2  ;;  %v2824_v32 = vrot.slane %v2788_v47, 2  ;;  %v2825_v24 = vrot.slane %v2789_v44, 2  ;;  %v2827_v50 = vrot.slane %v2790_v40, 2 }
 0x1f1   : > { %6973 = vst [vmem:[#allocation17_spill] sm:$0xff] %v6081_v13  ;;  %v6748_v45 = vunpack.c.l.bf16 %v6075_v22  ;;  %v6750_v2 = vunpack.c.l.bf16 %v6077_v33  ;;  %v2828_v62 = vrot.slane %v2791_v8, 2  ;;  %v2830_v49 = vrot.slane %v2792_v39, 2  ;;  %v4357_v56 = vld [vmem:[%s6612_s3 + $0x9] ss:$0 sm:$0xff] }
 0x1f2   : > { %v2817_v9 = vsel %vm2814_vm10, %v2815_v41, %v2816_v53  ;;  %v2831_v16 = vrot.slane %v2793_v48, 2  ;;  %v2833_v17 = vrot.slane %v2794_v30, 2  ;;  %v2820_v4 = vsel %vm2814_vm10, %v2818_v19, %v2819_v63  ;;  %v6979_v30 = vld [vmem:[#allocation53_spill] sm:$0xff] }
 0x1f3   : > { %v2834_v27 = vrot.slane %v2795_v57, 2  ;;  %v2836_v61 = vrot.slane %v2796_v36, 2  ;;  %v2837_v37 = vrot.slane %v2797_v1, 2  ;;  %v2823_v47 = vsel %vm2814_vm10, %v2821_v29, %v2822_v10  ;;  %v6981_v36 = vld [vmem:[#allocation54_spill] sm:$0xff] }
 0x1f4   : > { %v2826_v44 = vsel %vm2814_vm10, %v2824_v32, %v2825_v24  ;;  %v2829_v40 = vsel %vm2814_vm10, %v2827_v50, %v2828_v62  ;;  %v2832_v8 = vsel %vm2814_vm10, %v2830_v49, %v2831_v16  ;;  %v6097_v53 = vadd.f32 %v2817_v9, %v5943_v6  ;;  %v6974_v24 = vld [vmem:[#allocation47_spill] sm:$0xff] }
 0x1f5   : > { %v2835_v41 = vsel %vm2814_vm10, %v2833_v17, %v2834_v27  ;;  %v6100_v63 = vadd.f32 %v2820_v4, %v5946_v20  ;;  %v6103_v1 = vadd.f32 %v2823_v47, %v5949_v0  ;;  %v2838_v19 = vsel %vm2814_vm10, %v2836_v61, %v2837_v37  ;;  %v6977_v20 = vld [vmem:[#allocation52_spill] sm:$0xff]  ;;  %v6983_v9 = vld [vmem:[#allocation55_spill] sm:$0xff] }
 0x1f6   : > { %v6107_v10 = vadd.f32 %v2826_v44, %v5953_v25  ;;  %v6110_v32 = vadd.f32 %v2829_v40, %v5956_v54  ;;  %v2860_v50 = vmul.f32 %v4357_v56, %v2768_v52  ;;  %v6975_v17 = vunpack.c.l.bf16 %v6974_v24  ;;  %v6985_v37 = vld [vmem:[#allocation56_spill] sm:$0xff]  ;;  %v6986_v40 = vld [vmem:[#allocation58_spill] sm:$0xff] }
 0x1f7   : > { %v6976_v6 = vunpack.c.l.bf16 %v6027_v23  ;;  %v2863_v39 = vmul.f32 %v4357_v56, %v6977_v20  ;;  %v6978_v0 = vunpack.c.l.bf16 %v6029_v3  ;;  %v2865_v62 = vmul.f32 %v4357_v56, %v6979_v30 }
 0x1f8   : > { %v2861_v49 = vmul.f32 %v4357_v56, %v6975_v17  ;;  %v6980_v25 = vunpack.c.l.bf16 %v6031_v46  ;;  %v2867_v54 = vmul.f32 %v4357_v56, %v6981_v36  ;;  %v6982_v52 = vunpack.c.l.bf16 %v6041_v28 }
 0x1f9   : > { %v2862_v29 = vmul.f32 %v4357_v56, %v6976_v6  ;;  %v2864_v48 = vmul.f32 %v4357_v56, %v6978_v0  ;;  %v2869_v4 = vmul.f32 %v4357_v56, %v6983_v9  ;;  %v6984_v27 = vunpack.c.l.bf16 %v6043_v35  ;;  %v6987_v6 = vld [vmem:[#allocation59_spill] sm:$0xff] }
 0x1fa   : > { %v2866_v57 = vmul.f32 %v4357_v56, %v6980_v25  ;;  %v2868_v16 = vmul.f32 %v4357_v56, %v6982_v52  ;;  %v2871_v47 = vmul.f32 %v4357_v56, %v6985_v37  ;;  %v2872_v44 = vmul.f32 %v4357_v56, %v6748_v45 }
 0x1fb   : > { %v2870_v61 = vmul.f32 %v4357_v56, %v6984_v27  ;;  %v2873_v24 = vmul.f32 %v4357_v56, %v6986_v40  ;;  %v2874_v17 = vmul.f32 %v4357_v56, %v6750_v2  ;;  %v2875_v0 = vmul.f32 %v4357_v56, %v6987_v6 }
 0x1fc   : > { %v2892_v25 = vrot.slane %v2860_v50, 2  ;;  %v2893_v31 = vrot.slane %v2861_v49, 2  ;;  %v2895_v52 = vrot.slane %v2862_v29, 2  ;;  %v2896_v13 = vrot.slane %v2863_v39, 2  ;;  %v4358_v29 = vld [vmem:[%s6612_s3 + $0xe] ss:$0 sm:$0xff] }
 0x1fd   : > { %v2898_v9 = vrot.slane %v2864_v48, 2  ;;  %v2899_v28 = vrot.slane %v2865_v62, 2  ;;  %v2901_v35 = vrot.slane %v2866_v57, 2  ;;  %v2902_v27 = vrot.slane %v2867_v54, 2 }
 0x1fe   : > { %v2904_v36 = vrot.slane %v2868_v16, 2  ;;  %v6136_v37 = vadd.f32 %v2832_v8, %v5978_v26  ;;  %v6139_v45 = vadd.f32 %v2835_v41, %v5981_v11  ;;  %v2905_v40 = vrot.slane %v2869_v4, 2 }
 0x1ff   : > { %v2907_v33 = vrot.slane %v2870_v61, 2  ;;  %v6142_v2 = vadd.f32 %v2838_v19, %v5984_v43  ;;  %v2894_v56 = vsel %vm2814_vm10, %v2892_v25, %v2893_v31  ;;  %v2908_v50 = vrot.slane %v2871_v47, 2  ;;  %v6993_v25 = vld [vmem:[#allocation37_spill] sm:$0xff] }
 0x200   : > { %v2910_v49 = vrot.slane %v2872_v44, 2  ;;  %v2897_v39 = vsel %vm2814_vm10, %v2895_v52, %v2896_v13  ;;  %v2911_v26 = vrot.slane %v2873_v24, 2  ;;  %v2913_v8 = vrot.slane %v2874_v17, 2  ;;  %v6990_v44 = vld [vmem:[#allocation27_spill] sm:$0xff] }
 0x201   : > { %v2914_v48 = vrot.slane %v2875_v0, 2  ;;  %v2900_v11 = vsel %vm2814_vm10, %v2898_v9, %v2899_v28  ;;  %v2903_v41 = vsel %vm2814_vm10, %v2901_v35, %v2902_v27  ;;  %v2906_v43 = vsel %vm2814_vm10, %v2904_v36, %v2905_v40  ;;  %v6991_v40 = vld [vmem:[#allocation9_spill] sm:$0xff]  ;;  %v6992_v17 = vld [vmem:[#allocation31_spill] sm:$0xff] }
 0x202   : > { %v2909_v19 = vsel %vm2814_vm10, %v2907_v33, %v2908_v50  ;;  %v2912_v31 = vsel %vm2814_vm10, %v2910_v49, %v2911_v26  ;;  %v6155_v62 = vadd.f32 %v2894_v56, %v5996_v59  ;;  %v6158_v57 = vadd.f32 %v2897_v39, %v5999_v21  ;;  %v6995_v56 = vld [vmem:[#allocation51_spill] sm:$0xff] }
 0x203   : > { %v6161_v13 = vadd.f32 %v2900_v11, %v6002_v60  ;;  %v2915_v54 = vsel %vm2814_vm10, %v2913_v8, %v2914_v48  ;;  %v6165_v28 = vadd.f32 %v2903_v41, %v6006_v51  ;;  %v6168_v35 = vadd.f32 %v2906_v43, %v6009_v15 }
 0x204   : > { %v6988_v33 = vunpack.c.l.bf16 %v5987_v58  ;;  %v2938_v59 = vmul.f32 %v4358_v29, %v6965_v55  ;;  %v2939_v16 = vmul.f32 %v4358_v29, %v6033_v42  ;;  %v2940_v21 = vmul.f32 %v4358_v29, %v6966_v38  ;;  %v6989_v58 = vld [vmem:[#allocation44_spill] sm:$0xff] }
 0x205   : > { %v2941_v60 = vmul.f32 %v4358_v29, %v6035_v5  ;;  %v2942_v9 = vmul.f32 %v4358_v29, %v6967_v14  ;;  %v2943_v4 = vmul.f32 %v4358_v29, %v6037_v34  ;;  %v2944_v51 = vmul.f32 %v4358_v29, %v6968_v7 }
 0x206   : > { %v2937_v36 = vmul.f32 %v4358_v29, %v6988_v33  ;;  %v2945_v15 = vmul.f32 %v4358_v29, %v6039_v12  ;;  %v2946_v61 = vmul.f32 %v4358_v29, %v6969_v18  ;;  %v2947_v47 = vmul.f32 %v4358_v29, %v6989_v58  ;;  %v6996_v58 = vld [vmem:[#allocation32_spill] sm:$0xff] }
 0x207   : > { %v2948_v55 = vmul.f32 %v4358_v29, %v6990_v44  ;;  %v2949_v24 = vmul.f32 %v4358_v29, %v6991_v40  ;;  %v2950_v0 = vmul.f32 %v4358_v29, %v6992_v17  ;;  %v6994_v52 = vunpack.c.l.bf16 %v6993_v25  ;;  %v6997_v40 = vld [vmem:[#allocation7_spill] sm:$0xff] }
 0x208   : > { %v2952_v50 = vmul.f32 %v4358_v29, %v6995_v56  ;;  %v2969_v49 = vrot.slane %v2937_v36, 2  ;;  %v2970_v39 = vrot.slane %v2938_v59, 2  ;;  %v2972_v26 = vrot.slane %v2939_v16, 2  ;;  %v4359_v16 = vld [vmem:[%s6612_s3 + $0x13] ss:$0 sm:$0xff] }
 0x209   : > { %v2951_v27 = vmul.f32 %v4358_v29, %v6994_v52  ;;  %v2973_v8 = vrot.slane %v2940_v21, 2  ;;  %v2975_v48 = vrot.slane %v2941_v60, 2  ;;  %v2976_v11 = vrot.slane %v2942_v9, 2  ;;  %v6998_v52 = vld [vmem:[#allocation11_spill] sm:$0xff] }
 0x20a   : > { %v2978_v41 = vrot.slane %v2943_v4, 2  ;;  %v2979_v43 = vrot.slane %v2944_v51, 2  ;;  %v2981_v33 = vrot.slane %v2945_v15, 2  ;;  %v6189_v44 = vadd.f32 %v2909_v19, %v6996_v58 }
 0x20b   : > { %v6192_v18 = vadd.f32 %v2912_v31, %v6997_v40  ;;  %v2982_v17 = vrot.slane %v2946_v61, 2  ;;  %v2984_v25 = vrot.slane %v2947_v47, 2  ;;  %v6195_v12 = vadd.f32 %v2915_v54, %v6998_v52  ;;  %v7010_v52 = vld [vmem:[#allocation58_spill] sm:$0xff] }
 0x20c   : > { %v2971_v29 = vsel %vm2814_vm10, %v2969_v49, %v2970_v39  ;;  %v2985_v36 = vrot.slane %v2948_v55, 2  ;;  %v2987_v59 = vrot.slane %v2949_v24, 2  ;;  %v2974_v21 = vsel %vm2814_vm10, %v2972_v26, %v2973_v8  ;;  %v7002_v49 = vld [vmem:[#allocation54_spill] sm:$0xff] }
 0x20d   : > { %v2988_v19 = vrot.slane %v2950_v0, 2  ;;  %v2990_v60 = vrot.slane %v2951_v27, 2  ;;  %v2991_v9 = vrot.slane %v2952_v50, 2  ;;  %v2977_v31 = vsel %vm2814_vm10, %v2975_v48, %v2976_v11  ;;  %v7006_v11 = vld [vmem:[#allocation24_spill] sm:$0xff] }
 0x20e   : > { %v2980_v4 = vsel %vm2814_vm10, %v2978_v41, %v2979_v43  ;;  %v2983_v54 = vsel %vm2814_vm10, %v2981_v33, %v2982_v17  ;;  %v2986_v51 = vsel %vm2814_vm10, %v2984_v25, %v2985_v36  ;;  %v6208_v61 = vadd.f32 %v2971_v29, %v6097_v53  ;;  %v7008_v43 = vld [vmem:[#allocation56_spill] sm:$0xff]  ;;  %v7011_v29 = vld [vmem:[#allocation13_spill] sm:$0xff] }
 0x20f   : > { %v2989_v15 = vsel %vm2814_vm10, %v2987_v59, %v2988_v19  ;;  %v6211_v58 = vadd.f32 %v2974_v21, %v6100_v63  ;;  %v6214_v47 = vadd.f32 %v2977_v31, %v6103_v1  ;;  %v2992_v55 = vsel %vm2814_vm10, %v2990_v60, %v2991_v9  ;;  %v7013_v21 = vld [vmem:[#allocation17_spill] sm:$0xff] }
 0x210   : > { %v6218_v40 = vadd.f32 %v2980_v4, %v6107_v10  ;;  %v6221_v24 = vadd.f32 %v2983_v54, %v6110_v32  ;;  %v6999_v17 = vunpack.c.l.bf16 %v6027_v23  ;;  %v3015_v53 = vmul.f32 %v4359_v16, %v6977_v20  ;;  %v7003_v10 = vld [vmem:[#allocation19_spill] sm:$0xff]  ;;  %v7015_v9 = vld [vmem:[#allocation57_spill] sm:$0xff] }
 0x211   : > { %v7000_v25 = vunpack.c.l.bf16 %v6029_v3  ;;  %v3017_v27 = vmul.f32 %v4359_v16, %v6979_v30  ;;  %v7001_v1 = vunpack.c.l.bf16 %v6031_v46  ;;  %v3019_v39 = vmul.f32 %v4359_v16, %v7002_v49  ;;  %v7005_v32 = vld [vmem:[#allocation55_spill] sm:$0xff] }
 0x212   : > { %v3014_v0 = vmul.f32 %v4359_v16, %v6999_v17  ;;  %v7004_v26 = vunpack.c.l.bf16 %v7003_v10  ;;  %v3021_v48 = vmul.f32 %v4359_v16, %v7005_v32  ;;  %v7007_v23 = vunpack.c.l.bf16 %v7006_v11 }
 0x213   : > { %v3016_v63 = vmul.f32 %v4359_v16, %v7000_v25  ;;  %v3018_v50 = vmul.f32 %v4359_v16, %v7001_v1  ;;  %v3023_v20 = vmul.f32 %v4359_v16, %v7008_v43  ;;  %v7009_v3 = vunpack.c.l.bf16 %v6075_v22 }
 0x214   : > { %v3020_v8 = vmul.f32 %v4359_v16, %v7004_v26  ;;  %v3022_v41 = vmul.f32 %v4359_v16, %v7007_v23  ;;  %v3025_v30 = vmul.f32 %v4359_v16, %v7010_v52  ;;  %v7012_v46 = vunpack.c.l.bf16 %v7011_v29 }
 0x215   : > { %v3024_v33 = vmul.f32 %v4359_v16, %v7009_v3  ;;  %v3027_v59 = vmul.f32 %v4359_v16, %v6987_v6  ;;  %v7014_v19 = vunpack.c.l.bf16 %v7013_v21  ;;  %v7016_v31 = vunpack.c.l.bf16 %v7015_v9  ;;  %v7018_v21 = vld [vmem:[#allocation23_spill] sm:$0xff] }
 0x216   : > { %v3026_v36 = vmul.f32 %v4359_v16, %v7012_v46  ;;  %v3046_v54 = vrot.slane %v3014_v0, 2  ;;  %v3047_v17 = vrot.slane %v3015_v53, 2  ;;  %v3049_v25 = vrot.slane %v3016_v63, 2  ;;  %v4360_v63 = vld [vmem:[%s6612_s3 + $0x18] ss:$0 sm:$0xff]  ;;  %v7020_v9 = vld [vmem:[#allocation27_spill] sm:$0xff] }
 0x217   : > { %v3028_v60 = vmul.f32 %v4359_v16, %v7014_v19  ;;  %v3029_v4 = vmul.f32 %v4359_v16, %v7016_v31  ;;  %v3050_v1 = vrot.slane %v3017_v27, 2  ;;  %v3052_v49 = vrot.slane %v3018_v50, 2  ;;  %v7021_v31 = vld [vmem:[#allocation9_spill] sm:$0xff] }
 0x218   : > { %v3053_v22 = vrot.slane %v3019_v39, 2  ;;  %v3055_v10 = vrot.slane %v3020_v8, 2  ;;  %v3056_v26 = vrot.slane %v3021_v48, 2  ;;  %v3058_v32 = vrot.slane %v3022_v41, 2 }
 0x219   : > { %v6249_v11 = vadd.f32 %v2986_v51, %v6136_v37  ;;  %v6252_v6 = vadd.f32 %v2989_v15, %v6139_v45  ;;  %v3059_v23 = vrot.slane %v3023_v20, 2  ;;  %v3061_v43 = vrot.slane %v3024_v33, 2 }
 0x21a   : > { %v6255_v3 = vadd.f32 %v2992_v55, %v6142_v2  ;;  %v3048_v16 = vsel %vm2814_vm10, %v3046_v54, %v3047_v17  ;;  %v3062_v0 = vrot.slane %v3025_v30, 2  ;;  %v3064_v53 = vrot.slane %v3026_v36, 2  ;;  %v7023_v54 = vld [vmem:[#allocation37_spill] sm:$0xff] }
 0x21b   : > { %v3051_v27 = vsel %vm2814_vm10, %v3049_v25, %v3050_v1  ;;  %v3065_v37 = vrot.slane %v3027_v59, 2  ;;  %v3067_v51 = vrot.slane %v3028_v60, 2  ;;  %v3068_v50 = vrot.slane %v3029_v4, 2  ;;  %v7017_v59 = vld [vmem:[#allocation15_spill] sm:$0xff]  ;;  %v7019_v60 = vld [vmem:[#allocation44_spill] sm:$0xff]  ;;  %v7027_v1 = vld [vmem:[#allocation46_spill] sm:$0xff] }
 0x21c   : > { %v3054_v45 = vsel %vm2814_vm10, %v3052_v49, %v3053_v22  ;;  %v3057_v15 = vsel %vm2814_vm10, %v3055_v10, %v3056_v26  ;;  %v3060_v2 = vsel %vm2814_vm10, %v3058_v32, %v3059_v23  ;;  %v3063_v55 = vsel %vm2814_vm10, %v3061_v43, %v3062_v0  ;;  %v7022_v4 = vld [vmem:[#allocation31_spill] sm:$0xff] }
 0x21d   : > { %v3066_v39 = vsel %vm2814_vm10, %v3064_v53, %v3065_v37  ;;  %v3078_v8 = vadd.f32 %v3048_v16, %v6155_v62  ;;  %v3079_v48 = vadd.f32 %v3051_v27, %v6158_v57  ;;  %v3080_v41 = vadd.f32 %v3054_v45, %v6161_v13 }
 0x21e   : > { %v3069_v20 = vsel %vm2814_vm10, %v3067_v51, %v3068_v50  ;;  %v3081_v33 = vadd.f32 %v3057_v15, %v6165_v28  ;;  %v3082_v52 = vadd.f32 %v3060_v2, %v6168_v35  ;;  %v3091_v30 = vmul.f32 %v4360_v63, %v6033_v42 }
 0x21f   : > { %v3092_v29 = vmul.f32 %v4360_v63, %v6966_v38  ;;  %v3093_v46 = vmul.f32 %v4360_v63, %v6035_v5  ;;  %v3094_v36 = vmul.f32 %v4360_v63, %v6967_v14  ;;  %v3095_v62 = vmul.f32 %v4360_v63, %v6037_v34  ;;  %v7025_v34 = vld [vmem:[#allocation39_spill] sm:$0xff] }
 0x220   : > { %v3096_v57 = vmul.f32 %v4360_v63, %v6968_v7  ;;  %v3097_v13 = vmul.f32 %v4360_v63, %v7017_v59  ;;  %v3098_v19 = vmul.f32 %v4360_v63, %v7018_v21  ;;  %v3099_v28 = vmul.f32 %v4360_v63, %v7019_v60  ;;  %v4361_v59 = vld [vmem:[%s6613_s4] ss:$0 sm:$0xff] }
 0x221   : > { %v3100_v35 = vmul.f32 %v4360_v63, %v7020_v9  ;;  %v3101_v42 = vmul.f32 %v4360_v63, %v7021_v31  ;;  %v3102_v38 = vmul.f32 %v4360_v63, %v7022_v4  ;;  %v7024_v5 = vunpack.c.l.bf16 %v7023_v54 }
 0x222   : > { %v3104_v14 = vmul.f32 %v4360_v63, %v6995_v56  ;;  %v7026_v25 = vunpack.c.l.bf16 %v7025_v34  ;;  %v7028_v49 = vunpack.c.l.bf16 %v7027_v1  ;;  %v3123_v10 = vrot.slane %v3091_v30, 2 }
 0x223   : > { %v3103_v17 = vmul.f32 %v4360_v63, %v7024_v5  ;;  %v3124_v26 = vrot.slane %v3092_v29, 2  ;;  %v3126_v32 = vrot.slane %v3093_v46, 2  ;;  %v3127_v23 = vrot.slane %v3094_v36, 2 }
 0x224   : > { %v3105_v7 = vmul.f32 %v4360_v63, %v7026_v25  ;;  %v3106_v22 = vmul.f32 %v4360_v63, %v7028_v49  ;;  %v3129_v43 = vrot.slane %v3095_v62, 2  ;;  %v3130_v16 = vrot.slane %v3096_v57, 2 }
 0x225   : > { %v3132_v0 = vrot.slane %v3097_v13, 2  ;;  %v3133_v53 = vrot.slane %v3098_v19, 2  ;;  %v3135_v27 = vrot.slane %v3099_v28, 2  ;;  %v3083_v37 = vadd.f32 %v3063_v55, %v6189_v44 }
 0x226   : > { %v3125_v51 = vsel %vm2814_vm10, %v3123_v10, %v3124_v26  ;;  %v3136_v56 = vrot.slane %v3100_v35, 2  ;;  %v3138_v50 = vrot.slane %v3101_v42, 2  ;;  %v3128_v45 = vsel %vm2814_vm10, %v3126_v32, %v3127_v23  ;;  %v3284_v23 = vld [vmem:[%s6616_s7 + $0x8] sm:$0xf] }
 0x227   : > { %v3131_v15 = vsel %vm2814_vm10, %v3129_v43, %v3130_v16  ;;  %v3139_v63 = vrot.slane %v3102_v38, 2  ;;  %v3141_v2 = vrot.slane %v3103_v17, 2  ;;  %v3134_v30 = vsel %vm2814_vm10, %v3132_v0, %v3133_v53 }
 0x228   : > { %v3142_v29 = vrot.slane %v3104_v14, 2  ;;  %v3144_v46 = vrot.slane %v3105_v7, 2  ;;  %v3145_v36 = vrot.slane %v3106_v22, 2  ;;  %v3137_v62 = vsel %vm2814_vm10, %v3135_v27, %v3136_v56 }
 0x229   : > { %v3155_v57 = vadd.f32 %v3125_v51, %v6208_v61  ;;  %v3156_v44 = vadd.f32 %v3128_v45, %v6211_v58  ;;  %v3157_v55 = vadd.f32 %v3131_v15, %v6214_v47  ;;  %v3140_v13 = vsel %vm2814_vm10, %v3138_v50, %v3139_v63 }
 0x22a   : > { %v3143_v21 = vsel %vm2814_vm10, %v3141_v2, %v3142_v29  ;;  %v3158_v19 = vadd.f32 %v3134_v30, %v6218_v40  ;;  %v3159_v60 = vadd.f32 %v3137_v62, %v6221_v24  ;;  %v3146_v28 = vsel %vm2814_vm10, %v3144_v46, %v3145_v36  ;;  %v4255_v30 = vld [vmem:[%s6616_s7] sm:$0xff] }
 0x22b   : > { %v3160_v61 = vadd.f32 %v3140_v13, %v6249_v11  ;;  %v3161_v58 = vadd.f32 %v3143_v21, %v6252_v6  ;;  %v3163_v9 = vadd.f32 %v3155_v57, %v3078_v8  ;;  %v3164_v47 = vadd.f32 %v3156_v44, %v3079_v48 }
 0x22c   : > { %v3165_v35 = vadd.f32 %v3157_v55, %v3080_v41  ;;  %v3166_v31 = vadd.f32 %v3158_v19, %v3081_v33  ;;  %v3167_v42 = vadd.f32 %v3159_v60, %v3082_v52  ;;  %v3084_v4 = vadd.f32 %v3066_v39, %v6192_v18 }
 0x22d   : > { %v3085_v38 = vadd.f32 %v3069_v20, %v6195_v12  ;;  %v6313_v54 = vadd.f32 %v4361_v59, %v3163_v9  ;;  %v3168_v40 = vadd.f32 %v3160_v61, %v3083_v37  ;;  %v6315_v5 = vadd.f32 %v4361_v59, %v3164_v47  ;;  %v3343_v9 = vld [vmem:[%s6618_s9 + $0x20] sm:$0xf] }
 0x22e   : > { %v6317_v24 = vadd.f32 %v4361_v59, %v3165_v35  ;;  %v6319_v17 = vadd.f32 %v4361_v59, %v3166_v31  ;;  %v3162_v11 = vadd.f32 %v3146_v28, %v6255_v3  ;;  %v3169_v6 = vadd.f32 %v3161_v58, %v3084_v4  ;;  %v3405_v47 = vld [vmem:[%s6618_s9 + $0x20] sm:$0xf] }
 0x22f   : > { %v6322_v8 = vadd.f32 %v4361_v59, %v3167_v42  ;;  %v3183_v48 = vmax.f32 %v6313_v54, 0.0  ;;  %v3184_v18 = vmax.f32 %v6315_v5, 0.0  ;;  %v6327_v41 = vadd.f32 %v4361_v59, %v3168_v40  ;;  %v3467_v42 = vld [vmem:[%s6618_s9 + $0x20] sm:$0xf] }
 0x230   : > { %v3185_v12 = vmax.f32 %v6317_v24, 0.0  ;;  %v3170_v39 = vadd.f32 %v3162_v11, %v3085_v38  ;;  %v3186_v20 = vmax.f32 %v6319_v17, 0.0  ;;  %v6333_v3 = vadd.f32 %v4361_v59, %v3169_v6  ;;  %v3529_v11 = vld [vmem:[%s6618_s9 + $0x20] sm:$0xf] }
 0x231   : > { %v3193_v33 = vsel %vm3191_vm11, %v3184_v18, 0.0  ;;  %v3187_v52 = vmax.f32 %v6322_v8, 0.0  ;;  %v3192_v14 = vsel %vm3191_vm11, %v3183_v48, 0.0  ;;  %v4440_v7 = vmov 8.0   ;;  %v4362_v8 = vld [vmem:[%s6619_s10] ss:$0 sm:$0xff] }
 0x232   : > { %v3195_v34 = vsel %vm3191_vm11, %v3185_v12, 0.0  ;;  %v3194_v25 = vadd.f32 %v3193_v33, %v3192_v14  ;;  %4370 = vrcp.f32 %v4440_v7  ;;  %v6342_v1 = vadd.f32 %v4361_v59, %v3170_v39 }
 0x233   : > { %v3188_v49 = vmax.f32 %v6327_v41, 0.0  ;;  %v3197_v22 = vsel %vm3191_vm11, %v3186_v20, 0.0  ;;  %v3189_v26 = vmax.f32 %v6333_v3, 0.0  ;;  %v3199_v32 = vsel %vm3191_vm11, %v3187_v52, 0.0  ;;  %v4363_v41 = vld [vmem:[%s6619_s10] ss:$0 sm:$0xff] }
 0x234   : > { %v3196_v10 = vadd.f32 %v3195_v34, %v3194_v25  ;;  %v3291_v16 = vunpack.c.l.b16 %v3284_v23  ;;  %v3190_v0 = vmax.f32 %v6342_v1, 0.0  ;;  %v3365_v35 = vunpack.c.l.b16 %v3343_v9  ;;  %v4259_v34 = vld [vmem:[%s6618_s9 + $0x18] sm:$0xff]  ;;  %v4262_v23 = vld [vmem:[%s6618_s9 + $0x10] sm:$0xff] }
 0x235   : > { %v3201_v53 = vsel %vm3191_vm11, %v3188_v49, 0.0  ;;  %v3203_v56 = vsel %vm3191_vm11, %v3189_v26, 0.0  ;;  %v3427_v31 = vunpack.c.l.b16 %v3405_v47  ;;  %v3489_v40 = vunpack.c.l.b16 %v3467_v42  ;;  %v4263_v25 = vld [vmem:[%s6618_s9 + $0x18] sm:$0xff]  ;;  %v4264_v42 = vld [vmem:[%s6618_s9] sm:$0xff] }
 0x236   : > { %v3198_v43 = vadd.f32 %v3197_v22, %v3196_v10  ;;  %v3293_v51 = vpack.c.b16 %v3291_v16, %v3291_v16  ;;  %v3205_v63 = vsel %vm3191_vm11, %v3190_v0, 0.0  ;;  %v3370_v4 = vpack.c.b16 %v3365_v35, %v3365_v35  ;;  %v4261_v16 = vld [vmem:[%s6618_s9 + $0x8] sm:$0xff]  ;;  %v4275_v35 = vld [vmem:[%s6618_s9 + $0x18] sm:$0xff] }
 0x237   : > { %v3432_v38 = vpack.c.b16 %v3427_v31, %v3427_v31  ;;  %v3551_v6 = vunpack.c.l.b16 %v3529_v11  ;;  %v3494_v14 = vpack.c.b16 %v3489_v40, %v3489_v40  ;;  %v4279_v31 = vld [vmem:[%s6618_s9 + $0x18] sm:$0xff]  ;;  %v4274_v11 = vld [vmem:[%s6618_s9 + $0x10] sm:$0xff] }
 0x238   : > { %v4371_v27 = vpop.eup %4370  ;;  %v3200_v37 = vadd.f32 %v3199_v32, %v3198_v43  ;;  %v3299_v15 = vsel %vm515_vm0, %v3293_v51, 0  ;;  %v3379_v39 = vsel %vm515_vm0, %v3370_v4, 0  ;;  %v4258_v32 = vld [vmem:[%s6618_s9 + $0x10] sm:$0xff]  ;;  %v4257_v43 = vld [vmem:[%s6618_s9 + $0x8] sm:$0xff]  ;;  %v4268_v4 = vld [vmem:[%s6618_s9] sm:$0xff] }
 0x239   : > { %v3208_v50 = vmul.f32 8.0, %v4371_v27  ;;  %3307 = vmatpush.bf16.msrb.mxu1 %v3299_v15  ;;  %vm3212_vm12 = vweird.f32 %v4371_v27  ;;  %v3441_v33 = vsel %vm515_vm0, %v3432_v38, 0  ;;  %3384 = vmatpush.bf16.msrb.mxu2 %v3379_v39  ;;  %v3556_v7 = vpack.c.b16 %v3551_v6, %v3551_v6  ;;  %v4271_v15 = vld [vmem:[%s6618_s9 + $0x18] sm:$0xff]  ;;  %v4278_v6 = vld [vmem:[%s6618_s9 + $0x10] sm:$0xff] }
 0x23a   : > { %v3202_v45 = vadd.f32 %v3201_v53, %v3200_v37  ;;  %3446 = vmatpush.bf16.msrb.mxu3 %v3441_v33  ;;  %v3503_v22 = vsel %vm515_vm0, %v3494_v14, 0  ;;  %v3233_v53 = vld [vmem:[%s6615_s6] sm:$0x1]  ;;  %v4283_v39 = vld [vmem:[%s6618_s9 + $0x18] sm:$0xff]  ;;  %v4273_v14 = vld [vmem:[%s6618_s9 + $0x8] sm:$0xff] }
 0x23b   : > { %v3209_v2 = vsub.f32 1.0, %v3208_v50  ;;  %3508 = vmatpush.bf16.msra.mxu0 %v3503_v22  ;;  %v3565_v10 = vsel %vm515_vm0, %v3556_v7, 0  ;;  %v4287_v33 = vld [vmem:[%s6618_s9 + $0x18] sm:$0xff]  ;;  %v4282_v7 = vld [vmem:[%s6618_s9 + $0x10] sm:$0xff] }
 0x23c   : > { %v3204_v29 = vadd.f32 %v3203_v56, %v3202_v45  ;;  %v4267_v45 = vld [vmem:[%s6618_s9 + $0x18] sm:$0xff]  ;;  %v4286_v22 = vld [vmem:[%s6618_s9 + $0x10] sm:$0xff] }
 0x23d   : > { %v3210_v46 = vmul.f32 %v4371_v27, %v3209_v2  ;;  %3308 = vmatpush.bf16.msrb.mxu1 %v4255_v30  ;;  %3385 = vmatpush.bf16.msrb.mxu2 %v4259_v34  ;;  %v4260_v2 = vld [vmem:[%s6618_s9] sm:$0xff]  ;;  %v4266_v30 = vld [vmem:[%s6618_s9 + $0x10] sm:$0xff]  ;;  %v4277_v34 = vld [vmem:[%s6618_s9 + $0x8] sm:$0xff] }
 0x23e   : > { %v3206_v36 = vadd.f32 %v3205_v63, %v3204_v29  ;;  %3447 = vmatpush.bf16.msrb.mxu3 %v4263_v25  ;;  %v4256_v63 = vld [vmem:[%s6618_s9] sm:$0xff]  ;;  %v4270_v29 = vld [vmem:[%s6618_s9 + $0x10] sm:$0xff] }
 0x23f   : > { %v3211_v62 = vadd.f32 %v4371_v27, %v3210_v46  ;;  %3509 = vmatpush.bf16.msra.mxu0 %v4267_v45  ;;  %v3591_v46 = vld [vmem:[%s6618_s9 + $0x20] sm:$0xf] }
 0x240   : > { %v3285_v25 = vld [vmem:[%s6617_s8] sm:$0x1] }
 0x241   : > { %v3213_v57 = vsel %vm3212_vm12, %v4371_v27, %v3211_v62  ;;  %3570 = vmatpush.bf16.msra.mxu1 %v3565_v10  ;;  %3386 = vmatpush.bf16.msrb.mxu2 %v4258_v32  ;;  %v3613_v62 = vunpack.c.l.b16 %v3591_v46  ;;  %v4272_v32 = vld [vmem:[%s6618_s9] sm:$0xff] }
 0x242   : > { %v3214_v44 = vmul.f32 %v3213_v57, %v3206_v36  ;;  %3448 = vmatpush.bf16.msrb.mxu3 %v4262_v23  ;;  %v3653_v36 = vld [vmem:[%s6618_s9 + $0x20] sm:$0xf] }
 0x243   : > { %3510 = vmatpush.bf16.msra.mxu0 %v4266_v30  ;;  %v4276_v23 = vld [vmem:[%s6618_s9] sm:$0xff] }
 0x244   : > { %v3215_v55 = vsel %vm3191_vm11, %v3214_v44, 0.0  ;;  %v3715_v44 = vld [vmem:[%s6618_s9 + $0x20] sm:$0xf] }
 0x245   : > { %v3216_v59 = vrot.slane %v3215_v55, 4  ;;  %3387 = vmatpush.bf16.msrb.mxu2 %v4257_v43  ;;  %3571 = vmatpush.bf16.msra.mxu1 %v4271_v15 }
 0x246   : > { %3449 = vmatpush.bf16.msrb.mxu3 %v4261_v16  ;;  %v4281_v16 = vld [vmem:[%s6618_s9 + $0x8] sm:$0xff] }
 0x247   : > { %v3217_v13 = vadd.f32 %v3216_v59, %v3215_v55  ;;  %v3777_v55 = vld [vmem:[%s6618_s9 + $0x20] sm:$0xf]  ;;  %v3737_v59 = vunpack.c.l.b16 %v3715_v44 }
 0x249   : > { %v3218_v21 = vrot.slane %v3217_v13, 2  ;;  %3388 = vmatpush.bf16.msrb.mxu2 %v4256_v63  ;;  %3572 = vmatpush.bf16.msra.mxu1 %v4270_v29  ;;  %v3742_v9 = vpack.c.b16 %v3737_v59, %v3737_v59 }
 0x24a   : > { %3450 = vmatpush.bf16.msrb.mxu3 %v4260_v2 }
 0x24b   : > { %v3219_v19 = vadd.f32 %v3218_v21, %v3217_v13  ;;  %v3799_v13 = vunpack.c.l.b16 %v3777_v55  ;;  %v4265_v21 = vld [vmem:[%s6618_s9 + $0x8] sm:$0xff]  ;;  %v3751_v38 = vsel %vm515_vm0, %v3742_v9, 0 }
 0x24c   : > { %3511 = vmatpush.bf16.msra.mxu0 %v4265_v21 }
 0x24d   : > { %v3220_v60 = vrot.slane %v3219_v19, 1  ;;  %v3804_v47 = vpack.c.b16 %v3799_v13, %v3799_v13 }
 0x24f   : > { %v3221_v28 = vadd.f32 %v3220_v60, %v3219_v19  ;;  %v4269_v19 = vld [vmem:[%s6618_s9 + $0x8] sm:$0xff]  ;;  %v3618_v60 = vpack.c.b16 %v3613_v62, %v3613_v62  ;;  %v3813_v40 = vsel %vm515_vm0, %v3804_v47, 0 }
 0x250   : > { %3573 = vmatpush.bf16.msra.mxu1 %v4269_v19  ;;  %3512 = vmatpush.bf16.msra.mxu0 %v4264_v42  ;;  %v4367_v42 = vld [vmem:[%s6619_s10] ss:$0 sm:$0xff] }
 0x251   : > { %v3222_v61 = vmul.f32 %v3221_v28, %v3213_v57  ;;  %v3675_v57 = vunpack.c.l.b16 %v3653_v36 }
 0x253   : > { %v3223_v58 = vpack.c.bf16 %v3222_v61, %v3222_v61  ;;  %v3680_v28 = vpack.c.b16 %v3675_v57, %v3675_v57  ;;  %v3627_v61 = vsel %vm515_vm0, %v3618_v60, 0 }
 0x254   : > { %3632 = vmatpush.bf16.msra.mxu2 %v3627_v61  ;;  %3574 = vmatpush.bf16.msra.mxu1 %v4268_v4 }
 0x255   : > { %4076 = vmatmul.msk.bf16.vlgmr.msrb.gmra.mxu0 %vm3191_vm11, %v3223_v58  ;;  %v3689_v58 = vsel %vm515_vm0, %v3680_v28, 0 }
 0x256   : > { %3694 = vmatpush.bf16.msra.mxu3 %v3689_v58  ;;  %3756 = vmatpush.bf16.msrb.mxu0 %v3751_v38 }
 0x258   : > { %3633 = vmatpush.bf16.msra.mxu2 %v4275_v35 }
 0x25a   : > { %3695 = vmatpush.bf16.msra.mxu3 %v4279_v31  ;;  %3757 = vmatpush.bf16.msrb.mxu0 %v4283_v39  ;;  %v4366_v31 = vld [vmem:[%s6619_s10] ss:$0 sm:$0xff] }
 0x25b   : > { %v4369_v39 = vld [vmem:[%s6619_s10] ss:$0 sm:$0xff] }
 0x25c   : > { %3634 = vmatpush.bf16.msra.mxu2 %v4274_v11 }
 0x25e   : > { %3696 = vmatpush.bf16.msra.mxu3 %v4278_v6  ;;  %3758 = vmatpush.bf16.msrb.mxu0 %v4282_v7  ;;  %v4368_v6 = vld [vmem:[%s6619_s10] ss:$0 sm:$0xff] }
 0x260   : > { %3635 = vmatpush.bf16.msra.mxu2 %v4273_v14 }
 0x262   : > { %3697 = vmatpush.bf16.msra.mxu3 %v4277_v34  ;;  %3759 = vmatpush.bf16.msrb.mxu0 %v4281_v16 }
 0x264   : > { %3636 = vmatpush.bf16.msra.mxu2 %v4272_v32 }
 0x266   : > { %3698 = vmatpush.bf16.msra.mxu3 %v4276_v23 }
 0x2d2   : > { %v3276_v27 = vpop.f32.mrf.mxu0 }
 0x2d3   : > { %v3277_v37 = vadd.f32 %v3276_v27, %v3233_v53  ;;  %v4285_v53 = vld [vmem:[%s6618_s9 + $0x8] sm:$0xff] }
 0x2d5   : > { %v3280_v51 = vmax.f32 %v3277_v37, 0.0 }
 0x2d7   : > { %v3281_v56 = vpack.c.bf16 %v3280_v51, %v3280_v51  ;;  %v4280_v51 = vld [vmem:[%s6618_s9] sm:$0xff] }
 0x2d8   : > { %3760 = vmatpush.bf16.msrb.mxu0 %v4280_v51 }
 0x2d9   : > { %4081 = vmatmul.msk.bf16.vlgmr.msrb.gmra.mxu1 %vm502_vm1, %v3281_v56  ;;  %v4284_v56 = vld [vmem:[%s6618_s9] sm:$0xff] }
 0x2da   : > { %v3278_v50 = vpop.f32.mrf.mxu0  ;;  %3818 = vmatpush.bf16.msrb.mxu1 %v3813_v40 }
 0x2de   : > { %3819 = vmatpush.bf16.msrb.mxu1 %v4287_v33 }
 0x2e2   : > { %3820 = vmatpush.bf16.msrb.mxu1 %v4286_v22 }
 0x2e6   : > { %3821 = vmatpush.bf16.msrb.mxu1 %v4285_v53 }
 0x2ea   : > { %3822 = vmatpush.bf16.msrb.mxu1 %v4284_v56 }
 0x356   : > { %v3310_v10 = vpop.f32.mrf.mxu1 }
 0x357   : > { %v3311_v43 = vadd.f32 %v3310_v10, %v3285_v25 }
 0x359   : > { %v3314_v27 = vadd.f32 3.0, %v3311_v43 }
 0x35b   : > { %v3315_v37 = vmax.f32 %v3314_v27, 0.0 }
 0x35d   : > { %v3316_v50 = vmin.f32 %v3315_v37, 6.0 }
 0x35e   : > { %v3312_v45 = vpop.f32.mrf.mxu1 }
 0x35f   : > { %v3317_v15 = vmul.f32 0.16666667, %v3316_v50 }
 0x361   : > { %v3318_v63 = vperm.slane %v3317_v15, 0 }
 0x363   : > { %v3319_v2 = vmul.f32 %v3318_v63, %v3183_v48  ;;  %v3320_v30 = vmul.f32 %v3318_v63, %v3184_v18  ;;  %v3321_v29 = vmul.f32 %v3318_v63, %v3185_v12  ;;  %v3322_v46 = vmul.f32 %v3318_v63, %v3186_v20 }
 0x364   : > { %v3323_v54 = vmul.f32 %v3318_v63, %v3187_v52  ;;  %v3324_v5 = vmul.f32 %v3318_v63, %v3188_v49  ;;  %v3325_v24 = vmul.f32 %v3318_v63, %v3189_v26  ;;  %v3326_v17 = vmul.f32 %v3318_v63, %v3190_v0  ;;  %v4364_v26 = vld [vmem:[%s6619_s10] ss:$0 sm:$0xff] }
 0x365   : > { %v3327_v36 = vpack.c.bf16 %v3319_v2, %v3319_v2  ;;  %v3328_v62 = vpack.c.bf16 %v3320_v30, %v3320_v30  ;;  %v3329_v57 = vpack.c.bf16 %v3321_v29, %v3321_v29  ;;  %v3330_v44 = vpack.c.bf16 %v3322_v46, %v3322_v46  ;;  %v4365_v0 = vld [vmem:[%s6619_s10] ss:$0 sm:$0xff] }
 0x366   : > { %v3331_v48 = vpack.c.bf16 %v3323_v54, %v3323_v54  ;;  %v3332_v18 = vpack.c.bf16 %v3324_v5, %v3324_v5  ;;  %v3333_v12 = vpack.c.bf16 %v3325_v24, %v3325_v24  ;;  %v3334_v20 = vpack.c.bf16 %v3326_v17, %v3326_v17 }
 0x367   : > { %4098 = vmatmul.msk.bf16.vlgmr.msrb.gmra.mxu2 %vm3191_vm11, %v3327_v36  ;;  %4115 = vmatmul.msk.bf16.vlgmr.msrb.gmra.mxu3 %vm3191_vm11, %v3328_v62 }
 0x368   : > { %4133 = vmatmul.msk.bf16.vlgmr.msra.gmra.mxu0 %vm3191_vm11, %v3329_v57  ;;  %4151 = vmatmul.msk.bf16.vlgmr.msra.gmra.mxu1 %vm3191_vm11, %v3330_v44 }
 0x377   : > { %4169 = vmatmul.msk.bf16.vlgmr.msra.gmra.mxu2 %vm3191_vm11, %v3331_v48  ;;  %4187 = vmatmul.msk.bf16.vlgmr.msra.gmra.mxu3 %vm3191_vm11, %v3332_v18 }
 0x378   : > { %4205 = vmatmul.msk.bf16.vlgmr.msrb.gmra.mxu0 %vm3191_vm11, %v3333_v12  ;;  %4223 = vmatmul.msk.bf16.vlgmr.msrb.gmra.mxu1 %vm3191_vm11, %v3334_v20 }
 0x3e5   : > { %v3514_v3 = vpop.f32.mrf.mxu0  ;;  %v3576_v52 = vpop.f32.mrf.mxu1 }
 0x3e6   : > { %v3515_v1 = vadd.f32 %v4362_v8, %v3514_v3  ;;  %v3577_v49 = vadd.f32 %v4363_v41, %v3576_v52 }
 0x3e8   : > { %v3518_v55 = vpack.c.bf16 %v3515_v1, %v3515_v1  ;;  %v3580_v59 = vpack.c.bf16 %v3577_v49, %v3577_v49 }
 0x3ea   : > { %4134 = vst.msk [vmem:[%s6545_s16 + $0x8] sm:$0xf] %vm3395_vm13, %v3518_v55  ;;  %v3390_v13 = vpop.f32.mrf.mxu2  ;;  %v3452_v21 = vpop.f32.mrf.mxu3 }
 0x3eb   : > { %4152 = vst.msk [vmem:[%s6545_s16 + $0xc] sm:$0xf] %vm3395_vm13, %v3580_v59  ;;  %v3391_v19 = vadd.f32 %v4364_v26, %v3390_v13  ;;  %v3453_v60 = vadd.f32 %v4365_v0, %v3452_v21 }
 0x3ed   : > { %v3394_v28 = vpack.c.bf16 %v3391_v19, %v3391_v19  ;;  %v3456_v61 = vpack.c.bf16 %v3453_v60, %v3453_v60  ;;  %v3516_v58 = vpop.f32.mrf.mxu0  ;;  %v3578_v9 = vpop.f32.mrf.mxu1 }
 0x3ef   : > { %3396 = vst.msk [vmem:[%s6545_s16] sm:$0xf] %vm3395_vm13, %v3394_v28 }
 0x3f0   : > { %4116 = vst.msk [vmem:[%s6545_s16 + $0x4] sm:$0xf] %vm3395_vm13, %v3456_v61 }
 0x3f2   : > { %v3392_v47 = vpop.f32.mrf.mxu2  ;;  %v3454_v35 = vpop.f32.mrf.mxu3 }
 0x3f5   : > { %v3762_v4 = vpop.f32.mrf.mxu0  ;;  %v3824_v38 = vpop.f32.mrf.mxu1 }
 0x3f6   : > { %v3763_v40 = vadd.f32 %v4366_v31, %v3762_v4  ;;  %v3825_v11 = vadd.f32 %v4367_v42, %v3824_v38 }
 0x3f8   : > { %v3766_v33 = vpack.c.bf16 %v3763_v40, %v3763_v40  ;;  %v3828_v14 = vpack.c.bf16 %v3825_v11, %v3825_v11 }
 0x3fa   : > { %4206 = vst.msk [vmem:[%s6545_s16 + $0x18] sm:$0xf] %vm3395_vm13, %v3766_v33  ;;  %v3638_v34 = vpop.f32.mrf.mxu2  ;;  %v3700_v25 = vpop.f32.mrf.mxu3 }
 0x3fb   : > { %4224 = vst.msk [vmem:[%s6545_s16 + $0x1c] sm:$0xf] %vm3395_vm13, %v3828_v14  ;;  %v3639_v7 = vadd.f32 %v4368_v6, %v3638_v34  ;;  %v3701_v22 = vadd.f32 %v4369_v39, %v3700_v25 }
 0x3fd   : > { %v3642_v10 = vpack.c.bf16 %v3639_v7, %v3639_v7  ;;  %v3704_v32 = vpack.c.bf16 %v3701_v22, %v3701_v22  ;;  %v3764_v23 = vpop.f32.mrf.mxu0  ;;  %v3826_v43 = vpop.f32.mrf.mxu1 }
 0x3ff   : > { %4170 = vst.msk [vmem:[%s6545_s16 + $0x10] sm:$0xf] %vm3395_vm13, %v3642_v10 }
 0x400   : > { %4188 = vst.msk [vmem:[%s6545_s16 + $0x14] sm:$0xf] %vm3395_vm13, %v3704_v32 }
 0x401   : > { %4402 = shalt.err (!%p4399_p3)
}
 0x402   : > { %s4441_s16 = smov 64   ;;  %s4442_s29 = smov 4   ;;  %v3640_v16 = vpop.f32.mrf.mxu2  ;;  %v3702_v53 = vpop.f32.mrf.mxu3 }
 0x403   : > { %4289 = dma.vmem_to_hbm [thread:$0]  (%p4541_p5), %s3845_s21, 512, %s3847_s15, %s3832_s30, %s4441_s16, %s4441_s16, %s4442_s29  }
 0x404 PF: > { %p4295_p4 = scmp.ge.s32.totalorder %s4437_s20, 2  ;;  %s3861_s14 = sand.u32 1, %s4425_s17  }
 0x405   : > { %s3862_s0 = scalar_lea.sflag [#allocation4], %s3861_s14 }
 0x406   : > { %p4292_p7 = pnand %p4295_p4, %p4545_p6 }
 0x408   : > { %p4293_p8 = pneg %p4292_p7 }
 0x40a   : > { %4420 = dma.done.wait (%p4293_p8), %s3862_s0, 512  }
 0x40b   : > { %4422 = vsyncadd (%p4293_p8), %s3862_s0, 4294966784  ;;  %p21_p5 = scmp.ge.s32.totalorder %s4528_s23, 4   ;;  %s7030_s17 = smov %s4429_s18 }
 0x40c   : > { %s7031_s18 = smov %s4433_s19  ;;  %s7032_s19 = smov %s4539_s26 }
 0x40d   : > { %s7033_s20 = smov %s4528_s23  ;;  %23 = sbr.rel (!%p21_p5) target bundleno = 5 (0x5), region = 172 }
 0x412   :  { %3868 = vsyncpa [#allocation4], 1 }
 0x413   :  { %3870 = vsyncpa [#allocation4 + $0x1], 1 }

</bundles_post_ra>
